<compile_context>
chip_gen: v5e
topology: v5e:2x2
jax: 0.10.0
libtpu: 0.0.40
codegen_flags: <defaults>
</compile_context>

<pallas_src>
import numpy as np
import jax
import jax.numpy as jnp
from jax.experimental import pallas as pl
from jax.experimental.pallas import tpu as pltpu


# ----------------------------------------------------------------------------
# In-kernel helpers (pure jnp on values; everything stays in vregs/VMEM)
# ----------------------------------------------------------------------------
def _pad1_hw(x):
    """Zero-pad a (H, W, C) value by 1 on both sides of H and W."""
    H, W, C = x.shape
    zr = jnp.zeros((1, W, C), x.dtype)
    x = jnp.concatenate([zr, x, zr], axis=0)           # (H+2, W, C)
    zc = jnp.zeros((H + 2, 1, C), x.dtype)
    return jnp.concatenate([zc, x, zc], axis=1)        # (H+2, W+2, C)


def _im2col(xp, oy, ox, kh, kw, ho, wo):
    """im2col on a padded (Hp, Wp, C) value -> (ho*wo, kh*kw*C).

    Column order is (ky, kx, c) with c fastest, matching the weight layouts
    produced by conv_w_to_mat / convT_w_to_phase_mats.
    """
    c = xp.shape[-1]
    cols = []
    for ky in range(kh):
        for kx in range(kw):
            cols.append(
                xp[oy + ky:oy + ky + ho, ox + kx:ox + kx + wo, :].reshape(ho * wo, c))
    return jnp.concatenate(cols, axis=-1)


# ----------------------------------------------------------------------------
# The fused decoder kernel (one image per grid step)
# ----------------------------------------------------------------------------
def _decoder_kernel(x_ref, w1_ref, b1_ref, rw1_ref, rw2_ref,
                    wt1_ref, bt1_ref, wt2_ref, bt2_ref, perm_ref, o_ref):
    bf16, f32 = jnp.bfloat16, jnp.float32
    H, W, _ = x_ref.shape
    Hd = b1_ref.shape[-1]
    Hd2 = bt1_ref.shape[-1]
    n_res = rw1_ref.shape[0]

    # ---- conv_1: Conv2d(Cin -> Hd, k=3, s=1, p=1) + bias (one matmul, K=9*Cin)
    x = x_ref[...].astype(bf16)
    patch = _im2col(_pad1_hw(x), 0, 0, 3, 3, H, W)                  # (H*W, 9*Cin)
    y = jnp.dot(patch, w1_ref[...], preferred_element_type=f32) + b1_ref[...]

    # ---- residual stack: y += conv1x1(relu(conv3x3(relu(y)))), no biases
    for i in range(n_res):
        h = jnp.maximum(y, 0.0).astype(bf16).reshape(H, W, Hd)
        pm = _im2col(_pad1_hw(h), 0, 0, 3, 3, H, W)                 # (H*W, 9*Hd)
        t = jnp.dot(pm, rw1_ref[i], preferred_element_type=f32)
        t = jnp.maximum(t, 0.0).astype(bf16)
        y = y + jnp.dot(t, rw2_ref[i], preferred_element_type=f32)

    # final ReLU of the residual stack
    y = jnp.maximum(y, 0.0)

    # ---- conv_trans_1: ConvTranspose2d(Hd -> Hd//2, k=4, s=2, p=1) + ReLU,
    # as 4 sub-pixel phases, each a 2x2 conv on the un-upsampled input.
    yp = _pad1_hw(y.astype(bf16).reshape(H, W, Hd))                 # (H+2, W+2, Hd)
    phases = []
    for ry in range(2):
        for rx in range(2):
            pm = _im2col(yp, ry, rx, 2, 2, H, W)                    # (H*W, 4*Hd)
            o = jnp.dot(pm, wt1_ref[ry * 2 + rx],
                        preferred_element_type=f32) + bt1_ref[...]
            phases.append(jnp.maximum(o, 0.0).astype(bf16))         # (H*W, Hd2)
    # interleave the 4 phase outputs into the row-major (2H, 2W) map with one
    # permutation matmul (avoids strided scatters / awkward reshapes).
    stacked = jnp.concatenate(phases, axis=0)                       # (4*H*W, Hd2)
    y1 = jnp.dot(perm_ref[...], stacked, preferred_element_type=f32)

    # ---- conv_trans_2: ConvTranspose2d(Hd//2 -> 3, k=4, s=2, p=1); phase-major out
    H2, W2 = 2 * H, 2 * W
    y1p = _pad1_hw(y1.astype(bf16).reshape(H2, W2, Hd2))            # (2H+2, 2W+2, Hd2)
    for ry in range(2):
        for rx in range(2):
            pm = _im2col(y1p, ry, rx, 2, 2, H2, W2)                 # (4*H*W, 4*Hd2)
            o = jnp.dot(pm, wt2_ref[ry * 2 + rx],
                        preferred_element_type=f32) + bt2_ref[...]  # (4*H*W, 3)
            o_ref[ry * 2 + rx] = o


# ----------------------------------------------------------------------------
# pallas_call wrapper
# ----------------------------------------------------------------------------
def _interleave_perm(H, W):
    """(4*H*W, 4*H*W) permutation: stacked phase rows -> row-major (2H, 2W) rows."""
    M = H * W
    qy, qx = np.meshgrid(np.arange(H), np.arange(W), indexing="ij")
    qy, qx = qy.reshape(-1), qx.reshape(-1)
    P = np.zeros((4 * M, 4 * M), np.float32)
    for ry in range(2):
        for rx in range(2):
            rows = (2 * qy + ry) * (2 * W) + (2 * qx + rx)
            cols = (ry * 2 + rx) * M + np.arange(M)
            P[rows, cols] = 1.0
    return P


@jax.jit
def decoder_forward(x, params):
    """x: (N, H, W, Cin) float32 NHWC -> (N, 4H, 4W, 3) float32 NHWC."""
    N, H, W, Cin = x.shape
    perm = jnp.asarray(_interleave_perm(H, W), dtype=jnp.bfloat16)

    def full_spec(a):
        r = a.ndim
        return pl.BlockSpec(a.shape, lambda *_: (0,) * r)

    out_ph = pl.pallas_call(
        _decoder_kernel,
        out_shape=jax.ShapeDtypeStruct((N, 4, 4 * H * W, 3), jnp.float32),
        grid=(N,),
        in_specs=[
            pl.BlockSpec((pl.Squeezed(), H, W, Cin), lambda n: (n, 0, 0, 0)),
            full_spec(params["w1"]),
            full_spec(params["b1"]),
            full_spec(params["rw1"]),
            full_spec(params["rw2"]),
            full_spec(params["wt1"]),
            full_spec(params["bt1"]),
            full_spec(params["wt2"]),
            full_spec(params["bt2"]),
            full_spec(perm),
        ],
        out_specs=pl.BlockSpec((pl.Squeezed(), 4, 4 * H * W, 3),
                               lambda n: (n, 0, 0, 0)),
        compiler_params=pltpu.CompilerParams(dimension_semantics=("parallel",)),
    )(x, params["w1"], params["b1"], params["rw1"], params["rw2"],
      params["wt1"], params["bt1"], params["wt2"], params["bt2"], perm)

    # phase-major -> NHWC: out_ph[n, ry*2+rx, qy*2W+qx, c] = y[n, 2qy+ry, 2qx+rx, c]
    out = out_ph.reshape(N, 2, 2, 2 * H, 2 * W, 3)
    out = out.transpose(0, 3, 1, 4, 2, 5).reshape(N, 4 * H, 4 * W, 3)
    return out


# ----------------------------------------------------------------------------
# Weight layout conversion (PyTorch layouts -> kernel matmul layouts)
# ----------------------------------------------------------------------------
def conv_w_to_mat(w):
    """torch Conv2d weight (Cout, Cin, KH, KW) -> (KH*KW*Cin, Cout)."""
    Cout, Cin, KH, KW = w.shape
    return jnp.transpose(w, (2, 3, 1, 0)).reshape(KH * KW * Cin, Cout)


def convT_w_to_phase_mats(w):
    """torch ConvTranspose2d weight (Cin, Cout, 4, 4) -> (4, 4*Cin, Cout).

    Phase p = ry*2 + rx.  Rows ordered (dy, dx, ci) with ci fastest, matching
    the 2x2 im2col used in the kernel on an input zero-padded by 1.
    """
    def tap(r, d):
        return (3 - 2 * d) if r == 0 else (2 - 2 * d)

    mats = []
    for ry in range(2):
        for rx in range(2):
            blocks = []
            for dy in range(2):
                for dx in range(2):
                    blocks.append(w[:, :, tap(ry, dy), tap(rx, dx)])   # (Cin, Cout)
            mats.append(jnp.concatenate(blocks, axis=0))               # (4*Cin, Cout)
    return jnp.stack(mats, axis=0)


# ----------------------------------------------------------------------------
# Parameter init (PyTorch defaults) and kernel-layout preparation
# ----------------------------------------------------------------------------
def init_torch_params(key, in_channels, num_hiddens, num_residual_layers,
                      num_residual_hiddens):
    """PyTorch default-initialised weights kept in torch layouts (f32)."""
    # TODO(synk): use_kaiming_normal=True branch (weight_norm + kaiming init) not implemented.
    half = num_hiddens // 2
    ks = jax.random.split(key, 6 + 2 * num_residual_layers)

    def u(k, shape, fan_in):
        b = 1.0 / np.sqrt(fan_in)
        return jax.random.uniform(k, shape, jnp.float32, -b, b)

    tp = {}
    tp["w1"] = u(ks[0], (num_hiddens, in_channels, 3, 3), in_channels * 9)
    tp["b1"] = u(ks[1], (num_hiddens,), in_channels * 9)
    tp["res"] = []
    for i in range(num_residual_layers):
        w3 = u(ks[2 + 2 * i], (num_residual_hiddens, num_hiddens, 3, 3),
               num_hiddens * 9)
        w1x1 = u(ks[3 + 2 * i], (num_hiddens, num_residual_hiddens, 1, 1),
                 num_residual_hiddens)
        tp["res"].append((w3, w1x1))
    j = 2 + 2 * num_residual_layers
    # torch ConvTranspose2d default init uses fan_in = Cout * KH * KW
    tp["wt1"] = u(ks[j + 0], (num_hiddens, half, 4, 4), half * 16)
    tp["bt1"] = u(ks[j + 1], (half,), half * 16)
    tp["wt2"] = u(ks[j + 2], (half, 3, 4, 4), 3 * 16)
    tp["bt2"] = u(ks[j + 3], (3,), 3 * 16)
    return tp


def prepare_params(tp):
    """Torch-layout weights -> kernel matmul layouts (bf16 MXU operands, f32 biases)."""
    bf16 = jnp.bfloat16
    return {
        "w1": conv_w_to_mat(tp["w1"]).astype(bf16),
        "b1": tp["b1"].reshape(1, -1),
        "rw1": jnp.stack([conv_w_to_mat(w3) for w3, _ in tp["res"]]).astype(bf16),
        "rw2": jnp.stack([conv_w_to_mat(w1) for _, w1 in tp["res"]]).astype(bf16),
        "wt1": convT_w_to_phase_mats(tp["wt1"]).astype(bf16),
        "bt1": tp["bt1"].reshape(1, -1),
        "wt2": convT_w_to_phase_mats(tp["wt2"]).astype(bf16),
        "bt2": tp["bt2"].reshape(1, -1),
    }


# ----------------------------------------------------------------------------
# Pure-JAX/XLA reference (for a numerical sanity check)
# ----------------------------------------------------------------------------
def _conv2d_ref(x, w, b, padding):
    rhs = jnp.transpose(w, (2, 3, 1, 0))                  # (KH, KW, Cin, Cout)
    y = jax.lax.conv_general_dilated(
        x, rhs, window_strides=(1, 1),
        padding=((padding, padding), (padding, padding)),
        dimension_numbers=("NHWC", "HWIO", "NHWC"))
    return y if b is None else y + b


def _convT_ref(x, w, b):
    # ConvTranspose2d(k=4, s=2, p=1) == lhs-dilated conv with flipped kernel.
    rhs = jnp.transpose(jnp.flip(w, (2, 3)), (2, 3, 0, 1))
    y = jax.lax.conv_general_dilated(
        x, rhs, window_strides=(1, 1), padding=((2, 2), (2, 2)),
        lhs_dilation=(2, 2), dimension_numbers=("NHWC", "HWIO", "NHWC"))
    return y + b


def decoder_reference(x, tp):
    y = _conv2d_ref(x, tp["w1"], tp["b1"], 1)
    for w3, w1x1 in tp["res"]:
        h = jax.nn.relu(y)
        h = _conv2d_ref(h, w3, None, 1)
        h = jax.nn.relu(h)
        h = _conv2d_ref(h, w1x1, None, 0)
        y = y + h
    y = jax.nn.relu(y)
    y = jax.nn.relu(_convT_ref(y, tp["wt1"], tp["bt1"]))
    return _convT_ref(y, tp["wt2"], tp["bt2"])


# ----------------------------------------------------------------------------
if __name__ == "__main__":
    key = jax.random.PRNGKey(0)
    k_param, k_x = jax.random.split(key)

    N, H, W = 2, 8, 8             # VQ-VAE CIFAR latent 8x8 -> 32x32x3 output
    in_channels = 4
    num_hiddens = 32
    num_residual_layers = 2
    num_residual_hiddens = 16

    tp = init_torch_params(k_param, in_channels, num_hiddens,
                           num_residual_layers, num_residual_hiddens)
    params = prepare_params(tp)

    # NHWC input (a PyTorch NCHW input corresponds to x.transpose(0, 2, 3, 1)).
    x = jax.random.normal(k_x, (N, H, W, in_channels), jnp.float32)

    out = jax.block_until_ready(decoder_forward(x, params))
    assert out.shape == (N, 4 * H, 4 * W, 3), out.shape
    assert out.dtype == jnp.float32

    # Numerical sanity check vs. pure-XLA reference (bf16 MXU tolerance).
    ref = jax.block_until_ready(decoder_reference(x, tp))
    np.testing.assert_allclose(np.asarray(out), np.asarray(ref),
                               rtol=2e-2, atol=2e-2)
    print("KERNEL_OK")
</pallas_src>

<mosaic_0001>
module attributes {stable_mosaic.version = 11 : i64} {
  func.func @_decoder_kernel(%arg0: i32, %arg1: memref<1x8x8x4xf32, #tpu.memory_space<vmem>>, %arg2: memref<36x32xbf16, #tpu.memory_space<vmem>>, %arg3: memref<1x32xf32, #tpu.memory_space<vmem>>, %arg4: memref<2x288x16xbf16, #tpu.memory_space<vmem>>, %arg5: memref<2x16x32xbf16, #tpu.memory_space<vmem>>, %arg6: memref<4x128x16xbf16, #tpu.memory_space<vmem>>, %arg7: memref<1x16xf32, #tpu.memory_space<vmem>>, %arg8: memref<4x64x3xbf16, #tpu.memory_space<vmem>>, %arg9: memref<1x3xf32, #tpu.memory_space<vmem>>, %arg10: memref<256x256xbf16, #tpu.memory_space<vmem>>, %arg11: memref<1x4x256x3xf32, #tpu.memory_space<vmem>>) attributes {dimension_semantics = [#tpu.dimension_semantics<parallel>], iteration_bounds = array<i64: 2>, scalar_prefetch = 0 : i64, scratch_operands = 0 : i64, tpu.core_type = #tpu.core_type<tc>, window_params = [{transform_indices = @transform_0, window_bounds = array<i64: 1, 8, 8, 4>}, {pipeline_mode = #tpu.pipeline_mode<synchronous>, transform_indices = @transform_1, window_bounds = array<i64: 36, 32>}, {pipeline_mode = #tpu.pipeline_mode<synchronous>, transform_indices = @transform_2, window_bounds = array<i64: 1, 32>}, {pipeline_mode = #tpu.pipeline_mode<synchronous>, transform_indices = @transform_3, window_bounds = array<i64: 2, 288, 16>}, {pipeline_mode = #tpu.pipeline_mode<synchronous>, transform_indices = @transform_4, window_bounds = array<i64: 2, 16, 32>}, {pipeline_mode = #tpu.pipeline_mode<synchronous>, transform_indices = @transform_5, window_bounds = array<i64: 4, 128, 16>}, {pipeline_mode = #tpu.pipeline_mode<synchronous>, transform_indices = @transform_6, window_bounds = array<i64: 1, 16>}, {pipeline_mode = #tpu.pipeline_mode<synchronous>, transform_indices = @transform_7, window_bounds = array<i64: 4, 64, 3>}, {pipeline_mode = #tpu.pipeline_mode<synchronous>, transform_indices = @transform_8, window_bounds = array<i64: 1, 3>}, {pipeline_mode = #tpu.pipeline_mode<synchronous>, transform_indices = @transform_9, window_bounds = array<i64: 256, 256>}, {transform_indices = @transform_10, window_bounds = array<i64: 1, 4, 256, 3>}]} {
    %c0 = arith.constant 0 : index
    %c0_0 = arith.constant 0 : index
    %c0_1 = arith.constant 0 : index
    %c0_2 = arith.constant 0 : index
    %0 = vector.load %arg1[%c0, %c0_0, %c0_1, %c0_2] : memref<1x8x8x4xf32, #tpu.memory_space<vmem>>, vector<1x8x8x4xf32>
    %1 = vector.shape_cast %0 : vector<1x8x8x4xf32> to vector<8x8x4xf32>
    %2 = arith.truncf %1 : vector<8x8x4xf32> to vector<8x8x4xbf16>
    %cst = arith.constant 0.000000e+00 : bf16
    %3 = vector.broadcast %cst : bf16 to vector<1x8x4xbf16>
    %4 = tpu.concatenate %3, %2, %3 in 0 : vector<1x8x4xbf16>, vector<8x8x4xbf16>, vector<1x8x4xbf16> -> vector<10x8x4xbf16>
    %cst_3 = arith.constant 0.000000e+00 : bf16
    %5 = vector.broadcast %cst_3 : bf16 to vector<10x1x4xbf16>
    %6 = tpu.concatenate %5, %4, %5 in 1 : vector<10x1x4xbf16>, vector<10x8x4xbf16>, vector<10x1x4xbf16> -> vector<10x10x4xbf16>
    %7 = vector.extract_strided_slice %6 {offsets = [0, 0, 0], sizes = [8, 8, 4], strides = [1, 1, 1]} : vector<10x10x4xbf16> to vector<8x8x4xbf16>
    %8 = vector.shape_cast %7 : vector<8x8x4xbf16> to vector<64x4xbf16>
    %9 = vector.extract_strided_slice %6 {offsets = [0, 1, 0], sizes = [8, 8, 4], strides = [1, 1, 1]} : vector<10x10x4xbf16> to vector<8x8x4xbf16>
    %10 = vector.shape_cast %9 : vector<8x8x4xbf16> to vector<64x4xbf16>
    %11 = vector.extract_strided_slice %6 {offsets = [0, 2, 0], sizes = [8, 8, 4], strides = [1, 1, 1]} : vector<10x10x4xbf16> to vector<8x8x4xbf16>
    %12 = vector.shape_cast %11 : vector<8x8x4xbf16> to vector<64x4xbf16>
    %13 = vector.extract_strided_slice %6 {offsets = [1, 0, 0], sizes = [8, 8, 4], strides = [1, 1, 1]} : vector<10x10x4xbf16> to vector<8x8x4xbf16>
    %14 = vector.shape_cast %13 : vector<8x8x4xbf16> to vector<64x4xbf16>
    %15 = vector.extract_strided_slice %6 {offsets = [1, 1, 0], sizes = [8, 8, 4], strides = [1, 1, 1]} : vector<10x10x4xbf16> to vector<8x8x4xbf16>
    %16 = vector.shape_cast %15 : vector<8x8x4xbf16> to vector<64x4xbf16>
    %17 = vector.extract_strided_slice %6 {offsets = [1, 2, 0], sizes = [8, 8, 4], strides = [1, 1, 1]} : vector<10x10x4xbf16> to vector<8x8x4xbf16>
    %18 = vector.shape_cast %17 : vector<8x8x4xbf16> to vector<64x4xbf16>
    %19 = vector.extract_strided_slice %6 {offsets = [2, 0, 0], sizes = [8, 8, 4], strides = [1, 1, 1]} : vector<10x10x4xbf16> to vector<8x8x4xbf16>
    %20 = vector.shape_cast %19 : vector<8x8x4xbf16> to vector<64x4xbf16>
    %21 = vector.extract_strided_slice %6 {offsets = [2, 1, 0], sizes = [8, 8, 4], strides = [1, 1, 1]} : vector<10x10x4xbf16> to vector<8x8x4xbf16>
    %22 = vector.shape_cast %21 : vector<8x8x4xbf16> to vector<64x4xbf16>
    %23 = vector.extract_strided_slice %6 {offsets = [2, 2, 0], sizes = [8, 8, 4], strides = [1, 1, 1]} : vector<10x10x4xbf16> to vector<8x8x4xbf16>
    %24 = vector.shape_cast %23 : vector<8x8x4xbf16> to vector<64x4xbf16>
    %25 = tpu.concatenate %8, %10, %12, %14, %16, %18, %20, %22, %24 in 1 : vector<64x4xbf16>, vector<64x4xbf16>, vector<64x4xbf16>, vector<64x4xbf16>, vector<64x4xbf16>, vector<64x4xbf16>, vector<64x4xbf16>, vector<64x4xbf16>, vector<64x4xbf16> -> vector<64x36xbf16>
    %c0_4 = arith.constant 0 : index
    %c0_5 = arith.constant 0 : index
    %26 = vector.load %arg2[%c0_4, %c0_5] : memref<36x32xbf16, #tpu.memory_space<vmem>>, vector<36x32xbf16>
    %cst_6 = arith.constant dense<0.000000e+00> : vector<64x32xf32>
    %27 = tpu.matmul %25, %26, %cst_6 {dimension_numbers = #tpu.dot_dimension_numbers<[1], [0], [0], [1], [0, 0, 1, 1], [], []>} : vector<64x36xbf16>, vector<36x32xbf16>, vector<64x32xf32> -> vector<64x32xf32>
    %c0_7 = arith.constant 0 : index
    %c0_8 = arith.constant 0 : index
    %28 = vector.load %arg3[%c0_7, %c0_8] : memref<1x32xf32, #tpu.memory_space<vmem>>, vector<1x32xf32>
    %29 = vector.broadcast %28 : vector<1x32xf32> to vector<64x32xf32>
    %30 = arith.addf %27, %29 : vector<64x32xf32>
    %cst_9 = arith.constant 0.000000e+00 : f32
    %31 = vector.broadcast %cst_9 : f32 to vector<64x32xf32>
    %32 = arith.maximumf %30, %31 : vector<64x32xf32>
    %33 = arith.truncf %32 : vector<64x32xf32> to vector<64x32xbf16>
    %34 = vector.shape_cast %33 : vector<64x32xbf16> to vector<8x8x32xbf16>
    %cst_10 = arith.constant 0.000000e+00 : bf16
    %35 = vector.broadcast %cst_10 : bf16 to vector<1x8x32xbf16>
    %36 = tpu.concatenate %35, %34, %35 in 0 : vector<1x8x32xbf16>, vector<8x8x32xbf16>, vector<1x8x32xbf16> -> vector<10x8x32xbf16>
    %cst_11 = arith.constant 0.000000e+00 : bf16
    %37 = vector.broadcast %cst_11 : bf16 to vector<10x1x32xbf16>
    %38 = tpu.concatenate %37, %36, %37 in 1 : vector<10x1x32xbf16>, vector<10x8x32xbf16>, vector<10x1x32xbf16> -> vector<10x10x32xbf16>
    %39 = vector.extract_strided_slice %38 {offsets = [0, 0, 0], sizes = [8, 8, 32], strides = [1, 1, 1]} : vector<10x10x32xbf16> to vector<8x8x32xbf16>
    %40 = vector.shape_cast %39 : vector<8x8x32xbf16> to vector<64x32xbf16>
    %41 = vector.extract_strided_slice %38 {offsets = [0, 1, 0], sizes = [8, 8, 32], strides = [1, 1, 1]} : vector<10x10x32xbf16> to vector<8x8x32xbf16>
    %42 = vector.shape_cast %41 : vector<8x8x32xbf16> to vector<64x32xbf16>
    %43 = vector.extract_strided_slice %38 {offsets = [0, 2, 0], sizes = [8, 8, 32], strides = [1, 1, 1]} : vector<10x10x32xbf16> to vector<8x8x32xbf16>
    %44 = vector.shape_cast %43 : vector<8x8x32xbf16> to vector<64x32xbf16>
    %45 = vector.extract_strided_slice %38 {offsets = [1, 0, 0], sizes = [8, 8, 32], strides = [1, 1, 1]} : vector<10x10x32xbf16> to vector<8x8x32xbf16>
    %46 = vector.shape_cast %45 : vector<8x8x32xbf16> to vector<64x32xbf16>
    %47 = vector.extract_strided_slice %38 {offsets = [1, 1, 0], sizes = [8, 8, 32], strides = [1, 1, 1]} : vector<10x10x32xbf16> to vector<8x8x32xbf16>
    %48 = vector.shape_cast %47 : vector<8x8x32xbf16> to vector<64x32xbf16>
    %49 = vector.extract_strided_slice %38 {offsets = [1, 2, 0], sizes = [8, 8, 32], strides = [1, 1, 1]} : vector<10x10x32xbf16> to vector<8x8x32xbf16>
    %50 = vector.shape_cast %49 : vector<8x8x32xbf16> to vector<64x32xbf16>
    %51 = vector.extract_strided_slice %38 {offsets = [2, 0, 0], sizes = [8, 8, 32], strides = [1, 1, 1]} : vector<10x10x32xbf16> to vector<8x8x32xbf16>
    %52 = vector.shape_cast %51 : vector<8x8x32xbf16> to vector<64x32xbf16>
    %53 = vector.extract_strided_slice %38 {offsets = [2, 1, 0], sizes = [8, 8, 32], strides = [1, 1, 1]} : vector<10x10x32xbf16> to vector<8x8x32xbf16>
    %54 = vector.shape_cast %53 : vector<8x8x32xbf16> to vector<64x32xbf16>
    %55 = vector.extract_strided_slice %38 {offsets = [2, 2, 0], sizes = [8, 8, 32], strides = [1, 1, 1]} : vector<10x10x32xbf16> to vector<8x8x32xbf16>
    %56 = vector.shape_cast %55 : vector<8x8x32xbf16> to vector<64x32xbf16>
    %57 = tpu.concatenate %40, %42, %44, %46, %48, %50, %52, %54, %56 in 1 : vector<64x32xbf16>, vector<64x32xbf16>, vector<64x32xbf16>, vector<64x32xbf16>, vector<64x32xbf16>, vector<64x32xbf16>, vector<64x32xbf16>, vector<64x32xbf16>, vector<64x32xbf16> -> vector<64x288xbf16>
    %c0_12 = arith.constant 0 : index
    %c0_13 = arith.constant 0 : index
    %c0_14 = arith.constant 0 : index
    %58 = vector.load %arg4[%c0_12, %c0_13, %c0_14] : memref<2x288x16xbf16, #tpu.memory_space<vmem>>, vector<1x288x16xbf16>
    %59 = vector.shape_cast %58 : vector<1x288x16xbf16> to vector<288x16xbf16>
    %cst_15 = arith.constant dense<0.000000e+00> : vector<64x16xf32>
    %60 = tpu.matmul %57, %59, %cst_15 {dimension_numbers = #tpu.dot_dimension_numbers<[1], [0], [0], [1], [0, 0, 1, 1], [], []>} : vector<64x288xbf16>, vector<288x16xbf16>, vector<64x16xf32> -> vector<64x16xf32>
    %cst_16 = arith.constant 0.000000e+00 : f32
    %61 = vector.broadcast %cst_16 : f32 to vector<64x16xf32>
    %62 = arith.maximumf %60, %61 : vector<64x16xf32>
    %63 = arith.truncf %62 : vector<64x16xf32> to vector<64x16xbf16>
    %c0_17 = arith.constant 0 : index
    %c0_18 = arith.constant 0 : index
    %c0_19 = arith.constant 0 : index
    %64 = vector.load %arg5[%c0_17, %c0_18, %c0_19] : memref<2x16x32xbf16, #tpu.memory_space<vmem>>, vector<1x16x32xbf16>
    %65 = vector.shape_cast %64 : vector<1x16x32xbf16> to vector<16x32xbf16>
    %cst_20 = arith.constant dense<0.000000e+00> : vector<64x32xf32>
    %66 = tpu.matmul %63, %65, %cst_20 {dimension_numbers = #tpu.dot_dimension_numbers<[1], [0], [0], [1], [0, 0, 1, 1], [], []>} : vector<64x16xbf16>, vector<16x32xbf16>, vector<64x32xf32> -> vector<64x32xf32>
    %67 = arith.addf %30, %66 : vector<64x32xf32>
    %cst_21 = arith.constant 0.000000e+00 : f32
    %68 = vector.broadcast %cst_21 : f32 to vector<64x32xf32>
    %69 = arith.maximumf %67, %68 : vector<64x32xf32>
    %70 = arith.truncf %69 : vector<64x32xf32> to vector<64x32xbf16>
    %71 = vector.shape_cast %70 : vector<64x32xbf16> to vector<8x8x32xbf16>
    %cst_22 = arith.constant 0.000000e+00 : bf16
    %72 = vector.broadcast %cst_22 : bf16 to vector<1x8x32xbf16>
    %73 = tpu.concatenate %72, %71, %72 in 0 : vector<1x8x32xbf16>, vector<8x8x32xbf16>, vector<1x8x32xbf16> -> vector<10x8x32xbf16>
    %cst_23 = arith.constant 0.000000e+00 : bf16
    %74 = vector.broadcast %cst_23 : bf16 to vector<10x1x32xbf16>
    %75 = tpu.concatenate %74, %73, %74 in 1 : vector<10x1x32xbf16>, vector<10x8x32xbf16>, vector<10x1x32xbf16> -> vector<10x10x32xbf16>
    %76 = vector.extract_strided_slice %75 {offsets = [0, 0, 0], sizes = [8, 8, 32], strides = [1, 1, 1]} : vector<10x10x32xbf16> to vector<8x8x32xbf16>
    %77 = vector.shape_cast %76 : vector<8x8x32xbf16> to vector<64x32xbf16>
    %78 = vector.extract_strided_slice %75 {offsets = [0, 1, 0], sizes = [8, 8, 32], strides = [1, 1, 1]} : vector<10x10x32xbf16> to vector<8x8x32xbf16>
    %79 = vector.shape_cast %78 : vector<8x8x32xbf16> to vector<64x32xbf16>
    %80 = vector.extract_strided_slice %75 {offsets = [0, 2, 0], sizes = [8, 8, 32], strides = [1, 1, 1]} : vector<10x10x32xbf16> to vector<8x8x32xbf16>
    %81 = vector.shape_cast %80 : vector<8x8x32xbf16> to vector<64x32xbf16>
    %82 = vector.extract_strided_slice %75 {offsets = [1, 0, 0], sizes = [8, 8, 32], strides = [1, 1, 1]} : vector<10x10x32xbf16> to vector<8x8x32xbf16>
    %83 = vector.shape_cast %82 : vector<8x8x32xbf16> to vector<64x32xbf16>
    %84 = vector.extract_strided_slice %75 {offsets = [1, 1, 0], sizes = [8, 8, 32], strides = [1, 1, 1]} : vector<10x10x32xbf16> to vector<8x8x32xbf16>
    %85 = vector.shape_cast %84 : vector<8x8x32xbf16> to vector<64x32xbf16>
    %86 = vector.extract_strided_slice %75 {offsets = [1, 2, 0], sizes = [8, 8, 32], strides = [1, 1, 1]} : vector<10x10x32xbf16> to vector<8x8x32xbf16>
    %87 = vector.shape_cast %86 : vector<8x8x32xbf16> to vector<64x32xbf16>
    %88 = vector.extract_strided_slice %75 {offsets = [2, 0, 0], sizes = [8, 8, 32], strides = [1, 1, 1]} : vector<10x10x32xbf16> to vector<8x8x32xbf16>
    %89 = vector.shape_cast %88 : vector<8x8x32xbf16> to vector<64x32xbf16>
    %90 = vector.extract_strided_slice %75 {offsets = [2, 1, 0], sizes = [8, 8, 32], strides = [1, 1, 1]} : vector<10x10x32xbf16> to vector<8x8x32xbf16>
    %91 = vector.shape_cast %90 : vector<8x8x32xbf16> to vector<64x32xbf16>
    %92 = vector.extract_strided_slice %75 {offsets = [2, 2, 0], sizes = [8, 8, 32], strides = [1, 1, 1]} : vector<10x10x32xbf16> to vector<8x8x32xbf16>
    %93 = vector.shape_cast %92 : vector<8x8x32xbf16> to vector<64x32xbf16>
    %94 = tpu.concatenate %77, %79, %81, %83, %85, %87, %89, %91, %93 in 1 : vector<64x32xbf16>, vector<64x32xbf16>, vector<64x32xbf16>, vector<64x32xbf16>, vector<64x32xbf16>, vector<64x32xbf16>, vector<64x32xbf16>, vector<64x32xbf16>, vector<64x32xbf16> -> vector<64x288xbf16>
    %c1 = arith.constant 1 : index
    %c0_24 = arith.constant 0 : index
    %c0_25 = arith.constant 0 : index
    %95 = vector.load %arg4[%c1, %c0_24, %c0_25] : memref<2x288x16xbf16, #tpu.memory_space<vmem>>, vector<1x288x16xbf16>
    %96 = vector.shape_cast %95 : vector<1x288x16xbf16> to vector<288x16xbf16>
    %cst_26 = arith.constant dense<0.000000e+00> : vector<64x16xf32>
    %97 = tpu.matmul %94, %96, %cst_26 {dimension_numbers = #tpu.dot_dimension_numbers<[1], [0], [0], [1], [0, 0, 1, 1], [], []>} : vector<64x288xbf16>, vector<288x16xbf16>, vector<64x16xf32> -> vector<64x16xf32>
    %cst_27 = arith.constant 0.000000e+00 : f32
    %98 = vector.broadcast %cst_27 : f32 to vector<64x16xf32>
    %99 = arith.maximumf %97, %98 : vector<64x16xf32>
    %100 = arith.truncf %99 : vector<64x16xf32> to vector<64x16xbf16>
    %c1_28 = arith.constant 1 : index
    %c0_29 = arith.constant 0 : index
    %c0_30 = arith.constant 0 : index
    %101 = vector.load %arg5[%c1_28, %c0_29, %c0_30] : memref<2x16x32xbf16, #tpu.memory_space<vmem>>, vector<1x16x32xbf16>
    %102 = vector.shape_cast %101 : vector<1x16x32xbf16> to vector<16x32xbf16>
    %cst_31 = arith.constant dense<0.000000e+00> : vector<64x32xf32>
    %103 = tpu.matmul %100, %102, %cst_31 {dimension_numbers = #tpu.dot_dimension_numbers<[1], [0], [0], [1], [0, 0, 1, 1], [], []>} : vector<64x16xbf16>, vector<16x32xbf16>, vector<64x32xf32> -> vector<64x32xf32>
    %104 = arith.addf %67, %103 : vector<64x32xf32>
    %cst_32 = arith.constant 0.000000e+00 : f32
    %105 = vector.broadcast %cst_32 : f32 to vector<64x32xf32>
    %106 = arith.maximumf %104, %105 : vector<64x32xf32>
    %107 = arith.truncf %106 : vector<64x32xf32> to vector<64x32xbf16>
    %108 = vector.shape_cast %107 : vector<64x32xbf16> to vector<8x8x32xbf16>
    %cst_33 = arith.constant 0.000000e+00 : bf16
    %109 = vector.broadcast %cst_33 : bf16 to vector<1x8x32xbf16>
    %110 = tpu.concatenate %109, %108, %109 in 0 : vector<1x8x32xbf16>, vector<8x8x32xbf16>, vector<1x8x32xbf16> -> vector<10x8x32xbf16>
    %cst_34 = arith.constant 0.000000e+00 : bf16
    %111 = vector.broadcast %cst_34 : bf16 to vector<10x1x32xbf16>
    %112 = tpu.concatenate %111, %110, %111 in 1 : vector<10x1x32xbf16>, vector<10x8x32xbf16>, vector<10x1x32xbf16> -> vector<10x10x32xbf16>
    %113 = vector.extract_strided_slice %112 {offsets = [0, 0, 0], sizes = [8, 8, 32], strides = [1, 1, 1]} : vector<10x10x32xbf16> to vector<8x8x32xbf16>
    %114 = vector.shape_cast %113 : vector<8x8x32xbf16> to vector<64x32xbf16>
    %115 = vector.extract_strided_slice %112 {offsets = [0, 1, 0], sizes = [8, 8, 32], strides = [1, 1, 1]} : vector<10x10x32xbf16> to vector<8x8x32xbf16>
    %116 = vector.shape_cast %115 : vector<8x8x32xbf16> to vector<64x32xbf16>
    %117 = vector.extract_strided_slice %112 {offsets = [1, 0, 0], sizes = [8, 8, 32], strides = [1, 1, 1]} : vector<10x10x32xbf16> to vector<8x8x32xbf16>
    %118 = vector.shape_cast %117 : vector<8x8x32xbf16> to vector<64x32xbf16>
    %119 = vector.extract_strided_slice %112 {offsets = [1, 1, 0], sizes = [8, 8, 32], strides = [1, 1, 1]} : vector<10x10x32xbf16> to vector<8x8x32xbf16>
    %120 = vector.shape_cast %119 : vector<8x8x32xbf16> to vector<64x32xbf16>
    %121 = tpu.concatenate %114, %116, %118, %120 in 1 : vector<64x32xbf16>, vector<64x32xbf16>, vector<64x32xbf16>, vector<64x32xbf16> -> vector<64x128xbf16>
    %c0_35 = arith.constant 0 : index
    %c0_36 = arith.constant 0 : index
    %c0_37 = arith.constant 0 : index
    %122 = vector.load %arg6[%c0_35, %c0_36, %c0_37] : memref<4x128x16xbf16, #tpu.memory_space<vmem>>, vector<1x128x16xbf16>
    %123 = vector.shape_cast %122 : vector<1x128x16xbf16> to vector<128x16xbf16>
    %cst_38 = arith.constant dense<0.000000e+00> : vector<64x16xf32>
    %124 = tpu.matmul %121, %123, %cst_38 {dimension_numbers = #tpu.dot_dimension_numbers<[1], [0], [0], [1], [0, 0, 1, 1], [], []>} : vector<64x128xbf16>, vector<128x16xbf16>, vector<64x16xf32> -> vector<64x16xf32>
    %c0_39 = arith.constant 0 : index
    %c0_40 = arith.constant 0 : index
    %125 = vector.load %arg7[%c0_39, %c0_40] : memref<1x16xf32, #tpu.memory_space<vmem>>, vector<1x16xf32>
    %126 = vector.broadcast %125 : vector<1x16xf32> to vector<64x16xf32>
    %127 = arith.addf %124, %126 : vector<64x16xf32>
    %cst_41 = arith.constant 0.000000e+00 : f32
    %128 = vector.broadcast %cst_41 : f32 to vector<64x16xf32>
    %129 = arith.maximumf %127, %128 : vector<64x16xf32>
    %130 = arith.truncf %129 : vector<64x16xf32> to vector<64x16xbf16>
    %131 = vector.extract_strided_slice %112 {offsets = [0, 1, 0], sizes = [8, 8, 32], strides = [1, 1, 1]} : vector<10x10x32xbf16> to vector<8x8x32xbf16>
    %132 = vector.shape_cast %131 : vector<8x8x32xbf16> to vector<64x32xbf16>
    %133 = vector.extract_strided_slice %112 {offsets = [0, 2, 0], sizes = [8, 8, 32], strides = [1, 1, 1]} : vector<10x10x32xbf16> to vector<8x8x32xbf16>
    %134 = vector.shape_cast %133 : vector<8x8x32xbf16> to vector<64x32xbf16>
    %135 = vector.extract_strided_slice %112 {offsets = [1, 1, 0], sizes = [8, 8, 32], strides = [1, 1, 1]} : vector<10x10x32xbf16> to vector<8x8x32xbf16>
    %136 = vector.shape_cast %135 : vector<8x8x32xbf16> to vector<64x32xbf16>
    %137 = vector.extract_strided_slice %112 {offsets = [1, 2, 0], sizes = [8, 8, 32], strides = [1, 1, 1]} : vector<10x10x32xbf16> to vector<8x8x32xbf16>
    %138 = vector.shape_cast %137 : vector<8x8x32xbf16> to vector<64x32xbf16>
    %139 = tpu.concatenate %132, %134, %136, %138 in 1 : vector<64x32xbf16>, vector<64x32xbf16>, vector<64x32xbf16>, vector<64x32xbf16> -> vector<64x128xbf16>
    %c1_42 = arith.constant 1 : index
    %c0_43 = arith.constant 0 : index
    %c0_44 = arith.constant 0 : index
    %140 = vector.load %arg6[%c1_42, %c0_43, %c0_44] : memref<4x128x16xbf16, #tpu.memory_space<vmem>>, vector<1x128x16xbf16>
    %141 = vector.shape_cast %140 : vector<1x128x16xbf16> to vector<128x16xbf16>
    %cst_45 = arith.constant dense<0.000000e+00> : vector<64x16xf32>
    %142 = tpu.matmul %139, %141, %cst_45 {dimension_numbers = #tpu.dot_dimension_numbers<[1], [0], [0], [1], [0, 0, 1, 1], [], []>} : vector<64x128xbf16>, vector<128x16xbf16>, vector<64x16xf32> -> vector<64x16xf32>
    %c0_46 = arith.constant 0 : index
    %c0_47 = arith.constant 0 : index
    %143 = vector.load %arg7[%c0_46, %c0_47] : memref<1x16xf32, #tpu.memory_space<vmem>>, vector<1x16xf32>
    %144 = vector.broadcast %143 : vector<1x16xf32> to vector<64x16xf32>
    %145 = arith.addf %142, %144 : vector<64x16xf32>
    %cst_48 = arith.constant 0.000000e+00 : f32
    %146 = vector.broadcast %cst_48 : f32 to vector<64x16xf32>
    %147 = arith.maximumf %145, %146 : vector<64x16xf32>
    %148 = arith.truncf %147 : vector<64x16xf32> to vector<64x16xbf16>
    %149 = vector.extract_strided_slice %112 {offsets = [1, 0, 0], sizes = [8, 8, 32], strides = [1, 1, 1]} : vector<10x10x32xbf16> to vector<8x8x32xbf16>
    %150 = vector.shape_cast %149 : vector<8x8x32xbf16> to vector<64x32xbf16>
    %151 = vector.extract_strided_slice %112 {offsets = [1, 1, 0], sizes = [8, 8, 32], strides = [1, 1, 1]} : vector<10x10x32xbf16> to vector<8x8x32xbf16>
    %152 = vector.shape_cast %151 : vector<8x8x32xbf16> to vector<64x32xbf16>
    %153 = vector.extract_strided_slice %112 {offsets = [2, 0, 0], sizes = [8, 8, 32], strides = [1, 1, 1]} : vector<10x10x32xbf16> to vector<8x8x32xbf16>
    %154 = vector.shape_cast %153 : vector<8x8x32xbf16> to vector<64x32xbf16>
    %155 = vector.extract_strided_slice %112 {offsets = [2, 1, 0], sizes = [8, 8, 32], strides = [1, 1, 1]} : vector<10x10x32xbf16> to vector<8x8x32xbf16>
    %156 = vector.shape_cast %155 : vector<8x8x32xbf16> to vector<64x32xbf16>
    %157 = tpu.concatenate %150, %152, %154, %156 in 1 : vector<64x32xbf16>, vector<64x32xbf16>, vector<64x32xbf16>, vector<64x32xbf16> -> vector<64x128xbf16>
    %c2 = arith.constant 2 : index
    %c0_49 = arith.constant 0 : index
    %c0_50 = arith.constant 0 : index
    %158 = vector.load %arg6[%c2, %c0_49, %c0_50] : memref<4x128x16xbf16, #tpu.memory_space<vmem>>, vector<1x128x16xbf16>
    %159 = vector.shape_cast %158 : vector<1x128x16xbf16> to vector<128x16xbf16>
    %cst_51 = arith.constant dense<0.000000e+00> : vector<64x16xf32>
    %160 = tpu.matmul %157, %159, %cst_51 {dimension_numbers = #tpu.dot_dimension_numbers<[1], [0], [0], [1], [0, 0, 1, 1], [], []>} : vector<64x128xbf16>, vector<128x16xbf16>, vector<64x16xf32> -> vector<64x16xf32>
    %c0_52 = arith.constant 0 : index
    %c0_53 = arith.constant 0 : index
    %161 = vector.load %arg7[%c0_52, %c0_53] : memref<1x16xf32, #tpu.memory_space<vmem>>, vector<1x16xf32>
    %162 = vector.broadcast %161 : vector<1x16xf32> to vector<64x16xf32>
    %163 = arith.addf %160, %162 : vector<64x16xf32>
    %cst_54 = arith.constant 0.000000e+00 : f32
    %164 = vector.broadcast %cst_54 : f32 to vector<64x16xf32>
    %165 = arith.maximumf %163, %164 : vector<64x16xf32>
    %166 = arith.truncf %165 : vector<64x16xf32> to vector<64x16xbf16>
    %167 = vector.extract_strided_slice %112 {offsets = [1, 1, 0], sizes = [8, 8, 32], strides = [1, 1, 1]} : vector<10x10x32xbf16> to vector<8x8x32xbf16>
    %168 = vector.shape_cast %167 : vector<8x8x32xbf16> to vector<64x32xbf16>
    %169 = vector.extract_strided_slice %112 {offsets = [1, 2, 0], sizes = [8, 8, 32], strides = [1, 1, 1]} : vector<10x10x32xbf16> to vector<8x8x32xbf16>
    %170 = vector.shape_cast %169 : vector<8x8x32xbf16> to vector<64x32xbf16>
    %171 = vector.extract_strided_slice %112 {offsets = [2, 1, 0], sizes = [8, 8, 32], strides = [1, 1, 1]} : vector<10x10x32xbf16> to vector<8x8x32xbf16>
    %172 = vector.shape_cast %171 : vector<8x8x32xbf16> to vector<64x32xbf16>
    %173 = vector.extract_strided_slice %112 {offsets = [2, 2, 0], sizes = [8, 8, 32], strides = [1, 1, 1]} : vector<10x10x32xbf16> to vector<8x8x32xbf16>
    %174 = vector.shape_cast %173 : vector<8x8x32xbf16> to vector<64x32xbf16>
    %175 = tpu.concatenate %168, %170, %172, %174 in 1 : vector<64x32xbf16>, vector<64x32xbf16>, vector<64x32xbf16>, vector<64x32xbf16> -> vector<64x128xbf16>
    %c3 = arith.constant 3 : index
    %c0_55 = arith.constant 0 : index
    %c0_56 = arith.constant 0 : index
    %176 = vector.load %arg6[%c3, %c0_55, %c0_56] : memref<4x128x16xbf16, #tpu.memory_space<vmem>>, vector<1x128x16xbf16>
    %177 = vector.shape_cast %176 : vector<1x128x16xbf16> to vector<128x16xbf16>
    %cst_57 = arith.constant dense<0.000000e+00> : vector<64x16xf32>
    %178 = tpu.matmul %175, %177, %cst_57 {dimension_numbers = #tpu.dot_dimension_numbers<[1], [0], [0], [1], [0, 0, 1, 1], [], []>} : vector<64x128xbf16>, vector<128x16xbf16>, vector<64x16xf32> -> vector<64x16xf32>
    %c0_58 = arith.constant 0 : index
    %c0_59 = arith.constant 0 : index
    %179 = vector.load %arg7[%c0_58, %c0_59] : memref<1x16xf32, #tpu.memory_space<vmem>>, vector<1x16xf32>
    %180 = vector.broadcast %179 : vector<1x16xf32> to vector<64x16xf32>
    %181 = arith.addf %178, %180 : vector<64x16xf32>
    %cst_60 = arith.constant 0.000000e+00 : f32
    %182 = vector.broadcast %cst_60 : f32 to vector<64x16xf32>
    %183 = arith.maximumf %181, %182 : vector<64x16xf32>
    %184 = arith.truncf %183 : vector<64x16xf32> to vector<64x16xbf16>
    %185 = tpu.concatenate %130, %148, %166, %184 in 0 : vector<64x16xbf16>, vector<64x16xbf16>, vector<64x16xbf16>, vector<64x16xbf16> -> vector<256x16xbf16>
    %c0_61 = arith.constant 0 : index
    %c0_62 = arith.constant 0 : index
    %186 = vector.load %arg10[%c0_61, %c0_62] : memref<256x256xbf16, #tpu.memory_space<vmem>>, vector<256x256xbf16>
    %cst_63 = arith.constant dense<0.000000e+00> : vector<256x16xf32>
    %187 = tpu.matmul %186, %185, %cst_63 {dimension_numbers = #tpu.dot_dimension_numbers<[1], [0], [0], [1], [0, 0, 1, 1], [], []>} : vector<256x256xbf16>, vector<256x16xbf16>, vector<256x16xf32> -> vector<256x16xf32>
    %188 = arith.truncf %187 : vector<256x16xf32> to vector<256x16xbf16>
    %189 = vector.shape_cast %188 : vector<256x16xbf16> to vector<16x16x16xbf16>
    %cst_64 = arith.constant 0.000000e+00 : bf16
    %190 = vector.broadcast %cst_64 : bf16 to vector<1x16x16xbf16>
    %191 = tpu.concatenate %190, %189, %190 in 0 : vector<1x16x16xbf16>, vector<16x16x16xbf16>, vector<1x16x16xbf16> -> vector<18x16x16xbf16>
    %cst_65 = arith.constant 0.000000e+00 : bf16
    %192 = vector.broadcast %cst_65 : bf16 to vector<18x1x16xbf16>
    %193 = tpu.concatenate %192, %191, %192 in 1 : vector<18x1x16xbf16>, vector<18x16x16xbf16>, vector<18x1x16xbf16> -> vector<18x18x16xbf16>
    %194 = vector.extract_strided_slice %193 {offsets = [0, 0, 0], sizes = [16, 16, 16], strides = [1, 1, 1]} : vector<18x18x16xbf16> to vector<16x16x16xbf16>
    %195 = vector.shape_cast %194 : vector<16x16x16xbf16> to vector<256x16xbf16>
    %196 = vector.extract_strided_slice %193 {offsets = [0, 1, 0], sizes = [16, 16, 16], strides = [1, 1, 1]} : vector<18x18x16xbf16> to vector<16x16x16xbf16>
    %197 = vector.shape_cast %196 : vector<16x16x16xbf16> to vector<256x16xbf16>
    %198 = vector.extract_strided_slice %193 {offsets = [1, 0, 0], sizes = [16, 16, 16], strides = [1, 1, 1]} : vector<18x18x16xbf16> to vector<16x16x16xbf16>
    %199 = vector.shape_cast %198 : vector<16x16x16xbf16> to vector<256x16xbf16>
    %200 = vector.extract_strided_slice %193 {offsets = [1, 1, 0], sizes = [16, 16, 16], strides = [1, 1, 1]} : vector<18x18x16xbf16> to vector<16x16x16xbf16>
    %201 = vector.shape_cast %200 : vector<16x16x16xbf16> to vector<256x16xbf16>
    %202 = tpu.concatenate %195, %197, %199, %201 in 1 : vector<256x16xbf16>, vector<256x16xbf16>, vector<256x16xbf16>, vector<256x16xbf16> -> vector<256x64xbf16>
    %c0_66 = arith.constant 0 : index
    %c0_67 = arith.constant 0 : index
    %c0_68 = arith.constant 0 : index
    %203 = vector.load %arg8[%c0_66, %c0_67, %c0_68] : memref<4x64x3xbf16, #tpu.memory_space<vmem>>, vector<1x64x3xbf16>
    %204 = vector.shape_cast %203 : vector<1x64x3xbf16> to vector<64x3xbf16>
    %cst_69 = arith.constant dense<0.000000e+00> : vector<256x3xf32>
    %205 = tpu.matmul %202, %204, %cst_69 {dimension_numbers = #tpu.dot_dimension_numbers<[1], [0], [0], [1], [0, 0, 1, 1], [], []>} : vector<256x64xbf16>, vector<64x3xbf16>, vector<256x3xf32> -> vector<256x3xf32>
    %c0_70 = arith.constant 0 : index
    %c0_71 = arith.constant 0 : index
    %206 = vector.load %arg9[%c0_70, %c0_71] : memref<1x3xf32, #tpu.memory_space<vmem>>, vector<1x3xf32>
    %207 = vector.broadcast %206 : vector<1x3xf32> to vector<256x3xf32>
    %208 = arith.addf %205, %207 : vector<256x3xf32>
    %c0_72 = arith.constant 0 : index
    %c0_73 = arith.constant 0 : index
    %c0_74 = arith.constant 0 : index
    %c0_75 = arith.constant 0 : index
    %209 = vector.load %arg11[%c0_72, %c0_73, %c0_74, %c0_75] : memref<1x4x256x3xf32, #tpu.memory_space<vmem>>, vector<1x1x256x3xf32>
    %210 = vector.shape_cast %209 : vector<1x1x256x3xf32> to vector<256x3xf32>
    %211 = vector.shape_cast %208 : vector<256x3xf32> to vector<1x1x256x3xf32>
    tpu.vector_store %arg11[%c0_72, %c0_73, %c0_74, %c0_75], %211 {strides = array<i32>} : memref<1x4x256x3xf32, #tpu.memory_space<vmem>>, vector<1x1x256x3xf32>,
    %212 = vector.extract_strided_slice %193 {offsets = [0, 1, 0], sizes = [16, 16, 16], strides = [1, 1, 1]} : vector<18x18x16xbf16> to vector<16x16x16xbf16>
    %213 = vector.shape_cast %212 : vector<16x16x16xbf16> to vector<256x16xbf16>
    %214 = vector.extract_strided_slice %193 {offsets = [0, 2, 0], sizes = [16, 16, 16], strides = [1, 1, 1]} : vector<18x18x16xbf16> to vector<16x16x16xbf16>
    %215 = vector.shape_cast %214 : vector<16x16x16xbf16> to vector<256x16xbf16>
    %216 = vector.extract_strided_slice %193 {offsets = [1, 1, 0], sizes = [16, 16, 16], strides = [1, 1, 1]} : vector<18x18x16xbf16> to vector<16x16x16xbf16>
    %217 = vector.shape_cast %216 : vector<16x16x16xbf16> to vector<256x16xbf16>
    %218 = vector.extract_strided_slice %193 {offsets = [1, 2, 0], sizes = [16, 16, 16], strides = [1, 1, 1]} : vector<18x18x16xbf16> to vector<16x16x16xbf16>
    %219 = vector.shape_cast %218 : vector<16x16x16xbf16> to vector<256x16xbf16>
    %220 = tpu.concatenate %213, %215, %217, %219 in 1 : vector<256x16xbf16>, vector<256x16xbf16>, vector<256x16xbf16>, vector<256x16xbf16> -> vector<256x64xbf16>
    %c1_76 = arith.constant 1 : index
    %c0_77 = arith.constant 0 : index
    %c0_78 = arith.constant 0 : index
    %221 = vector.load %arg8[%c1_76, %c0_77, %c0_78] : memref<4x64x3xbf16, #tpu.memory_space<vmem>>, vector<1x64x3xbf16>
    %222 = vector.shape_cast %221 : vector<1x64x3xbf16> to vector<64x3xbf16>
    %cst_79 = arith.constant dense<0.000000e+00> : vector<256x3xf32>
    %223 = tpu.matmul %220, %222, %cst_79 {dimension_numbers = #tpu.dot_dimension_numbers<[1], [0], [0], [1], [0, 0, 1, 1], [], []>} : vector<256x64xbf16>, vector<64x3xbf16>, vector<256x3xf32> -> vector<256x3xf32>
    %c0_80 = arith.constant 0 : index
    %c0_81 = arith.constant 0 : index
    %224 = vector.load %arg9[%c0_80, %c0_81] : memref<1x3xf32, #tpu.memory_space<vmem>>, vector<1x3xf32>
    %225 = vector.broadcast %224 : vector<1x3xf32> to vector<256x3xf32>
    %226 = arith.addf %223, %225 : vector<256x3xf32>
    %c0_82 = arith.constant 0 : index
    %c1_83 = arith.constant 1 : index
    %c0_84 = arith.constant 0 : index
    %c0_85 = arith.constant 0 : index
    %227 = vector.load %arg11[%c0_82, %c1_83, %c0_84, %c0_85] : memref<1x4x256x3xf32, #tpu.memory_space<vmem>>, vector<1x1x256x3xf32>
    %228 = vector.shape_cast %227 : vector<1x1x256x3xf32> to vector<256x3xf32>
    %229 = vector.shape_cast %226 : vector<256x3xf32> to vector<1x1x256x3xf32>
    tpu.vector_store %arg11[%c0_82, %c1_83, %c0_84, %c0_85], %229 {strides = array<i32>} : memref<1x4x256x3xf32, #tpu.memory_space<vmem>>, vector<1x1x256x3xf32>,
    %230 = vector.extract_strided_slice %193 {offsets = [1, 0, 0], sizes = [16, 16, 16], strides = [1, 1, 1]} : vector<18x18x16xbf16> to vector<16x16x16xbf16>
    %231 = vector.shape_cast %230 : vector<16x16x16xbf16> to vector<256x16xbf16>
    %232 = vector.extract_strided_slice %193 {offsets = [1, 1, 0], sizes = [16, 16, 16], strides = [1, 1, 1]} : vector<18x18x16xbf16> to vector<16x16x16xbf16>
    %233 = vector.shape_cast %232 : vector<16x16x16xbf16> to vector<256x16xbf16>
    %234 = vector.extract_strided_slice %193 {offsets = [2, 0, 0], sizes = [16, 16, 16], strides = [1, 1, 1]} : vector<18x18x16xbf16> to vector<16x16x16xbf16>
    %235 = vector.shape_cast %234 : vector<16x16x16xbf16> to vector<256x16xbf16>
    %236 = vector.extract_strided_slice %193 {offsets = [2, 1, 0], sizes = [16, 16, 16], strides = [1, 1, 1]} : vector<18x18x16xbf16> to vector<16x16x16xbf16>
    %237 = vector.shape_cast %236 : vector<16x16x16xbf16> to vector<256x16xbf16>
    %238 = tpu.concatenate %231, %233, %235, %237 in 1 : vector<256x16xbf16>, vector<256x16xbf16>, vector<256x16xbf16>, vector<256x16xbf16> -> vector<256x64xbf16>
    %c2_86 = arith.constant 2 : index
    %c0_87 = arith.constant 0 : index
    %c0_88 = arith.constant 0 : index
    %239 = vector.load %arg8[%c2_86, %c0_87, %c0_88] : memref<4x64x3xbf16, #tpu.memory_space<vmem>>, vector<1x64x3xbf16>
    %240 = vector.shape_cast %239 : vector<1x64x3xbf16> to vector<64x3xbf16>
    %cst_89 = arith.constant dense<0.000000e+00> : vector<256x3xf32>
    %241 = tpu.matmul %238, %240, %cst_89 {dimension_numbers = #tpu.dot_dimension_numbers<[1], [0], [0], [1], [0, 0, 1, 1], [], []>} : vector<256x64xbf16>, vector<64x3xbf16>, vector<256x3xf32> -> vector<256x3xf32>
    %c0_90 = arith.constant 0 : index
    %c0_91 = arith.constant 0 : index
    %242 = vector.load %arg9[%c0_90, %c0_91] : memref<1x3xf32, #tpu.memory_space<vmem>>, vector<1x3xf32>
    %243 = vector.broadcast %242 : vector<1x3xf32> to vector<256x3xf32>
    %244 = arith.addf %241, %243 : vector<256x3xf32>
    %c0_92 = arith.constant 0 : index
    %c2_93 = arith.constant 2 : index
    %c0_94 = arith.constant 0 : index
    %c0_95 = arith.constant 0 : index
    %245 = vector.load %arg11[%c0_92, %c2_93, %c0_94, %c0_95] : memref<1x4x256x3xf32, #tpu.memory_space<vmem>>, vector<1x1x256x3xf32>
    %246 = vector.shape_cast %245 : vector<1x1x256x3xf32> to vector<256x3xf32>
    %247 = vector.shape_cast %244 : vector<256x3xf32> to vector<1x1x256x3xf32>
    tpu.vector_store %arg11[%c0_92, %c2_93, %c0_94, %c0_95], %247 {strides = array<i32>} : memref<1x4x256x3xf32, #tpu.memory_space<vmem>>, vector<1x1x256x3xf32>,
    %248 = vector.extract_strided_slice %193 {offsets = [1, 1, 0], sizes = [16, 16, 16], strides = [1, 1, 1]} : vector<18x18x16xbf16> to vector<16x16x16xbf16>
    %249 = vector.shape_cast %248 : vector<16x16x16xbf16> to vector<256x16xbf16>
    %250 = vector.extract_strided_slice %193 {offsets = [1, 2, 0], sizes = [16, 16, 16], strides = [1, 1, 1]} : vector<18x18x16xbf16> to vector<16x16x16xbf16>
    %251 = vector.shape_cast %250 : vector<16x16x16xbf16> to vector<256x16xbf16>
    %252 = vector.extract_strided_slice %193 {offsets = [2, 1, 0], sizes = [16, 16, 16], strides = [1, 1, 1]} : vector<18x18x16xbf16> to vector<16x16x16xbf16>
    %253 = vector.shape_cast %252 : vector<16x16x16xbf16> to vector<256x16xbf16>
    %254 = vector.extract_strided_slice %193 {offsets = [2, 2, 0], sizes = [16, 16, 16], strides = [1, 1, 1]} : vector<18x18x16xbf16> to vector<16x16x16xbf16>
    %255 = vector.shape_cast %254 : vector<16x16x16xbf16> to vector<256x16xbf16>
    %256 = tpu.concatenate %249, %251, %253, %255 in 1 : vector<256x16xbf16>, vector<256x16xbf16>, vector<256x16xbf16>, vector<256x16xbf16> -> vector<256x64xbf16>
    %c3_96 = arith.constant 3 : index
    %c0_97 = arith.constant 0 : index
    %c0_98 = arith.constant 0 : index
    %257 = vector.load %arg8[%c3_96, %c0_97, %c0_98] : memref<4x64x3xbf16, #tpu.memory_space<vmem>>, vector<1x64x3xbf16>
    %258 = vector.shape_cast %257 : vector<1x64x3xbf16> to vector<64x3xbf16>
    %cst_99 = arith.constant dense<0.000000e+00> : vector<256x3xf32>
    %259 = tpu.matmul %256, %258, %cst_99 {dimension_numbers = #tpu.dot_dimension_numbers<[1], [0], [0], [1], [0, 0, 1, 1], [], []>} : vector<256x64xbf16>, vector<64x3xbf16>, vector<256x3xf32> -> vector<256x3xf32>
    %c0_100 = arith.constant 0 : index
    %c0_101 = arith.constant 0 : index
    %260 = vector.load %arg9[%c0_100, %c0_101] : memref<1x3xf32, #tpu.memory_space<vmem>>, vector<1x3xf32>
    %261 = vector.broadcast %260 : vector<1x3xf32> to vector<256x3xf32>
    %262 = arith.addf %259, %261 : vector<256x3xf32>
    %c0_102 = arith.constant 0 : index
    %c3_103 = arith.constant 3 : index
    %c0_104 = arith.constant 0 : index
    %c0_105 = arith.constant 0 : index
    %263 = vector.load %arg11[%c0_102, %c3_103, %c0_104, %c0_105] : memref<1x4x256x3xf32, #tpu.memory_space<vmem>>, vector<1x1x256x3xf32>
    %264 = vector.shape_cast %263 : vector<1x1x256x3xf32> to vector<256x3xf32>
    %265 = vector.shape_cast %262 : vector<256x3xf32> to vector<1x1x256x3xf32>
    tpu.vector_store %arg11[%c0_102, %c3_103, %c0_104, %c0_105], %265 {strides = array<i32>} : memref<1x4x256x3xf32, #tpu.memory_space<vmem>>, vector<1x1x256x3xf32>,
    return
  }
  func.func @transform_0(%arg0: i32) -> (i32, i32, i32, i32) {
    %c0_i32 = arith.constant 0 : i32
    %c0_i32_0 = arith.constant 0 : i32
    %c0_i32_1 = arith.constant 0 : i32
    %c0_i32_2 = arith.constant 0 : i32
    return %arg0, %c0_i32, %c0_i32_0, %c0_i32_1 : i32, i32, i32, i32
  }
  func.func @transform_1(%arg0: i32) -> (i32, i32) {
    %c0_i32 = arith.constant 0 : i32
    %c0_i32_0 = arith.constant 0 : i32
    %c0_i32_1 = arith.constant 0 : i32
    return %c0_i32, %c0_i32_0 : i32, i32
  }
  func.func @transform_2(%arg0: i32) -> (i32, i32) {
    %c0_i32 = arith.constant 0 : i32
    %c0_i32_0 = arith.constant 0 : i32
    %c0_i32_1 = arith.constant 0 : i32
    return %c0_i32, %c0_i32_0 : i32, i32
  }
  func.func @transform_3(%arg0: i32) -> (i32, i32, i32) {
    %c0_i32 = arith.constant 0 : i32
    %c0_i32_0 = arith.constant 0 : i32
    %c0_i32_1 = arith.constant 0 : i32
    %c0_i32_2 = arith.constant 0 : i32
    return %c0_i32, %c0_i32_0, %c0_i32_1 : i32, i32, i32
  }
  func.func @transform_4(%arg0: i32) -> (i32, i32, i32) {
    %c0_i32 = arith.constant 0 : i32
    %c0_i32_0 = arith.constant 0 : i32
    %c0_i32_1 = arith.constant 0 : i32
    %c0_i32_2 = arith.constant 0 : i32
    return %c0_i32, %c0_i32_0, %c0_i32_1 : i32, i32, i32
  }
  func.func @transform_5(%arg0: i32) -> (i32, i32, i32) {
    %c0_i32 = arith.constant 0 : i32
    %c0_i32_0 = arith.constant 0 : i32
    %c0_i32_1 = arith.constant 0 : i32
    %c0_i32_2 = arith.constant 0 : i32
    return %c0_i32, %c0_i32_0, %c0_i32_1 : i32, i32, i32
  }
  func.func @transform_6(%arg0: i32) -> (i32, i32) {
    %c0_i32 = arith.constant 0 : i32
    %c0_i32_0 = arith.constant 0 : i32
    %c0_i32_1 = arith.constant 0 : i32
    return %c0_i32, %c0_i32_0 : i32, i32
  }
  func.func @transform_7(%arg0: i32) -> (i32, i32, i32) {
    %c0_i32 = arith.constant 0 : i32
    %c0_i32_0 = arith.constant 0 : i32
    %c0_i32_1 = arith.constant 0 : i32
    %c0_i32_2 = arith.constant 0 : i32
    return %c0_i32, %c0_i32_0, %c0_i32_1 : i32, i32, i32
  }
  func.func @transform_8(%arg0: i32) -> (i32, i32) {
    %c0_i32 = arith.constant 0 : i32
    %c0_i32_0 = arith.constant 0 : i32
    %c0_i32_1 = arith.constant 0 : i32
    return %c0_i32, %c0_i32_0 : i32, i32
  }
  func.func @transform_9(%arg0: i32) -> (i32, i32) {
    %c0_i32 = arith.constant 0 : i32
    %c0_i32_0 = arith.constant 0 : i32
    %c0_i32_1 = arith.constant 0 : i32
    return %c0_i32, %c0_i32_0 : i32, i32
  }
  func.func @transform_10(%arg0: i32) -> (i32, i32, i32, i32) {
    %c0_i32 = arith.constant 0 : i32
    %c0_i32_0 = arith.constant 0 : i32
    %c0_i32_1 = arith.constant 0 : i32
    %c0_i32_2 = arith.constant 0 : i32
    return %arg0, %c0_i32, %c0_i32_0, %c0_i32_1 : i32, i32, i32, i32
  }
}

</mosaic_0001>

<bundles_post_ra>
// kernel: decoder_forward.1
= control target key start
LH: loop header
LB: loop body
LE: loop exit
PB: predicated region body
PF: predicated region fallthrough
CT: control target
= control target key end

     0   :  { %15 = vsyncpa [#allocation3], 0  ;;  %s9676_s0 = inlined_call_operand.vmem [shape: f32[2,8,8,4], index: 0, kind: input, shape index: {}]   ;;  %s9677_s1 = inlined_call_operand.vmem [shape: bf16[36,32], index: 1, kind: input, shape index: {}]   ;;  %s9678_s2 = inlined_call_operand.hbm [shape: f32[1,32], index: 2, kind: input, shape index: {}]   ;;  %s9679_s3 = inlined_call_operand.vmem [shape: bf16[2,288,16], index: 3, kind: input, shape index: {}]   ;;  %s9680_s4 = inlined_call_operand.hbm [shape: bf16[2,16,32], index: 4, kind: input, shape index: {}]   ;;  %s9681_s5 = inlined_call_operand.vmem [shape: bf16[4,128,16], index: 5, kind: input, shape index: {}]   ;;  %s9682_s6 = inlined_call_operand.hbm [shape: f32[1,16], index: 6, kind: input, shape index: {}]   ;;  %s9683_s7 = inlined_call_operand.vmem [shape: bf16[4,64,3], index: 7, kind: input, shape index: {}]   ;;  %s9684_s8 = inlined_call_operand.hbm [shape: f32[1,3], index: 8, kind: input, shape index: {}]   ;;  %s9685_s9 = inlined_call_operand.hbm [shape: bf16[256,256], index: 9, kind: input, shape index: {}]   ;;  %s9686_s10 = inlined_call_operand.vmem [shape: f32[2,4,256,3], index: 10, kind: output, shape index: {}]  }
   0x1   :  { %16 = vsyncpa [#allocation5], 0 }
   0x2   :  { %17 = vsyncpa [#allocation8], 0  ;;  %s7070_s13 = smov 0  }
   0x3 LB: > { %s298_s16 = sshll.u32 %s9680_s4, 4  ;;  %s7079_s17 = sadd.s32 4294967295, %s6992_s13   ;;  %s6992_s13 = sphi %s7070_s13, %s23_s13   ;;  %s299_s16 = int_to_ptr.hbm [resolvable:$true] %s298_s16 }
   0x4   : > { %p5785_p0 = scmp.ge.s32.totalorder %s6992_s13, 1  ;;  %p269_p1 = scmp.lt.s32.totalorder %s6992_s13, 3 }
   0x5   : > { %p6779_p2 = scmp.eq.s32.totalorder %s7079_s17, 0  ;;  %s6994_s19 = smov [#allocation4]  }
   0x6   : > { %p7084_p3 = pnand %p5785_p0, %p269_p1  ;;  %s300_s20 = sshll.u32 %s6994_s19, 4  ;;  %s301_s20 = int_to_ptr.vmem [resolvable:$true] %s300_s20 }
   0x7   : > { %s331_s23 = sshll.u32 %s9684_s8, 4  ;;  %s6995_s25 = smov [#allocation7]   ;;  %s332_s23 = int_to_ptr.hbm [resolvable:$true] %s331_s23 }
   0x8   : > { %p6763_p4 = pneg %p7084_p3  ;;  %s333_s26 = sshll.u32 %s6995_s25, 4  ;;  %s334_s26 = int_to_ptr.vmem [resolvable:$true] %s333_s26 }
   0x9   : > { %s284_s29 = sshll.u32 %s9678_s2, 4  ;;  %s6996_s30 = smov 64   ;;  %s285_s29 = int_to_ptr.hbm [resolvable:$true] %s284_s29 }
   0xa   : > { %p7095_p5 = pnand %p6779_p2, %p6763_p4  ;;  %s6997_s11 = smov 4  }
   0xb   : > { %s6998_s12 = smov [#allocation2]   ;;  %s316_s21 = sshll.u32 %s9682_s6, 4  ;;  %s317_s21 = int_to_ptr.hbm [resolvable:$true] %s316_s21 }
   0xc   : > { %6769 = dma.hbm_to_vmem [thread:$0]  (!%p7095_p5), %s299_s16, 256, %s301_s20, [#allocation5], %s6996_s30, %s6996_s30, %s6997_s11  }
   0xd   : > { %6775 = dma.hbm_to_vmem [thread:$0]  (!%p7095_p5), %s332_s23, 16, %s334_s26, [#allocation8]  }
   0xe   : > { %s286_s14 = sshll.u32 %s6998_s12, 4  ;;  %s342_s27 = sshll.u32 %s9685_s9, 4  ;;  %s287_s14 = int_to_ptr.vmem [resolvable:$true] %s286_s14  ;;  %s343_s27 = int_to_ptr.hbm [resolvable:$true] %s342_s27 }
   0xf   : > { %6766 = dma.hbm_to_vmem [thread:$0]  (!%p7095_p5), %s285_s29, 16, %s287_s14, [#allocation3]  }
  0x10   : > { %s6999_s28 = smov [#allocation6]   ;;  %s7000_s20 = smov [#allocation9]  }
  0x11   : > { %s318_s16 = sshll.u32 %s6999_s28, 4  ;;  %s344_s23 = sshll.u32 %s7000_s20, 4  ;;  %s319_s16 = int_to_ptr.vmem [resolvable:$true] %s318_s16  ;;  %s345_s23 = int_to_ptr.vmem [resolvable:$true] %s344_s23 }
  0x12   : > { %6772 = dma.hbm_to_vmem [thread:$0]  (!%p7095_p5), %s317_s21, 16, %s319_s16, [#allocation5]  }
  0x13   : > { %s7001_s26 = smov 128   ;;  %s7002_s30 = smov 8  }
  0x14   : > { %6778 = dma.hbm_to_vmem [thread:$0]  (!%p7095_p5), %s343_s27, 4096, %s345_s23, [#allocation8], %s7001_s26, %s7001_s26, %s7002_s30  }
  0x15   : > { %368 = sbr.rel (%p7084_p3) target bundleno = 2319 (0x90f), region = 60 }
  0x1a   : > { %6979 = dma.done.wait (%p6779_p2), [#allocation3], 16  }
  0x1b   : > { %6981 = vsyncadd (%p6779_p2), [#allocation3], 4294967280 }
  0x1c   : > { %6983 = dma.done.wait (%p6779_p2), [#allocation5], 272  }
  0x1d   : > { %6985 = vsyncadd (%p6779_p2), [#allocation5], 4294967024 }
  0x1e   : > { %6987 = dma.done.wait (%p6779_p2), [#allocation8], 4112  }
  0x1f   : > { %6989 = vsyncadd (%p6779_p2), [#allocation8], 4294963184  ;;  %p427_p6 = scmp.lt.s32.totalorder %s7079_s17, 1  ;;  %vm526_vm0 = vcmask 1040384   ;;  %vm527_vm1 = vsmask.f32 256 }
  0x20   : > { %vm7133_vm2 = vmand %vm526_vm0, %vm527_vm1  ;;  %vm538_vm3 = vcmask 1044480   ;;  %vm539_vm4 = vsmask.f32 4352  ;;  %v7003_v2 = vmov 0   ;;  %vm705_vm6 = vcmask 1042432   ;;  %s7004_s12 = smov 12  }
  0x21   : > { %s9698_s17 = smov (!%p427_p6, %s7079_s17), 1  ;;  %vm7140_vm5 = vmand %vm538_vm3, %vm539_vm4  ;;  %v7144_v3 = vrot.slane %v7003_v2, 7  ;;  %vm706_vm7 = vcmask 1046532   ;;  %vm590_vm9 = vsmask.f32 3328  ;;  %s7005_s14 = smov 24  }
  0x22   : > { %s6605_s18 = sshll.u32 %s9698_s17, 6  ;;  %vm7170_vm8 = vmor %vm705_vm6, %vm706_vm7  ;;  %vm591_vm10 = vsmask.f32 7440  ;;  %s7006_s15 = smov 8   ;;  %vm981_vm12 = vcmask 1041408   ;;  %vm872_vm13 = vcmask 31744  }
  0x23   : > { %v7150_v4 = vsel %vm7133_vm2, 0, %v7144_v3  ;;  %s7155_s11 = scalar_lea.vmem %s9676_s0, %s6605_s18  ;;  %vm7237_vm11 = vmor %vm590_vm9, %vm591_vm10  ;;  %s7007_s19 = smov 20   ;;  %vm885_vm14 = vcmask 64512   ;;  %vm894_vm15 = vcmask 97280   ;;  %vm903_vm0 = vcmask 130048   ;;  %v6678_v22 = vld [vmem:[%s9681_s5 + $0xf8] sm:$0xff] }
  0x24   : > { %v541_v5 = vsel %vm7140_vm5, %v7150_v4, 0  ;;  %v438_v8 = vld [vmem:[%s7155_s11] sm:$0xff]  ;;  %v439_v9 = vld [vmem:[%s7155_s11 + $0x8] sm:$0xff]  ;;  %v440_v10 = vld [vmem:[%s7155_s11 + $0x10] sm:$0xff]  ;;  %s7008_s21 = smov 32   ;;  %s7009_s22 = smov 16  }
  0x25   : > { %v7160_v6 = vunpack.c.l.b16 %v541_v5  ;;  %v559_v7 = vunpack.c.h.b16 %v541_v5  ;;  %v446_v11 = vpack.c.bf16 %v438_v8, %v438_v8  ;;  %v447_v12 = vpack.c.bf16 %v439_v9, %v439_v9  ;;  %v441_v15 = vld [vmem:[%s7155_s11 + $0x18] sm:$0xff]  ;;  %v442_v44 = vld [vmem:[%s7155_s11 + $0x20] sm:$0xff]  ;;  %s7010_s25 = smov 4   ;;  %s7011_s27 = smov 28  }
  0x26   : > { %v448_v16 = vpack.c.bf16 %v440_v10, %v440_v10  ;;  %v449_v17 = vpack.c.bf16 %v441_v15, %v441_v15  ;;  %v7199_v56 = vpack.c.bf16 %v442_v44, %v442_v44  ;;  %vm912_vm1 = vcmask 162816   ;;  %s7014_s26 = smov 48   ;;  %s6606_s20 = sshll.u32 %s9698_s17, 10 }
  0x27   : > { %v574_v13 = vpack.c.b16 %v7160_v6, %v7160_v6  ;;  %v7167_v14 = vpack.c.b16 %v559_v7, %v559_v7  ;;  %v462_v18 = vshrl.u32 %v446_v11, 16  ;;  %v465_v19 = vshll.u32 %v446_v11, 16  ;;  %s9167_s18 = scalar_lea.vmem %s9686_s10, %s6606_s20 }
  0x28   : > { %v469_v20 = vshrl.u32 %v447_v12, 16  ;;  %v472_v21 = vshll.u32 %v447_v12, 16  ;;  %v476_v25 = vshrl.u32 %v448_v16, 16  ;;  %v479_v26 = vshll.u32 %v448_v16, 16 }
  0x29   : > { %v5802_v23 = vrot.slane %v574_v13, 9  ;;  %v710_v24 = vrot.slane %v7167_v14, 5  ;;  %v464_v27 = vrot.slane %v462_v18, 7  ;;  %v483_v29 = vshrl.u32 %v449_v17, 16 }
  0x2a   : > { %v471_v28 = vrot.slane %v469_v20, 7  ;;  %v486_v30 = vshll.u32 %v449_v17, 16  ;;  %v478_v32 = vrot.slane %v476_v25, 7  ;;  %v594_v33 = vshrl.u32 %v574_v13, 16 }
  0x2b   : > { %v711_v31 = vsel %vm7170_vm8, %v5802_v23, %v710_v24  ;;  %v597_v34 = vshll.u32 %v574_v13, 16  ;;  %v467_v35 = vor.u32 %v465_v19, %v464_v27  ;;  %v485_v37 = vrot.slane %v483_v29, 7 }
  0x2c   : > { %v474_v36 = vor.u32 %v472_v21, %v471_v28  ;;  %v7177_v38 = vunpack.c.l.b16 %v711_v31  ;;  %v481_v39 = vor.u32 %v479_v26, %v478_v32  ;;  %v7183_v43 = vrot.slane %v594_v33, 4 }
  0x2d   : > { %v530_v40 = vsel %vm7133_vm2, 0, %v467_v35  ;;  %v488_v42 = vor.u32 %v486_v30, %v485_v37  ;;  %v599_v48 = vrot.slane %v597_v34, 5  ;;  %v603_v55 = vshll.u32 %v7167_v14, 16 }
  0x2e   : > { %v531_v41 = vsel %vm7133_vm2, 0, %v474_v36  ;;  %v542_v45 = vsel %vm7140_vm5, %v530_v40, 0  ;;  %v532_v47 = vsel %vm7133_vm2, 0, %v481_v39  ;;  %vm921_vm3 = vcmask 195584  }
  0x2f   : > { %v543_v46 = vsel %vm7140_vm5, %v531_v41, 0  ;;  %v7192_v49 = vunpack.c.l.b16 %v542_v45  ;;  %v561_v50 = vunpack.c.h.b16 %v542_v45  ;;  %v533_v53 = vsel %vm7133_vm2, 0, %v488_v42 }
  0x30   : > { %v562_v51 = vunpack.c.l.b16 %v543_v46  ;;  %v563_v52 = vunpack.c.h.b16 %v543_v46  ;;  %v544_v54 = vsel %vm7140_vm5, %v532_v47, 0  ;;  %v545_v62 = vsel %vm7140_vm5, %v533_v53, 0 }
  0x31   : > { %v577_v57 = vpack.c.b16 %v561_v50, %v561_v50  ;;  %v576_v61 = vpack.c.b16 %v7192_v49, %v7192_v49  ;;  %v564_v63 = vunpack.c.l.b16 %v544_v54  ;;  %v565_v2 = vunpack.c.h.b16 %v544_v54 }
  0x32   : > { %v578_v58 = vpack.c.b16 %v562_v51, %v562_v51  ;;  %v579_v59 = vpack.c.b16 %v563_v52, %v563_v52  ;;  %v807_v60 = vpack.c.b16 %v562_v51, %v7192_v49  ;;  %v600_v9 = vor.u32 %v599_v48, %v7183_v43 }
  0x33   : > { %v617_v5 = vshll.u32 %v577_v57, 16  ;;  %v714_v8 = vrot.slane %v577_v57, 5  ;;  %v5803_v10 = vrot.slane %v576_v61, 9  ;;  %v7208_v11 = vunpack.c.l.b16 %v545_v62 }
  0x34   : > { %v718_v7 = vrot.slane %v579_v59, 5  ;;  %811 = vrot.lane.b32.xlu1 %v807_v60, %s7004_s12  ;;  %v567_v12 = vunpack.c.h.b16 %v545_v62  ;;  %v580_v13 = vpack.c.b16 %v564_v63, %v564_v63  ;;  %v581_v14 = vpack.c.b16 %v565_v2, %v565_v2 }
  0x35   : > { %v5804_v15 = vrot.slane %v578_v58, 9  ;;  %v7210_v16 = vpack.c.b16 %v564_v63, %v562_v51  ;;  %v608_v17 = vshrl.u32 %v576_v61, 16  ;;  %v715_v18 = vsel %vm7170_vm8, %v5803_v10, %v714_v8  ;;  %v443_v8 = vld [vmem:[%s7155_s11 + $0x28] sm:$0xff] }
  0x36   : > { %v582_v19 = vpack.c.b16 %v7208_v11, %v7208_v11  ;;  %v7216_v20 = vpack.c.b16 %v567_v12, %v567_v12  ;;  %v808_v21 = vpack.c.b16 %v7208_v11, %v564_v63  ;;  %v788_v23 = vunpack.c.l.b16 %v715_v18 }
  0x37   : > { %v719_v24 = vsel %vm7170_vm8, %v5804_v15, %v718_v7  ;;  %v5805_v25 = vrot.slane %v580_v13, 9  ;;  %v722_v26 = vrot.slane %v581_v14, 5  ;;  %846 = vrot.lane.b32.xlu2 %v7210_v16, %s7005_s14  ;;  %v631_v27 = vshll.u32 %v579_v59, 16 }
  0x38   : > { %v789_v28 = vunpack.c.l.b16 %v719_v24  ;;  %v5806_v29 = vrot.slane %v582_v19, 9  ;;  %v726_v30 = vrot.slane %v7216_v20, 5  ;;  %v795_v31 = vpack.c.b16 %v788_v23, %v7177_v38 }
  0x39   : > { %v723_v32 = vsel %vm7170_vm8, %v5805_v25, %v722_v26  ;;  %v610_v33 = vrot.slane %v608_v17, 4  ;;  %v611_v34 = vshll.u32 %v576_v61, 16  ;;  %v622_v37 = vshrl.u32 %v578_v58, 16 }
  0x3a   : > { %v790_v35 = vunpack.c.l.b16 %v723_v32  ;;  %v7229_v36 = vsel %vm7170_vm8, %v5806_v29, %v726_v30  ;;  %v625_v39 = vshll.u32 %v578_v58, 16  ;;  %799 = vrot.lane.b32.xlu0 %v795_v31, %s7006_s15  ;;  %v833_v41 = vpack.c.b16 %v789_v28, %v788_v23  ;;  %v444_v32 = vld [vmem:[%s7155_s11 + $0x30] sm:$0xff] }
  0x3b   : > { %v613_v40 = vrot.slane %v611_v34, 5  ;;  %v601_v42 = vrot.slane %v600_v9, 4  ;;  %v605_v43 = vrot.slane %v603_v55, 5  ;;  %v791_v44 = vunpack.c.l.b16 %v7229_v36 }
  0x3c   : > { %813 = vrot.lane.b32.xlu1 %v808_v21, %s7004_s12  ;;  %v619_v45 = vrot.slane %v617_v5, 5  ;;  %v624_v46 = vrot.slane %v622_v37, 4  ;;  %v627_v47 = vrot.slane %v625_v39, 5  ;;  %v796_v48 = vpack.c.b16 %v790_v35, %v789_v28 }
  0x3d   : > { %v614_v50 = vor.u32 %v613_v40, %v610_v33  ;;  %v633_v51 = vrot.slane %v631_v27, 5  ;;  %v490_v52 = vshrl.u32 %v7199_v56, 16  ;;  %v493_v55 = vshll.u32 %v7199_v56, 16 }
  0x3e   : > { %v628_v54 = vor.u32 %v627_v47, %v624_v46  ;;  %v636_v57 = vshrl.u32 %v580_v13, 16  ;;  %v639_v58 = vshll.u32 %v580_v13, 16  ;;  %v645_v61 = vshll.u32 %v581_v14, 16 }
  0x3f   : > { %v615_v59 = vrot.slane %v614_v50, 4  ;;  %837 = vrot.lane.b32.xlu2 %v833_v41, %s7007_s19  ;;  %v492_v60 = vrot.slane %v490_v52, 7  ;;  %v650_v62 = vshrl.u32 %v582_v19, 16  ;;  %v653_v7 = vshll.u32 %v582_v19, 16 }
  0x40   : > { %v629_v63 = vrot.slane %v628_v54, 4  ;;  %v638_v2 = vrot.slane %v636_v57, 4  ;;  %v641_v5 = vrot.slane %v639_v58, 5  ;;  %v647_v12 = vrot.slane %v645_v61, 5 }
  0x41   : > { %v620_v9 = vsel %vm7237_vm11, %v615_v59, %v619_v45  ;;  %v495_v10 = vor.u32 %v493_v55, %v492_v60  ;;  %v652_v56 = vrot.slane %v650_v62, 4  ;;  %v655_v18 = vrot.slane %v653_v7, 5 }
  0x42   : > { %v634_v13 = vsel %vm7237_vm11, %v629_v63, %v633_v51  ;;  %v7248_v15 = vunpack.c.l.b16 %v620_v9  ;;  %v642_v17 = vor.u32 %v641_v5, %v638_v2  ;;  %801 = vrot.lane.b32.xlu0 %v796_v48, %s7006_s15  ;;  %v659_v21 = vshll.u32 %v7216_v20, 16 }
  0x43   : > { %v769_v14 = vunpack.c.l.b16 %v634_v13  ;;  %v534_v19 = vsel %vm7133_vm2, 0, %v495_v10  ;;  %v451_v23 = vpack.c.bf16 %v443_v8, %v443_v8  ;;  %v606_v24 = vsel %vm7237_vm11, %v601_v42, %v605_v43  ;;  %v445_v42 = vld [vmem:[%s7155_s11 + $0x38] sm:$0xff] }
  0x44   : > { %864 = vrot.lane.b32.xlu1 %v796_v48, %s7008_s21  ;;  %v546_v25 = vsel %vm7140_vm5, %v534_v19, 0  ;;  %v643_v26 = vrot.slane %v642_v17, 4  ;;  %v656_v27 = vor.u32 %v655_v18, %v652_v56  ;;  %v834_v28 = vpack.c.b16 %v791_v44, %v790_v35 }
  0x45   : > { %v7261_v29 = vunpack.c.l.b16 %v546_v25  ;;  %v569_v30 = vunpack.c.h.b16 %v546_v25  ;;  %v661_v31 = vrot.slane %v659_v21, 5  ;;  %v497_v34 = vshrl.u32 %v451_v23, 16 }
  0x46   : > { %v648_v20 = vsel %vm7237_vm11, %v643_v26, %v647_v12  ;;  %v657_v33 = vrot.slane %v656_v27, 4  ;;  %v500_v37 = vshll.u32 %v451_v23, 16  ;;  %v820_v39 = vpack.c.b16 %v769_v14, %v7248_v15 }
  0x47   : > { %v7269_v40 = vpack.c.b16 %v7261_v29, %v7261_v29  ;;  %v7271_v41 = vpack.c.b16 %v569_v30, %v569_v30  ;;  %v770_v35 = vunpack.c.l.b16 %v648_v20  ;;  %v499_v43 = vrot.slane %v497_v34, 7 }
  0x48   : > { %v452_v45 = vpack.c.bf16 %v444_v32, %v444_v32  ;;  %v7274_v46 = vunpack.c.l.b16 %v606_v24  ;;  %v662_v48 = vsel %vm7237_vm11, %v657_v33, %v661_v31  ;;  %v453_v50 = vpack.c.bf16 %v445_v42, %v445_v42 }
  0x49   : > { %v7276_v47 = vpack.c.b16 %v770_v35, %v769_v14  ;;  %v664_v51 = vshrl.u32 %v7269_v40, 16  ;;  %v667_v52 = vshll.u32 %v7269_v40, 16  ;;  %v673_v54 = vshll.u32 %v7271_v41, 16 }
  0x4a   : > { %v502_v55 = vor.u32 %v500_v37, %v499_v43  ;;  %839 = vrot.lane.b32.xlu0 %v834_v28, %s7007_s19  ;;  %v504_v57 = vshrl.u32 %v452_v45, 16  ;;  %v507_v58 = vshll.u32 %v452_v45, 16  ;;  %v771_v59 = vunpack.c.l.b16 %v662_v48 }
  0x4b   : > { %781 = vrot.lane.b32.xlu2 %v7276_v47, %s7010_s25  ;;  %v666_v60 = vrot.slane %v664_v51, 4  ;;  %v669_v61 = vrot.slane %v667_v52, 5  ;;  %v775_v62 = vpack.c.b16 %v7248_v15, %v7274_v46  ;;  %v675_v7 = vrot.slane %v673_v54, 5 }
  0x4c   : > { %824 = vrot.lane.b32.xlu1 %v820_v39, %s7009_s22  ;;  %v535_v63 = vsel %vm7133_vm2, 0, %v502_v55  ;;  %v506_v2 = vrot.slane %v504_v57, 7  ;;  %v511_v9 = vshrl.u32 %v453_v50, 16  ;;  %v7295_v10 = vpack.c.b16 %v7261_v29, %v7208_v11 }
  0x4d   : > { %v670_v5 = vor.u32 %v669_v61, %v666_v60  ;;  %v547_v8 = vsel %vm7140_vm5, %v535_v63, 0  ;;  %v821_v17 = vpack.c.b16 %v771_v59, %v770_v35  ;;  %v514_v24 = vshll.u32 %v453_v50, 16 }
  0x4e   : > { %v7297_v12 = vunpack.c.l.b16 %v547_v8  ;;  %v571_v56 = vunpack.c.h.b16 %v547_v8  ;;  %v509_v13 = vor.u32 %v507_v58, %v506_v2  ;;  %v513_v23 = vrot.slane %v511_v9, 7 }
  0x4f   : > { %v671_v15 = vrot.slane %v670_v5, 4  ;;  %v5807_v30 = vrot.slane %v7269_v40, 9  ;;  %v730_v31 = vrot.slane %v7271_v41, 5  ;;  %vm939_vm4 = vcmask 261120  }
  0x50   : > { %v586_v18 = vpack.c.b16 %v7297_v12, %v7297_v12  ;;  %v587_v14 = vpack.c.b16 %v571_v56, %v571_v56  ;;  %v536_v19 = vsel %vm7133_vm2, 0, %v509_v13  ;;  %v516_v35 = vor.u32 %v514_v24, %v513_v23 }
  0x51   : > { %v676_v21 = vsel %vm7237_vm11, %v671_v15, %v675_v7  ;;  %v548_v11 = vsel %vm7140_vm5, %v536_v19, 0  ;;  %v731_v48 = vsel %vm7170_vm8, %v5807_v30, %v730_v31  ;;  %vm930_vm6 = vcmask 228352  }
  0x52   : > { %779 = vrot.lane.b32.xlu0 %v775_v62, %s7010_s25  ;;  %v772_v25 = vunpack.c.l.b16 %v676_v21  ;;  %v678_v26 = vshrl.u32 %v586_v18, 16  ;;  %v681_v27 = vshll.u32 %v586_v18, 16  ;;  %v687_v28 = vshll.u32 %v587_v14, 16 }
  0x53   : > { %826 = vrot.lane.b32.xlu2 %v821_v17, %s7009_s22  ;;  %v7313_v32 = vunpack.c.l.b16 %v548_v11  ;;  %v573_v20 = vunpack.c.h.b16 %v548_v11  ;;  %v537_v55 = vsel %vm7133_vm2, 0, %v516_v35  ;;  %v792_v57 = vunpack.c.l.b16 %v731_v48 }
  0x54   : > { %848 = vrot.lane.b32.xlu1 %v7295_v10, %s7005_s14  ;;  %v680_v33 = vrot.slane %v678_v26, 4  ;;  %v683_v34 = vrot.slane %v681_v27, 5  ;;  %v777_v42 = vpack.c.b16 %v772_v25, %v771_v59  ;;  %v689_v45 = vrot.slane %v687_v28, 5 }
  0x55   : > { %v588_v37 = vpack.c.b16 %v7313_v32, %v7313_v32  ;;  %v589_v39 = vpack.c.b16 %v573_v20, %v573_v20  ;;  %v549_v62 = vsel %vm7140_vm5, %v537_v55, 0  ;;  %v797_v2 = vpack.c.b16 %v792_v57, %v791_v44 }
  0x56   : > { %v684_v43 = vor.u32 %v683_v34, %v680_v33  ;;  %v734_v7 = vrot.slane %v587_v14, 5  ;;  %v741_v9 = vunpack.c.l.b16 %v549_v62  ;;  %v809_v14 = vpack.c.b16 %v7297_v12, %v7261_v29 }
  0x57   : > { %v692_v50 = vshrl.u32 %v588_v37, 16  ;;  %v695_v40 = vshll.u32 %v588_v37, 16  ;;  %v701_v51 = vshll.u32 %v589_v39, 16  ;;  %v5809_v17 = vrot.slane %v588_v37, 9 }
  0x58   : > { %v685_v41 = vrot.slane %v684_v43, 4  ;;  %v738_v15 = vrot.slane %v589_v39, 5  ;;  %v743_v36 = vpack.c.b16 %v741_v9, %v741_v9  ;;  %v7347_v29 = vpack.c.b16 %v7313_v32, %v7297_v12 }
  0x59   : > { %v694_v52 = vrot.slane %v692_v50, 4  ;;  %v697_v54 = vrot.slane %v695_v40, 5  ;;  %v703_v61 = vrot.slane %v701_v51, 5  ;;  %v845_v51 = vpack.c.b16 %v7160_v6, %v741_v9 }
  0x5a   : > { %855 = vrot.lane.b32.xlu0 %v7276_v47, %s7011_s27  ;;  %v690_v58 = vsel %vm7237_vm11, %v685_v41, %v689_v45  ;;  %v5808_v47 = vrot.slane %v586_v18, 9  ;;  %v742_v18 = vunpack.c.h.b16 %v549_v62  ;;  %v739_v21 = vsel %vm7170_vm8, %v5809_v17, %v738_v15  ;;  %v952_v41 = vld [vmem:[%s9677_s1 + $0x10] sm:$0x3] }
  0x5b   : > { %v773_v59 = vunpack.c.l.b16 %v690_v58  ;;  %857 = vrot.lane.b32.xlu2 %v777_v42, %s7011_s27  ;;  %v698_v60 = vor.u32 %v697_v54, %v694_v52  ;;  %v746_v11 = vshrl.u32 %v743_v36, 16  ;;  %v749_v23 = vshll.u32 %v743_v36, 16 }
  0x5c   : > { %783 = vrot.lane.b32.xlu1 %v777_v42, %s7010_s25  ;;  %v735_v13 = vsel %vm7170_vm8, %v5808_v47, %v734_v7  ;;  %v794_v26 = vunpack.c.l.b16 %v739_v21  ;;  %v5810_v30 = vrot.slane %v743_v36, 9  ;;  %v810_v45 = vpack.c.b16 %v741_v9, %v7313_v32 }
  0x5d   : > { %v699_v63 = vrot.slane %v698_v60, 4  ;;  %v822_v5 = vpack.c.b16 %v773_v59, %v772_v25  ;;  %v793_v44 = vunpack.c.l.b16 %v735_v13  ;;  %v744_v25 = vpack.c.b16 %v742_v18, %v742_v18  ;;  %v6607_v60 = vld [vmem:[%s9677_s1] sm:$0xff] }
  0x5e   : > { %v748_v27 = vrot.slane %v746_v11, 4  ;;  %v751_v28 = vrot.slane %v749_v23, 5  ;;  %v966_v52 = vunpack.c.l.b16 %v952_v41  ;;  %vm972_vm7 = vcmask 293888  }
  0x5f   : > { %v704_v8 = vsel %vm7237_vm11, %v699_v63, %v703_v61  ;;  %v835_v24 = vpack.c.b16 %v793_v44, %v792_v57  ;;  %v761_v31 = vrot.slane %v744_v25, 5  ;;  %v798_v20 = vpack.c.b16 %v794_v26, %v793_v44 }
  0x60   : > { %v774_v56 = vunpack.c.l.b16 %v704_v8  ;;  %v752_v33 = vor.u32 %v751_v28, %v748_v27  ;;  %v755_v34 = vshll.u32 %v744_v25, 16  ;;  %v969_v54 = vpack.c.b16 %v966_v52, %v966_v52 }
  0x61   : > { %v762_v37 = vsel %vm7170_vm8, %v5810_v30, %v761_v31  ;;  %vm1397_vm9 = vcmask 523264   ;;  %vm1406_vm10 = vcmask 785408  }
  0x62   : > { %866 = vrot.lane.b32.xlu0 %v797_v2, %s7008_s21  ;;  %v778_v19 = vpack.c.b16 %v774_v56, %v773_v59  ;;  %v832_v39 = vunpack.c.l.b16 %v762_v37  ;;  %v753_v35 = vrot.slane %v752_v33, 4  ;;  %v757_v42 = vrot.slane %v755_v34, 5  ;;  %v6608_v59 = vld [vmem:[%s9677_s1 + $0x8] sm:$0xff] }
  0x63   : > { %803 = vrot.lane.b32.xlu2 %v797_v2, %s7006_s15  ;;  %v983_v55 = vsel %vm981_vm12, %v969_v54, 0 }
  0x64   : > { %828 = vrot.lane.b32.xlu1 %v822_v5, %s7009_s22  ;;  %v836_v43 = vpack.c.b16 %v832_v39, %v794_v26  ;;  %v758_v12 = vsel %vm7237_vm11, %v753_v35, %v757_v42  ;;  %v863_v40 = vpack.c.b16 %v7177_v38, %v832_v39  ;;  %990 = vmatpush.bf16.msra.mxu0 %v983_v55 }
  0x65   : > { %v819_v48 = vunpack.c.l.b16 %v758_v12 }
  0x67   : > { %v823_v50 = vpack.c.b16 %v819_v48, %v774_v56  ;;  %v854_v32 = vpack.c.b16 %v7274_v46, %v819_v48  ;;  %v763_v56 = vpack.c.b16 %v7192_v49, %v7160_v6 }
  0x68   : > { %991 = vmatpush.bf16.msra.mxu0 %v6608_v59 }
  0x6a   : > { %815 = vrot.lane.b32.xlu0 %v809_v14, %s7004_s12 }
  0x6b   : > { %841 = vrot.lane.b32.xlu2 %v835_v24, %s7007_s19 }
  0x6c   : > { %859 = vrot.lane.b32.xlu1 %v778_v19, %s7011_s27  ;;  %992 = vmatpush.bf16.msra.mxu0 %v6607_v60 }
  0x72   : > { %850 = vrot.lane.b32.xlu0 %v7347_v29, %s7005_s14 }
  0x73   : > { %868 = vrot.lane.b32.xlu2 %v798_v20, %s7008_s21 }
  0x74   : > { %805 = vrot.lane.b32.xlu1 %v798_v20, %s7006_s15 }
  0x7a   : > { %785 = vrot.lane.b32.xlu0 %v778_v19, %s7010_s25 }
  0x7b   : > { %817 = vrot.lane.b32.xlu2 %v810_v45, %s7004_s12  ;;  %s7012_s12 = smov 64  }
  0x7c   : > { %843 = vrot.lane.b32.xlu1 %v836_v43, %s7007_s19 }
  0x82   : > { %830 = vrot.lane.b32.xlu0 %v823_v50, %s7009_s22 }
  0x83   : > { %852 = vrot.lane.b32.xlu2 %v845_v51, %s7005_s14  ;;  %s7013_s14 = smov 96  }
  0x84   : > { %870 = vrot.lane.b32.xlu1 %v863_v40, %s7008_s21 }
  0x8a   : > { %861 = vrot.lane.b32.xlu0 %v854_v32, %s7011_s27 }
  0x91   : > { %v847_v57 = vpop.permute.xlu2 %846 }
  0x99   : > { %v838_v63 = vpop.permute.xlu2 %837 }
  0xa5   : > { %v782_v47 = vpop.permute.xlu2 %781 }
  0xa6   : > { %v812_v58 = vpop.permute.xlu1 %811  ;;  %v878_v25 = vsel %vm872_vm13, %v7210_v16, %v782_v47 }
  0xac   : > { %v800_v61 = vpop.permute.xlu0 %799 }
  0xad   : > { %v827_v9 = vpop.permute.xlu2 %826 }
  0xae   : > { %v814_v62 = vpop.permute.xlu1 %813 }
  0xb4   : > { %v802_v2 = vpop.permute.xlu0 %801 }
  0xb5   : > { %v858_v14 = vpop.permute.xlu2 %857  ;;  %v889_v27 = vsel %vm885_vm14, %v878_v25, %v802_v2 }
  0xb6   : > { %v865_v5 = vpop.permute.xlu1 %864  ;;  %v898_v31 = vsel %vm894_vm15, %v889_v27, %v814_v62 }
  0xb7   : > { %v907_v20 = vsel %vm903_vm0, %v898_v31, %v827_v9  ;;  %v7418_v9 = vld [vmem:[#allocation2] ss:$0 sm:$0xff] }
  0xbc   : > { %v840_v7 = vpop.permute.xlu0 %839 }
  0xbd   : > { %v804_v26 = vpop.permute.xlu2 %803  ;;  %v916_v33 = vsel %vm912_vm1, %v907_v20, %v840_v7 }
  0xbe   : > { %v825_v8 = vpop.permute.xlu1 %824 }
  0xc4   : > { %v780_v13 = vpop.permute.xlu0 %779 }
  0xc5   : > { %v875_v15 = vsel %vm872_vm13, %v763_v56, %v780_v13  ;;  %v842_v39 = vpop.permute.xlu2 %841 }
  0xc6   : > { %v849_v17 = vpop.permute.xlu1 %848  ;;  %v887_v36 = vsel %vm885_vm14, %v875_v15, %v800_v61 }
  0xc7   : > { %v896_v44 = vsel %vm894_vm15, %v887_v36, %v812_v58  ;;  %v925_v34 = vsel %vm921_vm3, %v916_v33, %v849_v17  ;;  %v6626_v17 = vld [vmem:[%s9679_s3 + $0x88] sm:$0xff] }
  0xc8   : > { %v905_v18 = vsel %vm903_vm0, %v896_v44, %v825_v8  ;;  %v934_v35 = vsel %vm930_vm6, %v925_v34, %v858_v14  ;;  %1671 = vmatpush.bf16.msra.mxu3 %v6626_v17  ;;  %v6625_v44 = vld [vmem:[%s9679_s3 + $0x80] sm:$0xff] }
  0xc9   : > { %v914_v19 = vsel %vm912_vm1, %v905_v18, %v838_v63 }
  0xca   : > { %v923_v49 = vsel %vm921_vm3, %v914_v19, %v847_v57 }
  0xcc   : > { %v856_v21 = vpop.permute.xlu0 %855  ;;  %1672 = vmatpush.bf16.msra.mxu3 %v6625_v44 }
  0xcd   : > { %v932_v23 = vsel %vm930_vm6, %v923_v49, %v856_v21  ;;  %v869_v40 = vpop.permute.xlu2 %868 }
  0xce   : > { %v784_v11 = vpop.permute.xlu1 %783  ;;  %v941_v24 = vsel %vm939_vm4, %v932_v23, %v865_v5 }
  0xcf   : > { %5819 = vmatmul.msk.bf16.vlgmr.msra.gmra.mxu0 %vm972_vm7, %v941_v24  ;;  %v881_v37 = vsel %vm872_vm13, %v7295_v10, %v784_v11 }
  0xd0   : > { %v891_v43 = vsel %vm885_vm14, %v881_v37, %v804_v26 }
  0xd4   : > { %v867_v28 = vpop.permute.xlu0 %866 }
  0xd5   : > { %v943_v12 = vsel %vm939_vm4, %v934_v35, %v867_v28  ;;  %v818_v55 = vpop.permute.xlu2 %817 }
  0xd6   : > { %v829_v30 = vpop.permute.xlu1 %828 }
  0xdc   : > { %v816_v16 = vpop.permute.xlu0 %815 }
  0xdd   : > { %v900_v45 = vsel %vm894_vm15, %v891_v43, %v816_v16  ;;  %v853_v2 = vpop.permute.xlu2 %852 }
  0xde   : > { %v860_v42 = vpop.permute.xlu1 %859  ;;  %v909_v48 = vsel %vm903_vm0, %v900_v45, %v829_v30 }
  0xdf   : > { %5820 = vmatmul.msk.bf16.gmra.mxu0 %vm972_vm7, %v943_v12  ;;  %v918_v51 = vsel %vm912_vm1, %v909_v48, %v842_v39 }
  0xe4   : > { %v851_v50 = vpop.permute.xlu0 %850 }
  0xe5   : > { %v927_v32 = vsel %vm921_vm3, %v918_v51, %v851_v50 }
  0xe6   : > { %v806_v10 = vpop.permute.xlu1 %805  ;;  %v936_v41 = vsel %vm930_vm6, %v927_v32, %v860_v42 }
  0xe7   : > { %v945_v57 = vsel %vm939_vm4, %v936_v41, %v869_v40 }
  0xec   : > { %v786_v52 = vpop.permute.xlu0 %785 }
  0xed   : > { %v884_v54 = vsel %vm872_vm13, %v7347_v29, %v786_v52 }
  0xee   : > { %v893_v58 = vsel %vm885_vm14, %v884_v54, %v806_v10  ;;  %v844_v59 = vpop.permute.xlu1 %843 }
  0xef   : > { %5821 = vmatmul.msk.bf16.gmra.mxu0 %vm972_vm7, %v945_v57  ;;  %v902_v60 = vsel %vm894_vm15, %v893_v58, %v818_v55 }
  0xf4   : > { %v831_v61 = vpop.permute.xlu0 %830 }
  0xf5   : > { %v911_v62 = vsel %vm903_vm0, %v902_v60, %v831_v61 }
  0xf6   : > { %v920_v63 = vsel %vm912_vm1, %v911_v62, %v844_v59  ;;  %v871_v47 = vpop.permute.xlu1 %870 }
  0xf7   : > { %v929_v5 = vsel %vm921_vm3, %v920_v63, %v853_v2 }
  0xfc   : > { %v862_v29 = vpop.permute.xlu0 %861 }
  0xfd   : > { %v938_v7 = vsel %vm930_vm6, %v929_v5, %v862_v29 }
  0xfe   : > { %v947_v8 = vsel %vm939_vm4, %v938_v7, %v871_v47 }
  0xff   : > { %5822 = vmatmul.msk.bf16.gmra.mxu0 %vm972_vm7, %v947_v8 }
 0x14c   : > { %v994_v56 = vpop.f32.mrf.mxu0 }
 0x14d   : > { %v7421_v13 = vadd.f32 %v7418_v9, %v994_v56 }
 0x14f   : > { %v1014_v15 = vmax.f32 %v7421_v13, 0.0 }
 0x151   : > { %v1022_v36 = vpack.c.bf16 %v1014_v15, %v1014_v15 }
 0x153   : > { %v1031_v18 = vshrl.u32 %v1022_v36, 16  ;;  %v1034_v49 = vshll.u32 %v1022_v36, 16 }
 0x154   : > { %v996_v14 = vpop.f32.mrf.mxu0 }
 0x155   : > { %v1033_v19 = vrot.slane %v1031_v18, 7  ;;  %v7431_v21 = vadd.f32 %v7418_v9, %v996_v14 }
 0x157   : > { %v1036_v11 = vor.u32 %v1034_v49, %v1033_v19  ;;  %v1015_v23 = vmax.f32 %v7431_v21, 0.0 }
 0x159   : > { %v1094_v24 = vsel %vm7133_vm2, 0, %v1036_v11  ;;  %v1023_v25 = vpack.c.bf16 %v1015_v23, %v1015_v23 }
 0x15a   : > { %v1102_v26 = vsel %vm7140_vm5, %v1094_v24, 0 }
 0x15b   : > { %v7438_v27 = vunpack.c.l.b16 %v1102_v26  ;;  %v1118_v28 = vunpack.c.h.b16 %v1102_v26  ;;  %v1038_v30 = vshrl.u32 %v1023_v25, 16  ;;  %v1041_v31 = vshll.u32 %v1023_v25, 16 }
 0x15c   : > { %v999_v20 = vpop.f32.mrf.mxu0 }
 0x15d   : > { %v1132_v33 = vpack.c.b16 %v1118_v28, %v1118_v28  ;;  %v1040_v34 = vrot.slane %v1038_v30, 7  ;;  %v7441_v37 = vadd.f32 %v7418_v9, %v999_v20  ;;  %v1131_v39 = vpack.c.b16 %v7438_v27, %v7438_v27 }
 0x15f   : > { %v1043_v16 = vor.u32 %v1041_v31, %v1040_v34  ;;  %v1016_v35 = vmax.f32 %v7441_v37, 0.0  ;;  %v5823_v42 = vrot.slane %v1131_v39, 9  ;;  %v1245_v43 = vrot.slane %v1132_v33, 5 }
 0x160   : > { %v1146_v12 = vshrl.u32 %v1131_v39, 16  ;;  %v1149_v45 = vshll.u32 %v1131_v39, 16  ;;  %v1155_v59 = vshll.u32 %v1132_v33, 16 }
 0x161   : > { %v1095_v48 = vsel %vm7133_vm2, 0, %v1043_v16  ;;  %v1024_v50 = vpack.c.bf16 %v1016_v35, %v1016_v35  ;;  %v1246_v54 = vsel %vm7170_vm8, %v5823_v42, %v1245_v43 }
 0x162   : > { %v1103_v40 = vsel %vm7140_vm5, %v1095_v48, 0  ;;  %v1148_v51 = vrot.slane %v1146_v12, 4  ;;  %v1151_v10 = vrot.slane %v1149_v45, 5  ;;  %v1317_v2 = vunpack.c.l.b16 %v1246_v54 }
 0x163   : > { %v7450_v32 = vunpack.c.l.b16 %v1103_v40  ;;  %v1120_v41 = vunpack.c.h.b16 %v1103_v40  ;;  %v1045_v52 = vshrl.u32 %v1024_v50, 16  ;;  %v1048_v55 = vshll.u32 %v1024_v50, 16 }
 0x164   : > { %v1001_v57 = vpop.f32.mrf.mxu0  ;;  %v1152_v58 = vor.u32 %v1151_v10, %v1148_v51  ;;  %v1157_v56 = vrot.slane %v1155_v59, 5  ;;  %v1324_v43 = vpack.c.b16 %v1317_v2, %v7177_v38 }
 0x165   : > { %v1047_v60 = vrot.slane %v1045_v52, 7  ;;  %v7455_v61 = vadd.f32 %v7418_v9, %v1001_v57  ;;  %v1133_v62 = vpack.c.b16 %v7450_v32, %v7450_v32  ;;  %v1134_v63 = vpack.c.b16 %v1120_v41, %v1120_v41 }
 0x166   : > { %v1153_v8 = vrot.slane %v1152_v58, 4 }
 0x167   : > { %v1050_v5 = vor.u32 %v1048_v55, %v1047_v60  ;;  %v1017_v47 = vmax.f32 %v7455_v61, 0.0  ;;  %v5824_v29 = vrot.slane %v1133_v62, 9  ;;  %v1249_v7 = vrot.slane %v1134_v63, 5 }
 0x168   : > { %v1160_v17 = vshrl.u32 %v1133_v62, 16  ;;  %v1163_v15 = vshll.u32 %v1133_v62, 16  ;;  %v1169_v14 = vshll.u32 %v1134_v63, 16  ;;  %v1158_v20 = vsel %vm7237_vm11, %v1153_v8, %v1157_v56 }
 0x169   : > { %v1096_v36 = vsel %vm7133_vm2, 0, %v1050_v5  ;;  %v1025_v44 = vpack.c.bf16 %v1017_v47, %v1017_v47  ;;  %v1250_v18 = vsel %vm7170_vm8, %v5824_v29, %v1249_v7  ;;  %v7484_v40 = vunpack.c.l.b16 %v1158_v20 }
 0x16a   : > { %v1318_v19 = vunpack.c.l.b16 %v1250_v18  ;;  %v1104_v49 = vsel %vm7140_vm5, %v1096_v36, 0  ;;  %v1162_v11 = vrot.slane %v1160_v17, 4  ;;  %v1165_v23 = vrot.slane %v1163_v15, 5 }
 0x16b   : > { %v1052_v24 = vshrl.u32 %v1025_v44, 16  ;;  %v7466_v25 = vunpack.c.l.b16 %v1104_v49  ;;  %v1122_v26 = vunpack.c.h.b16 %v1104_v49  ;;  %v1055_v28 = vshll.u32 %v1025_v44, 16 }
 0x16c   : > { %v1004_v30 = vpop.f32.mrf.mxu0  ;;  %v1354_v31 = vpack.c.b16 %v1318_v19, %v1317_v2  ;;  %v1166_v33 = vor.u32 %v1165_v23, %v1162_v11  ;;  %v1171_v45 = vrot.slane %v1169_v14, 5  ;;  %v1305_v7 = vpack.c.b16 %v7484_v40, %v7274_v46 }
 0x16d   : > { %v1054_v34 = vrot.slane %v1052_v24, 7  ;;  %v7471_v39 = vadd.f32 %v7418_v9, %v1004_v30  ;;  %v1136_v16 = vpack.c.b16 %v1122_v26, %v1122_v26  ;;  %v7475_v35 = vpack.c.b16 %v7466_v25, %v7450_v32 }
 0x16e   : > { %1358 = vrot.lane.b32.xlu2 %v1354_v31, %s7008_s21  ;;  %v1135_v42 = vpack.c.b16 %v7466_v25, %v7466_v25  ;;  %v1167_v12 = vrot.slane %v1166_v33, 4 }
 0x16f   : > { %v1057_v48 = vor.u32 %v1055_v28, %v1054_v34  ;;  %v1018_v50 = vmax.f32 %v7471_v39, 0.0  ;;  %1367 = vrot.lane.b32.xlu0 %v7475_v35, %s7012_s12  ;;  %v1253_v51 = vrot.slane %v1136_v16, 5  ;;  %v1183_v58 = vshll.u32 %v1136_v16, 16 }
 0x170   : > { %v5825_v10 = vrot.slane %v1135_v42, 9  ;;  %v1172_v41 = vsel %vm7237_vm11, %v1167_v12, %v1171_v45  ;;  %v1174_v52 = vshrl.u32 %v1135_v42, 16  ;;  %v1177_v54 = vshll.u32 %v1135_v42, 16 }
 0x171   : > { %v1097_v55 = vsel %vm7133_vm2, 0, %v1057_v48  ;;  %v1026_v57 = vpack.c.bf16 %v1018_v50, %v1018_v50  ;;  %v7490_v59 = vunpack.c.l.b16 %v1172_v41  ;;  %v1185_v24 = vrot.slane %v1183_v58, 5 }
 0x172   : > { %v1105_v60 = vsel %vm7140_vm5, %v1097_v55, 0  ;;  %v1254_v62 = vsel %vm7170_vm8, %v5825_v10, %v1253_v51  ;;  %v1176_v63 = vrot.slane %v1174_v52, 4  ;;  %v1179_v2 = vrot.slane %v1177_v54, 5 }
 0x173   : > { %v7496_v5 = vunpack.c.l.b16 %v1105_v60  ;;  %v1124_v47 = vunpack.c.h.b16 %v1105_v60  ;;  %v1059_v29 = vshrl.u32 %v1026_v57, 16  ;;  %v1062_v8 = vshll.u32 %v1026_v57, 16 }
 0x174   : > { %v1006_v56 = vpop.f32.mrf.mxu0  ;;  %v1319_v17 = vunpack.c.l.b16 %v1254_v62  ;;  %v1180_v15 = vor.u32 %v1179_v2, %v1176_v63  ;;  %v1349_v36 = vpack.c.b16 %v7490_v59, %v7484_v40 }
 0x175   : > { %v1061_v44 = vrot.slane %v1059_v29, 7  ;;  %v7503_v18 = vadd.f32 %v7418_v9, %v1006_v56  ;;  %v1137_v14 = vpack.c.b16 %v7496_v5, %v7496_v5  ;;  %v1138_v49 = vpack.c.b16 %v1124_v47, %v1124_v47 }
 0x176   : > { %1309 = vrot.lane.b32.xlu2 %v1305_v7, %s7008_s21  ;;  %v7508_v11 = vpack.c.b16 %v1319_v17, %v1318_v19  ;;  %v1181_v23 = vrot.slane %v1180_v15, 4 }
 0x177   : > { %v1064_v26 = vor.u32 %v1062_v8, %v1061_v44  ;;  %v1019_v28 = vmax.f32 %v7503_v18, 0.0  ;;  %1328 = vrot.lane.b32.xlu0 %v1324_v43, %s7012_s12  ;;  %v5826_v30 = vrot.slane %v1137_v14, 9  ;;  %v1257_v31 = vrot.slane %v1138_v49, 5 }
 0x178   : > { %5903 = vmatmul.msk.bf16.vlgmr.msra.gmra.mxu3 %vm939_vm4, %v7508_v11  ;;  %v1186_v20 = vsel %vm7237_vm11, %v1181_v23, %v1185_v24  ;;  %v1188_v33 = vshrl.u32 %v1137_v14, 16  ;;  %v1191_v34 = vshll.u32 %v1137_v14, 16  ;;  %v1197_v16 = vshll.u32 %v1138_v49, 16 }
 0x179   : > { %v1098_v19 = vsel %vm7133_vm2, 0, %v1064_v26  ;;  %v1027_v42 = vpack.c.bf16 %v1019_v28, %v1019_v28  ;;  %v7518_v12 = vunpack.c.l.b16 %v1186_v20  ;;  %v1258_v43 = vsel %vm7170_vm8, %v5826_v30, %v1257_v31 }
 0x17a   : > { %v1320_v45 = vunpack.c.l.b16 %v1258_v43  ;;  %v1106_v48 = vsel %vm7140_vm5, %v1098_v19, 0  ;;  %v1190_v50 = vrot.slane %v1188_v33, 4  ;;  %v1193_v51 = vrot.slane %v1191_v34, 5 }
 0x17b   : > { %v1066_v10 = vshrl.u32 %v1027_v42, 16  ;;  %v1306_v41 = vpack.c.b16 %v7518_v12, %v7490_v59  ;;  %v7526_v52 = vunpack.c.l.b16 %v1106_v48  ;;  %v1069_v54 = vshll.u32 %v1027_v42, 16 }
 0x17c   : > { %v1009_v55 = vpop.f32.mrf.mxu0  ;;  %v1355_v57 = vpack.c.b16 %v1320_v45, %v1319_v17  ;;  %v1126_v58 = vunpack.c.h.b16 %v1106_v48  ;;  %v1194_v60 = vor.u32 %v1193_v51, %v1190_v50  ;;  %v1199_v8 = vrot.slane %v1197_v16, 5 }
 0x17d   : > { %v1068_v62 = vrot.slane %v1066_v10, 7  ;;  %1376 = vrot.lane.b32.xlu1 %v1306_v41, %s7013_s14  ;;  %v7530_v63 = vadd.f32 %v7418_v9, %v1009_v55  ;;  %v7534_v2 = vpack.c.b16 %v7526_v52, %v7496_v5  ;;  %v1139_v47 = vpack.c.b16 %v7526_v52, %v7526_v52 }
 0x17e   : > { %1360 = vrot.lane.b32.xlu2 %v1355_v57, %s7008_s21  ;;  %v1140_v29 = vpack.c.b16 %v1126_v58, %v1126_v58  ;;  %v1195_v7 = vrot.slane %v1194_v60, 4  ;;  %v1336_v14 = vpack.c.b16 %v7450_v32, %v7438_v27 }
 0x17f   : > { %v1071_v56 = vor.u32 %v1069_v54, %v1068_v62  ;;  %v1020_v17 = vmax.f32 %v7530_v63, 0.0  ;;  %1369 = vrot.lane.b32.xlu0 %v7534_v2, %s7012_s12  ;;  %v5827_v15 = vrot.slane %v1139_v47, 9  ;;  %v1202_v44 = vshrl.u32 %v1139_v47, 16 }
 0x180   : > { %v1261_v49 = vrot.slane %v1140_v29, 5  ;;  %v1200_v23 = vsel %vm7237_vm11, %v1195_v7, %v1199_v8  ;;  %v1205_v24 = vshll.u32 %v1139_v47, 16  ;;  %v1211_v32 = vshll.u32 %v1140_v29, 16 }
 0x181   : > { %v1099_v26 = vsel %vm7133_vm2, 0, %v1071_v56  ;;  %v1028_v28 = vpack.c.bf16 %v1020_v17, %v1020_v17  ;;  %v1204_v30 = vrot.slane %v1202_v44, 4  ;;  %v7548_v31 = vunpack.c.l.b16 %v1200_v23 }
 0x182   : > { %v1107_v20 = vsel %vm7140_vm5, %v1099_v26, 0  ;;  %v1262_v33 = vsel %vm7170_vm8, %v5827_v15, %v1261_v49  ;;  %v1207_v34 = vrot.slane %v1205_v24, 5  ;;  %v1213_v47 = vrot.slane %v1211_v32, 5 }
 0x183   : > { %v7554_v16 = vunpack.c.l.b16 %v1107_v20  ;;  %v1128_v19 = vunpack.c.h.b16 %v1107_v20  ;;  %v1073_v42 = vshrl.u32 %v1028_v28, 16  ;;  %v1076_v43 = vshll.u32 %v1028_v28, 16 }
 0x184   : > { %v1011_v48 = vpop.f32.mrf.mxu0  ;;  %v1321_v50 = vunpack.c.l.b16 %v1262_v33  ;;  %v1208_v51 = vor.u32 %v1207_v34, %v1204_v30  ;;  %v1350_v10 = vpack.c.b16 %v7548_v31, %v7518_v12 }
 0x185   : > { %v1075_v54 = vrot.slane %v1073_v42, 7  ;;  %1340 = vrot.lane.b32.xlu1 %v1336_v14, %s7013_s14  ;;  %v7560_v55 = vadd.f32 %v7418_v9, %v1011_v48  ;;  %v1141_v57 = vpack.c.b16 %v7554_v16, %v7554_v16  ;;  %v1142_v58 = vpack.c.b16 %v1128_v19, %v1128_v19 }
 0x186   : > { %1311 = vrot.lane.b32.xlu2 %v1306_v41, %s7008_s21  ;;  %v1326_v60 = vpack.c.b16 %v1321_v50, %v1320_v45  ;;  %v1209_v62 = vrot.slane %v1208_v51, 4 }
 0x187   : > { %v1078_v29 = vor.u32 %v1076_v43, %v1075_v54  ;;  %v1021_v7 = vmax.f32 %v7560_v55, 0.0  ;;  %1330 = vrot.lane.b32.xlu0 %v7508_v11, %s7012_s12  ;;  %v5828_v8 = vrot.slane %v1141_v57, 9  ;;  %v1265_v56 = vrot.slane %v1142_v58, 5 }
 0x188   : > { %5904 = vmatmul.msk.bf16.gmra.mxu3 %vm939_vm4, %v1326_v60  ;;  %v1214_v9 = vsel %vm7237_vm11, %v1209_v62, %v1213_v47  ;;  %v1216_v17 = vshrl.u32 %v1141_v57, 16  ;;  %v1219_v15 = vshll.u32 %v1141_v57, 16  ;;  %v1225_v44 = vshll.u32 %v1142_v58, 16 }
 0x189   : > { %v1100_v45 = vsel %vm7133_vm2, 0, %v1078_v29  ;;  %v1029_v41 = vpack.c.bf16 %v1021_v7, %v1021_v7  ;;  %v7573_v14 = vunpack.c.l.b16 %v1214_v9  ;;  %v1266_v49 = vsel %vm7170_vm8, %v5828_v8, %v1265_v56 }
 0x18a   : > { %v1322_v11 = vunpack.c.l.b16 %v1266_v49  ;;  %v1108_v23 = vsel %vm7140_vm5, %v1100_v45, 0  ;;  %v1218_v24 = vrot.slane %v1216_v17, 4  ;;  %v1221_v26 = vrot.slane %v1219_v15, 5 }
 0x18b   : > { %v1080_v28 = vshrl.u32 %v1029_v41, 16  ;;  %v1307_v30 = vpack.c.b16 %v7573_v14, %v7548_v31  ;;  %v7581_v20 = vunpack.c.l.b16 %v1108_v23  ;;  %v1130_v34 = vunpack.c.h.b16 %v1108_v23 }
 0x18c   : > { %v1356_v33 = vpack.c.b16 %v1322_v11, %v1321_v50  ;;  %v1222_v32 = vor.u32 %v1221_v26, %v1218_v24  ;;  %v1083_v42 = vshll.u32 %v1029_v41, 16  ;;  %v1227_v57 = vrot.slane %v1225_v44, 5 }
 0x18d   : > { %v1082_v19 = vrot.slane %v1080_v28, 7  ;;  %1378 = vrot.lane.b32.xlu1 %v1307_v30, %s7013_s14  ;;  %v7586_v43 = vpack.c.b16 %v7581_v20, %v7554_v16  ;;  %v1143_v48 = vpack.c.b16 %v7581_v20, %v7581_v20  ;;  %v1144_v51 = vpack.c.b16 %v1130_v34, %v1130_v34 }
 0x18e   : > { %1362 = vrot.lane.b32.xlu2 %v1356_v33, %s7008_s21  ;;  %v1223_v54 = vrot.slane %v1222_v32, 4  ;;  %v1337_v45 = vpack.c.b16 %v7496_v5, %v7466_v25 }
 0x18f   : > { %v1085_v58 = vor.u32 %v1083_v42, %v1082_v19  ;;  %1371 = vrot.lane.b32.xlu0 %v7586_v43, %s7012_s12  ;;  %v5829_v50 = vrot.slane %v1143_v48, 9  ;;  %v1230_v62 = vshrl.u32 %v1143_v48, 16  ;;  %v1233_v47 = vshll.u32 %v1143_v48, 16 }
 0x190   : > { %v1269_v29 = vrot.slane %v1144_v51, 5  ;;  %v1228_v7 = vsel %vm7237_vm11, %v1223_v54, %v1227_v57  ;;  %v1239_v8 = vshll.u32 %v1144_v51, 16 }
 0x191   : > { %v1101_v56 = vsel %vm7133_vm2, 0, %v1085_v58  ;;  %v1232_v9 = vrot.slane %v1230_v62, 4  ;;  %v1235_v17 = vrot.slane %v1233_v47, 5  ;;  %v7597_v15 = vunpack.c.l.b16 %v1228_v7 }
 0x192   : > { %v1109_v44 = vsel %vm7140_vm5, %v1101_v56, 0  ;;  %v1270_v41 = vsel %vm7170_vm8, %v5829_v50, %v1269_v29  ;;  %v1241_v28 = vrot.slane %v1239_v8, 5 }
 0x193   : > { %v1272_v49 = vunpack.c.l.b16 %v1109_v44  ;;  %v1273_v23 = vunpack.c.h.b16 %v1109_v44  ;;  %v1323_v24 = vunpack.c.l.b16 %v1270_v41  ;;  %v1236_v26 = vor.u32 %v1235_v17, %v1232_v9 }
 0x194   : > { %v1351_v33 = vpack.c.b16 %v7597_v15, %v7573_v14  ;;  %v1338_v44 = vpack.c.b16 %v7554_v16, %v7526_v52  ;;  %v6624_v52 = vld [vmem:[%s9679_s3 + $0x78] sm:$0xff] }
 0x195   : > { %1342 = vrot.lane.b32.xlu1 %v1337_v45, %s7013_s14  ;;  %v1327_v34 = vpack.c.b16 %v1323_v24, %v1322_v11  ;;  %v1237_v32 = vrot.slane %v1236_v26, 4  ;;  %v1274_v19 = vpack.c.b16 %v1272_v49, %v1272_v49  ;;  %v1275_v42 = vpack.c.b16 %v1273_v23, %v1273_v23  ;;  %1636 = vmatpush.bf16.msra.mxu2 %v6624_v52  ;;  %v6616_v26 = vld [vmem:[%s9679_s3 + $0x38] sm:$0xff] }
 0x196   : > { %1313 = vrot.lane.b32.xlu2 %v1307_v30, %s7008_s21  ;;  %v1366_v7 = vpack.c.b16 %v7160_v6, %v1272_v49  ;;  %v1339_v16 = vpack.c.b16 %v1272_v49, %v7581_v20  ;;  %1607 = vmatpush.bf16.msra.mxu1 %v6616_v26  ;;  %v6615_v20 = vld [vmem:[%s9679_s3 + $0x30] sm:$0xff]  ;;  %v6621_v49 = vld [vmem:[%s9679_s3 + $0x60] sm:$0xff] }
 0x197   : > { %1332 = vrot.lane.b32.xlu0 %v1326_v60, %s7012_s12  ;;  %v1242_v25 = vsel %vm7237_vm11, %v1237_v32, %v1241_v28  ;;  %v5830_v5 = vrot.slane %v1274_v19, 9  ;;  %v1292_v48 = vrot.slane %v1275_v42, 5  ;;  %v1277_v51 = vshrl.u32 %v1274_v19, 16  ;;  %v6622_v28 = vld [vmem:[%s9679_s3 + $0x68] sm:$0xff]  ;;  %v6620_v32 = vld [vmem:[%s9679_s3 + $0x58] sm:$0xff] }
 0x198   : > { %5905 = vmatmul.msk.bf16.gmra.mxu3 %vm939_vm4, %v1327_v34  ;;  %v7613_v54 = vunpack.c.l.b16 %v1242_v25  ;;  %v1280_v57 = vshll.u32 %v1274_v19, 16  ;;  %v1286_v62 = vshll.u32 %v1275_v42, 16  ;;  %v6613_v19 = vld [vmem:[%s9679_s3 + $0x20] sm:$0xff]  ;;  %v6619_v42 = vld [vmem:[%s9679_s3 + $0x50] sm:$0xff]  ;;  %v6612_v25 = vld [vmem:[%s9679_s3 + $0x18] sm:$0xff] }
 0x199   : > { %v1293_v11 = vsel %vm7170_vm8, %v5830_v5, %v1292_v48  ;;  %v1279_v58 = vrot.slane %v1277_v51, 4  ;;  %v6618_v5 = vld [vmem:[%s9679_s3 + $0x48] sm:$0xff]  ;;  %v6611_v48 = vld [vmem:[%s9679_s3 + $0x10] sm:$0xff]  ;;  %v6617_v51 = vld [vmem:[%s9679_s3 + $0x40] sm:$0xff] }
 0x19a   : > { %v1308_v30 = vpack.c.b16 %v7613_v54, %v7597_v15  ;;  %v1353_v50 = vunpack.c.l.b16 %v1293_v11  ;;  %v1282_v60 = vrot.slane %v1280_v57, 5  ;;  %v1288_v56 = vrot.slane %v1286_v62, 5  ;;  %1608 = vmatpush.bf16.msra.mxu1 %v6615_v20  ;;  %v6610_v57 = vld [vmem:[%s9679_s3 + $0x8] sm:$0xff]  ;;  %v6609_v11 = vld [vmem:[%s9679_s3] sm:$0xff] }
 0x19c   : > { %v1357_v47 = vpack.c.b16 %v1353_v50, %v1323_v24  ;;  %v1283_v29 = vor.u32 %v1282_v60, %v1279_v58  ;;  %v1384_v41 = vpack.c.b16 %v7177_v38, %v1353_v50  ;;  %v6623_v24 = vld [vmem:[%s9679_s3 + $0x70] sm:$0xff] }
 0x19d   : > { %1380 = vrot.lane.b32.xlu1 %v1308_v30, %s7013_s14  ;;  %1637 = vmatpush.bf16.msra.mxu2 %v6623_v24 }
 0x19e   : > { %1364 = vrot.lane.b32.xlu2 %v1357_v47, %s7008_s21  ;;  %v1284_v8 = vrot.slane %v1283_v29, 4 }
 0x19f   : > { %1373 = vrot.lane.b32.xlu0 %v1366_v7, %s7012_s12 }
 0x1a0   : > { %v1289_v9 = vsel %vm7237_vm11, %v1284_v8, %v1288_v56 }
 0x1a1   : > { %v7625_v17 = vunpack.c.l.b16 %v1289_v9  ;;  %1638 = vmatpush.bf16.msra.mxu2 %v6622_v28  ;;  %v1294_v9 = vpack.c.b16 %v7438_v27, %v7160_v6 }
 0x1a3   : > { %v1352_v45 = vpack.c.b16 %v7625_v17, %v7613_v54  ;;  %v1375_v23 = vpack.c.b16 %v7274_v46, %v7625_v17 }
 0x1a5   : > { %1344 = vrot.lane.b32.xlu1 %v1338_v44, %s7013_s14  ;;  %1639 = vmatpush.bf16.msra.mxu2 %v6621_v49 }
 0x1a6   : > { %1315 = vrot.lane.b32.xlu2 %v1308_v30, %s7008_s21 }
 0x1a7   : > { %1334 = vrot.lane.b32.xlu0 %v1327_v34, %s7012_s12  ;;  %v6614_v34 = vld [vmem:[%s9679_s3 + $0x28] sm:$0xff] }
 0x1a8   : > { %5906 = vmatmul.msk.bf16.gmra.mxu3 %vm939_vm4, %v1384_v41  ;;  %1609 = vmatpush.bf16.msra.mxu1 %v6614_v34 }
 0x1a9   : > { %1640 = vmatpush.bf16.msra.mxu2 %v6620_v32 }
 0x1ac   : > { %1610 = vmatpush.bf16.msra.mxu1 %v6613_v19 }
 0x1ad   : > { %1382 = vrot.lane.b32.xlu1 %v1375_v23, %s7013_s14  ;;  %1641 = vmatpush.bf16.msra.mxu2 %v6619_v42 }
 0x1b0   : > { %1611 = vmatpush.bf16.msra.mxu1 %v6612_v25 }
 0x1b1   : > { %1642 = vmatpush.bf16.msra.mxu2 %v6618_v5 }
 0x1b4   : > { %1612 = vmatpush.bf16.msra.mxu1 %v6611_v48 }
 0x1b5   : > { %1346 = vrot.lane.b32.xlu1 %v1339_v16, %s7013_s14  ;;  %1643 = vmatpush.bf16.msra.mxu2 %v6617_v51 }
 0x1b8   : > { %1613 = vmatpush.bf16.msra.mxu1 %v6610_v57 }
 0x1bc   : > { %1614 = vmatpush.bf16.msra.mxu1 %v6609_v11 }
 0x1c8   : > { %v1359_v58 = vpop.permute.xlu2 %1358 }
 0x1c9   : > { %v1421_v62 = vsel %vm939_vm4, %v1349_v36, %v1359_v58 }
 0x1d0   : > { %v1310_v50 = vpop.permute.xlu2 %1309 }
 0x1d1   : > { %v1387_v44 = vsel %vm939_vm4, %v1294_v9, %v1310_v50 }
 0x1d8   : > { %v1361_v8 = vpop.permute.xlu2 %1360 }
 0x1d9   : > { %v1424_v52 = vsel %vm939_vm4, %v1350_v10, %v1361_v8 }
 0x1e0   : > { %v1312_v59 = vpop.permute.xlu2 %1311 }
 0x1e1   : > { %v1368_v30 = vpop.permute.xlu0 %1367  ;;  %v1390_v28 = vsel %vm939_vm4, %v7475_v35, %v1312_v59  ;;  %v6627_v35 = vld [vmem:[#allocation4] sm:$0xff] }
 0x1e2   : > { %v1432_v47 = vsel %vm1397_vm9, %v1421_v62, %v1368_v30  ;;  %1733 = vmatpush.bf16.msrb.mxu3 %v6627_v35 }
 0x1e8   : > { %v1363_v26 = vpop.permute.xlu2 %1362 }
 0x1e9   : > { %v1329_v60 = vpop.permute.xlu0 %1328  ;;  %v1427_v12 = vsel %vm939_vm4, %v1351_v33, %v1363_v26 }
 0x1ea   : > { %v1399_v41 = vsel %vm1397_vm9, %v1387_v44, %v1329_v60 }
 0x1ef   : > { %v1377_v29 = vpop.permute.xlu1 %1376 }
 0x1f0   : > { %v1440_v7 = vsel %vm1406_vm10, %v1432_v47, %v1377_v29  ;;  %v1314_v31 = vpop.permute.xlu2 %1313 }
 0x1f1   : > { %1644 = vmatmul.bf16.vlgmr.msra.gmra.mxu2 %v1440_v7  ;;  %v1370_v56 = vpop.permute.xlu0 %1369  ;;  %v1393_v5 = vsel %vm939_vm4, %v7534_v2, %v1314_v31 }
 0x1f2   : > { %v1434_v16 = vsel %vm1397_vm9, %v1424_v52, %v1370_v56 }
 0x1f7   : > { %v1341_v23 = vpop.permute.xlu1 %1340 }
 0x1f8   : > { %v1408_v40 = vsel %vm1406_vm10, %v1399_v41, %v1341_v23  ;;  %v1365_v15 = vpop.permute.xlu2 %1364 }
 0x1f9   : > { %1615 = vmatmul.bf16.vlgmr.msra.gmra.mxu1 %v1408_v40  ;;  %v1331_v36 = vpop.permute.xlu0 %1330  ;;  %v1430_v57 = vsel %vm939_vm4, %v1352_v45, %v1365_v15 }
 0x1fa   : > { %v1401_v49 = vsel %vm1397_vm9, %v1390_v28, %v1331_v36 }
 0x1fb   : > { %v1674_v54 = vpop.f32.mrf.mxu3 }
 0x1ff   : > { %v1379_v24 = vpop.permute.xlu1 %1378 }
 0x200   : > { %v1443_v27 = vsel %vm1406_vm10, %v1434_v16, %v1379_v24  ;;  %v1316_v2 = vpop.permute.xlu2 %1315 }
 0x201   : > { %1649 = vmatmul.bf16.gmra.mxu2 %v1443_v27  ;;  %v1372_v20 = vpop.permute.xlu0 %1371  ;;  %v1396_v60 = vsel %vm939_vm4, %v7586_v43, %v1316_v2 }
 0x202   : > { %v1436_v10 = vsel %vm1397_vm9, %v1427_v12, %v1372_v20 }
 0x203   : > { %v1676_v17 = vpop.f32.mrf.mxu3 }
 0x207   : > { %v1343_v34 = vpop.permute.xlu1 %1342 }
 0x208   : > { %v1411_v32 = vsel %vm1406_vm10, %v1401_v49, %v1343_v34 }
 0x209   : > { %1620 = vmatmul.bf16.gmra.mxu1 %v1411_v32  ;;  %v1333_v42 = vpop.permute.xlu0 %1332 }
 0x20a   : > { %v1403_v48 = vsel %vm1397_vm9, %v1393_v5, %v1333_v42 }
 0x20b   : > { %v1679_v9 = vpop.f32.mrf.mxu3 }
 0x20f   : > { %v1381_v19 = vpop.permute.xlu1 %1380 }
 0x210   : > { %v1446_v25 = vsel %vm1406_vm10, %v1436_v10, %v1381_v19 }
 0x211   : > { %1654 = vmatmul.bf16.gmra.mxu2 %v1446_v25  ;;  %v1374_v33 = vpop.permute.xlu0 %1373 }
 0x212   : > { %v1438_v11 = vsel %vm1397_vm9, %v1430_v57, %v1374_v33 }
 0x213   : > { %v1681_v24 = vpop.f32.mrf.mxu3 }
 0x217   : > { %v1345_v51 = vpop.permute.xlu1 %1344 }
 0x218   : > { %v1414_v14 = vsel %vm1406_vm10, %v1403_v48, %v1345_v51 }
 0x219   : > { %1625 = vmatmul.bf16.gmra.mxu1 %v1414_v14  ;;  %v1335_v50 = vpop.permute.xlu0 %1334 }
 0x21a   : > { %v1405_v62 = vsel %vm1397_vm9, %v1396_v60, %v1335_v50 }
 0x21b   : > { %v1684_v32 = vpop.f32.mrf.mxu3 }
 0x21f   : > { %v1383_v58 = vpop.permute.xlu1 %1382 }
 0x220   : > { %v1449_v30 = vsel %vm1406_vm10, %v1438_v11, %v1383_v58 }
 0x221   : > { %1659 = vmatmul.bf16.gmra.mxu2 %v1449_v30 }
 0x223   : > { %v1686_v35 = vpop.f32.mrf.mxu3 }
 0x227   : > { %v1347_v47 = vpop.permute.xlu1 %1346 }
 0x228   : > { %v1417_v29 = vsel %vm1406_vm10, %v1405_v62, %v1347_v47 }
 0x229   : > { %1630 = vmatmul.bf16.gmra.mxu1 %v1417_v29 }
 0x22b   : > { %v1689_v30 = vpop.f32.mrf.mxu3 }
 0x274   : > { %v1645_v45 = vpop.f32.mrf.mxu2 }
 0x276   : > { %v1616_v7 = vpop.f32.mrf.mxu1 }
 0x277   : > { %v1646_v8 = vadd.f32 %v1645_v45, %v1616_v7 }
 0x279   : > { %v1675_v41 = vadd.f32 %v1674_v54, %v1646_v8  ;;  %v1691_v54 = vpop.f32.mrf.mxu3 }
 0x27b   : > { %v1694_v59 = vmax.f32 %v1675_v41, 0.0  ;;  %v6645_v41 = vld [vmem:[%s9679_s3 + $0x118] sm:$0xff] }
 0x27c   : > { %v1647_v56 = vpop.f32.mrf.mxu2  ;;  %2419 = vmatpush.bf16.msrb.mxu2 %v6645_v41 }
 0x27e   : > { %v1618_v44 = vpop.f32.mrf.mxu1 }
 0x27f   : > { %v1648_v23 = vadd.f32 %v1647_v56, %v1618_v44 }
 0x281   : > { %v1677_v40 = vadd.f32 %v1676_v17, %v1648_v23 }
 0x283   : > { %v1695_v36 = vmax.f32 %v1677_v40, 0.0 }
 0x284   : > { %v1650_v43 = vpop.f32.mrf.mxu2 }
 0x285   : > { %v1702_v52 = vpack.c.bf16 %v1695_v36, %v1694_v59  ;;  %v6644_v36 = vld [vmem:[%s9679_s3 + $0x110] sm:$0xff] }
 0x286   : > { %v1621_v16 = vpop.f32.mrf.mxu1  ;;  %2420 = vmatpush.bf16.msrb.mxu2 %v6644_v36 }
 0x287   : > { %5911 = vmatmul.msk.bf16.vlgmr.msrb.gmra.mxu3 %vm903_vm0, %v1702_v52  ;;  %v1651_v27 = vadd.f32 %v1650_v43, %v1621_v16 }
 0x289   : > { %v1680_v20 = vadd.f32 %v1679_v9, %v1651_v27 }
 0x28b   : > { %v1696_v12 = vmax.f32 %v1680_v20, 0.0 }
 0x28c   : > { %v1652_v26 = vpop.f32.mrf.mxu2 }
 0x28e   : > { %v1623_v28 = vpop.f32.mrf.mxu1 }
 0x28f   : > { %v1653_v49 = vadd.f32 %v1652_v26, %v1623_v28 }
 0x291   : > { %v1682_v34 = vadd.f32 %v1681_v24, %v1653_v49 }
 0x293   : > { %v1697_v31 = vmax.f32 %v1682_v34, 0.0 }
 0x294   : > { %v1655_v10 = vpop.f32.mrf.mxu2 }
 0x295   : > { %v1703_v19 = vpack.c.bf16 %v1697_v31, %v1696_v12 }
 0x296   : > { %v1626_v42 = vpop.f32.mrf.mxu1 }
 0x297   : > { %5912 = vmatmul.msk.bf16.gmra.mxu3 %vm903_vm0, %v1703_v19  ;;  %v1656_v25 = vadd.f32 %v1655_v10, %v1626_v42 }
 0x299   : > { %v1685_v51 = vadd.f32 %v1684_v32, %v1656_v25 }
 0x29b   : > { %v1698_v33 = vmax.f32 %v1685_v51, 0.0 }
 0x29c   : > { %v1657_v5 = vpop.f32.mrf.mxu2 }
 0x29e   : > { %v1628_v48 = vpop.f32.mrf.mxu1 }
 0x29f   : > { %v1658_v14 = vadd.f32 %v1657_v5, %v1628_v48 }
 0x2a1   : > { %v1687_v15 = vadd.f32 %v1686_v35, %v1658_v14 }
 0x2a3   : > { %v1699_v57 = vmax.f32 %v1687_v15, 0.0 }
 0x2a4   : > { %v1660_v11 = vpop.f32.mrf.mxu2 }
 0x2a5   : > { %v1704_v58 = vpack.c.bf16 %v1699_v57, %v1698_v33 }
 0x2a6   : > { %v1631_v2 = vpop.f32.mrf.mxu1 }
 0x2a7   : > { %5913 = vmatmul.msk.bf16.gmra.mxu3 %vm903_vm0, %v1704_v58  ;;  %v1661_v50 = vadd.f32 %v1660_v11, %v1631_v2 }
 0x2a9   : > { %v1690_v47 = vadd.f32 %v1689_v30, %v1661_v50 }
 0x2ab   : > { %v1700_v45 = vmax.f32 %v1690_v47, 0.0 }
 0x2ac   : > { %v1662_v60 = vpop.f32.mrf.mxu2 }
 0x2ae   : > { %v1633_v62 = vpop.f32.mrf.mxu1 }
 0x2af   : > { %v1663_v29 = vadd.f32 %v1662_v60, %v1633_v62 }
 0x2b1   : > { %v1692_v17 = vadd.f32 %v1691_v54, %v1663_v29 }
 0x2b3   : > { %v1701_v7 = vmax.f32 %v1692_v17, 0.0 }
 0x2b5   : > { %v1705_v8 = vpack.c.bf16 %v1701_v7, %v1700_v45 }
 0x2b7   : > { %5914 = vmatmul.msk.bf16.gmra.mxu3 %vm903_vm0, %v1705_v8 }
 0x30a   : > { %v1735_v56 = vpop.f32.mrf.mxu3 }
 0x30b   : > { %v7735_v9 = vadd.f32 %v1735_v56, %v7421_v13 }
 0x30d   : > { %v1763_v44 = vmax.f32 %v7735_v9, 0.0 }
 0x30f   : > { %v1771_v23 = vpack.c.bf16 %v1763_v44, %v1763_v44 }
 0x311   : > { %v1780_v40 = vshrl.u32 %v1771_v23, 16  ;;  %v1783_v52 = vshll.u32 %v1771_v23, 16 }
 0x312   : > { %v1737_v59 = vpop.f32.mrf.mxu3 }
 0x313   : > { %v1782_v43 = vrot.slane %v1780_v40, 7  ;;  %v7745_v16 = vadd.f32 %v1737_v59, %v7431_v21 }
 0x315   : > { %v1785_v13 = vor.u32 %v1783_v52, %v1782_v43  ;;  %v1764_v24 = vmax.f32 %v7745_v16, 0.0 }
 0x317   : > { %v1843_v27 = vsel %vm7133_vm2, 0, %v1785_v13  ;;  %v1772_v26 = vpack.c.bf16 %v1764_v24, %v1764_v24 }
 0x318   : > { %v1851_v28 = vsel %vm7140_vm5, %v1843_v27, 0 }
 0x319   : > { %v7752_v20 = vunpack.c.l.b16 %v1851_v28  ;;  %v1867_v49 = vunpack.c.h.b16 %v1851_v28  ;;  %v1787_v34 = vshrl.u32 %v1772_v26, 16  ;;  %v1790_v32 = vshll.u32 %v1772_v26, 16 }
 0x31a   : > { %v1740_v12 = vpop.f32.mrf.mxu3 }
 0x31b   : > { %v1881_v31 = vpack.c.b16 %v1867_v49, %v1867_v49  ;;  %v1789_v21 = vrot.slane %v1787_v34, 7  ;;  %v7755_v10 = vadd.f32 %v1740_v12, %v7441_v37  ;;  %v1880_v19 = vpack.c.b16 %v7752_v20, %v7752_v20 }
 0x31d   : > { %v1792_v42 = vor.u32 %v1790_v32, %v1789_v21  ;;  %v1765_v25 = vmax.f32 %v7755_v10, 0.0  ;;  %v5915_v35 = vrot.slane %v1880_v19, 9  ;;  %v1994_v5 = vrot.slane %v1881_v31, 5 }
 0x31e   : > { %v1895_v48 = vshrl.u32 %v1880_v19, 16  ;;  %v1898_v51 = vshll.u32 %v1880_v19, 16  ;;  %v1904_v57 = vshll.u32 %v1881_v31, 16 }
 0x31f   : > { %v1844_v14 = vsel %vm7133_vm2, 0, %v1792_v42  ;;  %v1773_v15 = vpack.c.bf16 %v1765_v25, %v1765_v25  ;;  %v1995_v33 = vsel %vm7170_vm8, %v5915_v35, %v1994_v5 }
 0x320   : > { %v1852_v37 = vsel %vm7140_vm5, %v1844_v14, 0  ;;  %v2066_v11 = vunpack.c.l.b16 %v1995_v33  ;;  %v1897_v58 = vrot.slane %v1895_v48, 4  ;;  %v1900_v30 = vrot.slane %v1898_v51, 5 }
 0x321   : > { %v7766_v2 = vunpack.c.l.b16 %v1852_v37  ;;  %v1869_v50 = vunpack.c.h.b16 %v1852_v37  ;;  %v1794_v60 = vshrl.u32 %v1773_v15, 16  ;;  %v1797_v62 = vshll.u32 %v1773_v15, 16 }
 0x322   : > { %v1742_v47 = vpop.f32.mrf.mxu3  ;;  %v2073_v29 = vpack.c.b16 %v2066_v11, %v7177_v38  ;;  %v1901_v54 = vor.u32 %v1900_v30, %v1897_v58  ;;  %v1906_v44 = vrot.slane %v1904_v57, 5 }
 0x323   : > { %v1796_v17 = vrot.slane %v1794_v60, 7  ;;  %v7770_v45 = vadd.f32 %v1742_v47, %v7455_v61  ;;  %v1882_v7 = vpack.c.b16 %v7766_v2, %v7766_v2  ;;  %v1883_v8 = vpack.c.b16 %v1869_v50, %v1869_v50 }
 0x324   : > { %2077 = vrot.lane.b32.xlu1 %v2073_v29, %s7012_s12  ;;  %v1902_v56 = vrot.slane %v1901_v54, 4  ;;  %v2085_v60 = vpack.c.b16 %v7766_v2, %v7752_v20 }
 0x325   : > { %v1799_v41 = vor.u32 %v1797_v62, %v1796_v17  ;;  %v1766_v23 = vmax.f32 %v7770_v45, 0.0  ;;  %v5916_v40 = vrot.slane %v1882_v7, 9  ;;  %v1998_v59 = vrot.slane %v1883_v8, 5 }
 0x326   : > { %v1907_v36 = vsel %vm7237_vm11, %v1902_v56, %v1906_v44  ;;  %v1909_v43 = vshrl.u32 %v1882_v7, 16  ;;  %v1912_v52 = vshll.u32 %v1882_v7, 16  ;;  %v1918_v61 = vshll.u32 %v1883_v8, 16 }
 0x327   : > { %v1845_v13 = vsel %vm7133_vm2, 0, %v1799_v41  ;;  %v1774_v24 = vpack.c.bf16 %v1766_v23, %v1766_v23  ;;  %v7780_v27 = vunpack.c.l.b16 %v1907_v36  ;;  %v1999_v26 = vsel %vm7170_vm8, %v5916_v40, %v1998_v59 }
 0x328   : > { %v2067_v28 = vunpack.c.l.b16 %v1999_v26  ;;  %v1853_v49 = vsel %vm7140_vm5, %v1845_v13, 0  ;;  %v1911_v34 = vrot.slane %v1909_v43, 4  ;;  %v1914_v32 = vrot.slane %v1912_v52, 5 }
 0x329   : > { %v1801_v12 = vshrl.u32 %v1774_v24, 16  ;;  %v2054_v31 = vpack.c.b16 %v7780_v27, %v7274_v46  ;;  %v7788_v21 = vunpack.c.l.b16 %v1853_v49  ;;  %v1871_v25 = vunpack.c.h.b16 %v1853_v49 }
 0x32a   : > { %v1745_v19 = vpop.f32.mrf.mxu3  ;;  %v2103_v42 = vpack.c.b16 %v2067_v28, %v2066_v11  ;;  %v1915_v35 = vor.u32 %v1914_v32, %v1911_v34  ;;  %v1804_v48 = vshll.u32 %v1774_v24, 16  ;;  %v1920_v57 = vrot.slane %v1918_v61, 5 }
 0x32b   : > { %v1803_v5 = vrot.slane %v1801_v12, 7  ;;  %2058 = vrot.lane.b32.xlu2 %v2054_v31, %s7008_s21  ;;  %v7792_v51 = vadd.f32 %v1745_v19, %v7471_v39  ;;  %v1884_v14 = vpack.c.b16 %v7788_v21, %v7788_v21  ;;  %v1885_v15 = vpack.c.b16 %v1871_v25, %v1871_v25 }
 0x32c   : > { %2107 = vrot.lane.b32.xlu0 %v2103_v42, %s7008_s21  ;;  %v1916_v33 = vrot.slane %v1915_v35, 4  ;;  %v7814_v59 = vpack.c.b16 %v7788_v21, %v7766_v2 }
 0x32d   : > { %v1806_v37 = vor.u32 %v1804_v48, %v1803_v5  ;;  %v1767_v11 = vmax.f32 %v7792_v51, 0.0  ;;  %v5917_v58 = vrot.slane %v1884_v14, 9  ;;  %v1923_v30 = vshrl.u32 %v1884_v14, 16 }
 0x32e   : > { %v2002_v50 = vrot.slane %v1885_v15, 5  ;;  %v1921_v39 = vsel %vm7237_vm11, %v1916_v33, %v1920_v57  ;;  %v1926_v62 = vshll.u32 %v1884_v14, 16  ;;  %v1932_v44 = vshll.u32 %v1885_v15, 16 }
 0x32f   : > { %v1846_v47 = vsel %vm7133_vm2, 0, %v1806_v37  ;;  %v1775_v29 = vpack.c.bf16 %v1767_v11, %v1767_v11  ;;  %v1925_v54 = vrot.slane %v1923_v30, 4  ;;  %v7804_v17 = vunpack.c.l.b16 %v1921_v39 }
 0x330   : > { %v1854_v7 = vsel %vm7140_vm5, %v1846_v47, 0  ;;  %v2003_v8 = vsel %vm7170_vm8, %v5917_v58, %v2002_v50  ;;  %v1928_v56 = vrot.slane %v1926_v62, 5  ;;  %v1934_v12 = vrot.slane %v1932_v44, 5 }
 0x331   : > { %v7810_v41 = vunpack.c.l.b16 %v1854_v7  ;;  %v1873_v23 = vunpack.c.h.b16 %v1854_v7  ;;  %v1808_v40 = vshrl.u32 %v1775_v29, 16  ;;  %v1811_v36 = vshll.u32 %v1775_v29, 16 }
 0x332   : > { %v1747_v43 = vpop.f32.mrf.mxu3  ;;  %v2068_v52 = vunpack.c.l.b16 %v2003_v8  ;;  %v1929_v61 = vor.u32 %v1928_v56, %v1925_v54  ;;  %v2098_v13 = vpack.c.b16 %v7804_v17, %v7780_v27 }
 0x333   : > { %v1810_v24 = vrot.slane %v1808_v40, 7  ;;  %2116 = vrot.lane.b32.xlu2 %v7814_v59, %s7012_s12  ;;  %v7821_v26 = vadd.f32 %v1747_v43, %v7503_v18  ;;  %v1886_v49 = vpack.c.b16 %v7810_v41, %v7810_v41  ;;  %v1887_v34 = vpack.c.b16 %v1873_v23, %v1873_v23 }
 0x334   : > { %2089 = vrot.lane.b32.xlu0 %v2085_v60, %s7013_s14  ;;  %v2074_v2 = vpack.c.b16 %v2068_v52, %v2067_v28  ;;  %v1930_v32 = vrot.slane %v1929_v61, 4 }
 0x335   : > { %v1813_v31 = vor.u32 %v1811_v36, %v1810_v24  ;;  %v1768_v19 = vmax.f32 %v7821_v26, 0.0  ;;  %v5918_v42 = vrot.slane %v1886_v49, 9  ;;  %v2006_v25 = vrot.slane %v1887_v34, 5 }
 0x336   : > { %6031 = vmatmul.msk.bf16.vlgmr.msrb.gmra.mxu2 %vm939_vm4, %v2074_v2  ;;  %v1935_v18 = vsel %vm7237_vm11, %v1930_v32, %v1934_v12  ;;  %v1937_v35 = vshrl.u32 %v1886_v49, 16  ;;  %v1940_v5 = vshll.u32 %v1886_v49, 16  ;;  %v1946_v48 = vshll.u32 %v1887_v34, 16 }
 0x337   : > { %v1847_v14 = vsel %vm7133_vm2, 0, %v1813_v31  ;;  %v1776_v15 = vpack.c.bf16 %v1768_v19, %v1768_v19  ;;  %v7832_v28 = vunpack.c.l.b16 %v1935_v18  ;;  %v2007_v33 = vsel %vm7170_vm8, %v5918_v42, %v2006_v25 }
 0x338   : > { %v2069_v57 = vunpack.c.l.b16 %v2007_v33  ;;  %v1855_v37 = vsel %vm7140_vm5, %v1847_v14, 0  ;;  %v1939_v11 = vrot.slane %v1937_v35, 4  ;;  %v1942_v58 = vrot.slane %v1940_v5, 5 }
 0x339   : > { %v1815_v30 = vshrl.u32 %v1776_v15, 16  ;;  %v2055_v50 = vpack.c.b16 %v7832_v28, %v7804_v17  ;;  %v7840_v60 = vunpack.c.l.b16 %v1855_v37  ;;  %v1875_v47 = vunpack.c.h.b16 %v1855_v37 }
 0x33a   : > { %v1750_v39 = vpop.f32.mrf.mxu3  ;;  %v2104_v62 = vpack.c.b16 %v2069_v57, %v2068_v52  ;;  %v1943_v29 = vor.u32 %v1942_v58, %v1939_v11  ;;  %v1818_v7 = vshll.u32 %v1776_v15, 16  ;;  %v1948_v40 = vrot.slane %v1946_v48, 5 }
 0x33b   : > { %v1817_v54 = vrot.slane %v1815_v30, 7  ;;  %2060 = vrot.lane.b32.xlu2 %v2055_v50, %s7008_s21  ;;  %2125 = vrot.lane.b32.xlu1 %v2055_v50, %s7013_s14  ;;  %v7845_v8 = vadd.f32 %v1750_v39, %v7530_v63  ;;  %v1888_v56 = vpack.c.b16 %v7840_v60, %v7840_v60  ;;  %v1889_v44 = vpack.c.b16 %v1875_v47, %v1875_v47 }
 0x33c   : > { %2109 = vrot.lane.b32.xlu0 %v2104_v62, %s7008_s21  ;;  %v1944_v23 = vrot.slane %v1943_v29, 4  ;;  %v2086_v24 = vpack.c.b16 %v7810_v41, %v7788_v21  ;;  %v7867_v14 = vpack.c.b16 %v7840_v60, %v7810_v41 }
 0x33d   : > { %v1820_v36 = vor.u32 %v1818_v7, %v1817_v54  ;;  %v1769_v43 = vmax.f32 %v7845_v8, 0.0  ;;  %v5919_v52 = vrot.slane %v1888_v56, 9  ;;  %v1951_v61 = vshrl.u32 %v1888_v56, 16 }
 0x33e   : > { %v2010_v49 = vrot.slane %v1889_v44, 5  ;;  %v1949_v63 = vsel %vm7237_vm11, %v1944_v23, %v1948_v40  ;;  %v1954_v34 = vshll.u32 %v1888_v56, 16  ;;  %v1960_v21 = vshll.u32 %v1889_v44, 16 }
 0x33f   : > { %v1848_v32 = vsel %vm7133_vm2, 0, %v1820_v36  ;;  %v1777_v12 = vpack.c.bf16 %v1769_v43, %v1769_v43  ;;  %v1953_v31 = vrot.slane %v1951_v61, 4  ;;  %v7857_v19 = vunpack.c.l.b16 %v1949_v63 }
 0x340   : > { %v1856_v42 = vsel %vm7140_vm5, %v1848_v32, 0  ;;  %v2011_v25 = vsel %vm7170_vm8, %v5919_v52, %v2010_v49  ;;  %v1956_v18 = vrot.slane %v1954_v34, 5  ;;  %v1962_v29 = vrot.slane %v1960_v21, 5 }
 0x341   : > { %v7863_v35 = vunpack.c.l.b16 %v1856_v42  ;;  %v1877_v5 = vunpack.c.h.b16 %v1856_v42  ;;  %v1822_v48 = vshrl.u32 %v1777_v12, 16  ;;  %v1825_v15 = vshll.u32 %v1777_v12, 16 }
 0x342   : > { %v1752_v33 = vpop.f32.mrf.mxu3  ;;  %v2070_v37 = vunpack.c.l.b16 %v2011_v25  ;;  %v1957_v11 = vor.u32 %v1956_v18, %v1953_v31  ;;  %v2099_v58 = vpack.c.b16 %v7857_v19, %v7832_v28 }
 0x343   : > { %v1824_v30 = vrot.slane %v1822_v48, 7  ;;  %2079 = vrot.lane.b32.xlu1 %v2074_v2, %s7012_s12  ;;  %2118 = vrot.lane.b32.xlu2 %v7867_v14, %s7012_s12  ;;  %v7875_v50 = vadd.f32 %v1752_v33, %v7560_v55  ;;  %v1890_v41 = vpack.c.b16 %v7863_v35, %v7863_v35  ;;  %v1891_v39 = vpack.c.b16 %v1877_v5, %v1877_v5 }
 0x344   : > { %2091 = vrot.lane.b32.xlu0 %v2086_v24, %s7013_s14  ;;  %v2075_v62 = vpack.c.b16 %v2070_v37, %v2069_v57  ;;  %v1958_v47 = vrot.slane %v1957_v11, 4 }
 0x345   : > { %v1827_v54 = vor.u32 %v1825_v15, %v1824_v30  ;;  %v1770_v7 = vmax.f32 %v7875_v50, 0.0  ;;  %v5920_v56 = vrot.slane %v1890_v41, 9  ;;  %v2014_v2 = vrot.slane %v1891_v39, 5 }
 0x346   : > { %6032 = vmatmul.msk.bf16.gmra.mxu2 %vm939_vm4, %v2075_v62  ;;  %v1963_v55 = vsel %vm7237_vm11, %v1958_v47, %v1962_v29  ;;  %v1965_v44 = vshrl.u32 %v1890_v41, 16  ;;  %v1968_v23 = vshll.u32 %v1890_v41, 16  ;;  %v1974_v40 = vshll.u32 %v1891_v39, 16 }
 0x347   : > { %v1849_v36 = vsel %vm7133_vm2, 0, %v1827_v54  ;;  %v1778_v43 = vpack.c.bf16 %v1770_v7, %v1770_v7  ;;  %v7886_v57 = vunpack.c.l.b16 %v1963_v55  ;;  %v2015_v52 = vsel %vm7170_vm8, %v5920_v56, %v2014_v2 }
 0x348   : > { %v2071_v61 = vunpack.c.l.b16 %v2015_v52  ;;  %v1857_v24 = vsel %vm7140_vm5, %v1849_v36, 0  ;;  %v1967_v49 = vrot.slane %v1965_v44, 4  ;;  %v1970_v63 = vrot.slane %v1968_v23, 5 }
 0x349   : > { %v1829_v34 = vshrl.u32 %v1778_v43, 16  ;;  %v2056_v32 = vpack.c.b16 %v7886_v57, %v7857_v19  ;;  %v7894_v12 = vunpack.c.l.b16 %v1857_v24  ;;  %v1879_v42 = vunpack.c.h.b16 %v1857_v24 }
 0x34a   : > { %v2105_v31 = vpack.c.b16 %v2071_v61, %v2070_v37  ;;  %v1971_v25 = vor.u32 %v1970_v63, %v1967_v49  ;;  %v1832_v21 = vshll.u32 %v1778_v43, 16  ;;  %v1976_v33 = vrot.slane %v1974_v40, 5 }
 0x34b   : > { %v1831_v18 = vrot.slane %v1829_v34, 7  ;;  %2062 = vrot.lane.b32.xlu2 %v2056_v32, %s7008_s21  ;;  %2127 = vrot.lane.b32.xlu1 %v2056_v32, %s7013_s14  ;;  %v1892_v5 = vpack.c.b16 %v7894_v12, %v7894_v12  ;;  %v1893_v48 = vpack.c.b16 %v1879_v42, %v1879_v42  ;;  %v7911_v44 = vpack.c.b16 %v7894_v12, %v7863_v35 }
 0x34c   : > { %2111 = vrot.lane.b32.xlu0 %v2105_v31, %s7008_s21  ;;  %v1972_v15 = vrot.slane %v1971_v25, 4  ;;  %v2087_v24 = vpack.c.b16 %v7863_v35, %v7840_v60 }
 0x34d   : > { %v1834_v11 = vor.u32 %v1832_v21, %v1831_v18  ;;  %v5921_v30 = vrot.slane %v1892_v5, 9  ;;  %v1979_v41 = vshrl.u32 %v1892_v5, 16  ;;  %v1982_v37 = vshll.u32 %v1892_v5, 16 }
 0x34e   : > { %v2018_v39 = vrot.slane %v1893_v48, 5  ;;  %v1977_v47 = vsel %vm7237_vm11, %v1972_v15, %v1976_v33  ;;  %v1988_v29 = vshll.u32 %v1893_v48, 16 }
 0x34f   : > { %v1850_v54 = vsel %vm7133_vm2, 0, %v1834_v11  ;;  %v1981_v7 = vrot.slane %v1979_v41, 4  ;;  %v1984_v56 = vrot.slane %v1982_v37, 5  ;;  %v7905_v2 = vunpack.c.l.b16 %v1977_v47 }
 0x350   : > { %v1858_v55 = vsel %vm7140_vm5, %v1850_v54, 0  ;;  %v2019_v23 = vsel %vm7170_vm8, %v5921_v30, %v2018_v39  ;;  %v1990_v49 = vrot.slane %v1988_v29, 5 }
 0x351   : > { %v2021_v40 = vunpack.c.l.b16 %v1858_v55  ;;  %v2022_v36 = vunpack.c.h.b16 %v1858_v55  ;;  %v2072_v43 = vunpack.c.l.b16 %v2019_v23  ;;  %v1985_v52 = vor.u32 %v1984_v56, %v1981_v7  ;;  %v6635_v23 = vld [vmem:[%s9679_s3 + $0xc8] sm:$0xff] }
 0x352   : > { %v2100_v63 = vpack.c.b16 %v7905_v2, %v7886_v57  ;;  %2355 = vmatpush.bf16.msrb.mxu0 %v6635_v23 }
 0x353   : > { %2081 = vrot.lane.b32.xlu1 %v2075_v62, %s7012_s12  ;;  %2120 = vrot.lane.b32.xlu2 %v7911_v44, %s7012_s12  ;;  %v2076_v34 = vpack.c.b16 %v2072_v43, %v2071_v61  ;;  %v1986_v32 = vrot.slane %v1985_v52, 4  ;;  %v2023_v31 = vpack.c.b16 %v2021_v40, %v2021_v40  ;;  %v2024_v42 = vpack.c.b16 %v2022_v36, %v2022_v36  ;;  %v6642_v52 = vld [vmem:[%s9679_s3 + $0x100] sm:$0xff] }
 0x354   : > { %2093 = vrot.lane.b32.xlu0 %v2087_v24, %s7013_s14  ;;  %v2115_v54 = vpack.c.b16 %v7160_v6, %v2021_v40  ;;  %v2088_v56 = vpack.c.b16 %v2021_v40, %v7894_v12  ;;  %v6634_v12 = vld [vmem:[%s9679_s3 + $0xc0] sm:$0xff]  ;;  %v6643_v40 = vld [vmem:[%s9679_s3 + $0x108] sm:$0xff]  ;;  %v6632_v24 = vld [vmem:[%s9679_s3 + $0xb0] sm:$0xff] }
 0x355   : > { %v1991_v25 = vsel %vm7237_vm11, %v1986_v32, %v1990_v49  ;;  %v5922_v18 = vrot.slane %v2023_v31, 9  ;;  %v2041_v60 = vrot.slane %v2024_v42, 5  ;;  %v2026_v35 = vshrl.u32 %v2023_v31, 16  ;;  %2384 = vmatpush.bf16.msrb.mxu1 %v6643_v40  ;;  %v6641_v49 = vld [vmem:[%s9679_s3 + $0xf8] sm:$0xff]  ;;  %v6640_v32 = vld [vmem:[%s9679_s3 + $0xf0] sm:$0xff] }
 0x356   : > { %6033 = vmatmul.msk.bf16.gmra.mxu2 %vm939_vm4, %v2076_v34  ;;  %v7926_v21 = vunpack.c.l.b16 %v1991_v25  ;;  %v2029_v62 = vshll.u32 %v2023_v31, 16  ;;  %v2035_v11 = vshll.u32 %v2024_v42, 16  ;;  %2356 = vmatpush.bf16.msrb.mxu0 %v6634_v12  ;;  %v6630_v31 = vld [vmem:[%s9679_s3 + $0xa0] sm:$0xff]  ;;  %v6639_v42 = vld [vmem:[%s9679_s3 + $0xe8] sm:$0xff]  ;;  %v6629_v25 = vld [vmem:[%s9679_s3 + $0x98] sm:$0xff] }
 0x357   : > { %v2042_v5 = vsel %vm7170_vm8, %v5922_v18, %v2041_v60  ;;  %v2028_v61 = vrot.slane %v2026_v35, 4  ;;  %v6638_v18 = vld [vmem:[%s9679_s3 + $0xe0] sm:$0xff]  ;;  %v6628_v60 = vld [vmem:[%s9679_s3 + $0x90] sm:$0xff]  ;;  %v6637_v35 = vld [vmem:[%s9679_s3 + $0xd8] sm:$0xff] }
 0x358   : > { %v2057_v48 = vpack.c.b16 %v7926_v21, %v7905_v2  ;;  %v2102_v15 = vunpack.c.l.b16 %v2042_v5  ;;  %v2031_v33 = vrot.slane %v2029_v62, 5  ;;  %v2037_v39 = vrot.slane %v2035_v11, 5  ;;  %v6636_v62 = vld [vmem:[%s9679_s3 + $0xd0] sm:$0xff] }
 0x359   : > { %2385 = vmatpush.bf16.msrb.mxu1 %v6642_v52 }
 0x35a   : > { %v2106_v30 = vpack.c.b16 %v2102_v15, %v2072_v43  ;;  %v2032_v41 = vor.u32 %v2031_v33, %v2028_v61  ;;  %v2133_v55 = vpack.c.b16 %v7177_v38, %v2102_v15  ;;  %v6633_v43 = vld [vmem:[%s9679_s3 + $0xb8] sm:$0xff]  ;;  %v2043_v15 = vpack.c.b16 %v7752_v20, %v7160_v6 }
 0x35b   : > { %2064 = vrot.lane.b32.xlu2 %v2057_v48, %s7008_s21  ;;  %2129 = vrot.lane.b32.xlu1 %v2057_v48, %s7013_s14 }
 0x35c   : > { %2113 = vrot.lane.b32.xlu0 %v2106_v30, %s7008_s21  ;;  %v2033_v37 = vrot.slane %v2032_v41, 4  ;;  %2357 = vmatpush.bf16.msrb.mxu0 %v6633_v43 }
 0x35d   : > { %2386 = vmatpush.bf16.msrb.mxu1 %v6641_v49 }
 0x35e   : > { %v2038_v47 = vsel %vm7237_vm11, %v2033_v37, %v2037_v39 }
 0x35f   : > { %v7937_v29 = vunpack.c.l.b16 %v2038_v47 }
 0x360   : > { %2358 = vmatpush.bf16.msrb.mxu0 %v6632_v24 }
 0x361   : > { %v2101_v7 = vpack.c.b16 %v7937_v29, %v7926_v21  ;;  %v2124_v36 = vpack.c.b16 %v7274_v46, %v7937_v29  ;;  %2387 = vmatpush.bf16.msrb.mxu1 %v6640_v32 }
 0x363   : > { %2083 = vrot.lane.b32.xlu1 %v2076_v34, %s7012_s12  ;;  %2122 = vrot.lane.b32.xlu2 %v2115_v54, %s7012_s12  ;;  %v6631_v34 = vld [vmem:[%s9679_s3 + $0xa8] sm:$0xff] }
 0x364   : > { %2095 = vrot.lane.b32.xlu0 %v2088_v56, %s7013_s14  ;;  %2359 = vmatpush.bf16.msrb.mxu0 %v6631_v34 }
 0x365   : > { %2388 = vmatpush.bf16.msrb.mxu1 %v6639_v42 }
 0x366   : > { %6034 = vmatmul.msk.bf16.gmra.mxu2 %vm939_vm4, %v2133_v55 }
 0x368   : > { %2360 = vmatpush.bf16.msrb.mxu0 %v6630_v31 }
 0x369   : > { %2389 = vmatpush.bf16.msrb.mxu1 %v6638_v18 }
 0x36b   : > { %2131 = vrot.lane.b32.xlu1 %v2124_v36, %s7013_s14 }
 0x36c   : > { %2361 = vmatpush.bf16.msrb.mxu0 %v6629_v25 }
 0x36d   : > { %2390 = vmatpush.bf16.msrb.mxu1 %v6637_v35 }
 0x370   : > { %2362 = vmatpush.bf16.msrb.mxu0 %v6628_v60 }
 0x371   : > { %2391 = vmatpush.bf16.msrb.mxu1 %v6636_v62 }
 0x385   : > { %v2059_v5 = vpop.permute.xlu2 %2058 }
 0x386   : > { %v2136_v11 = vsel %vm939_vm4, %v2043_v15, %v2059_v5 }
 0x38d   : > { %v2117_v48 = vpop.permute.xlu2 %2116 }
 0x395   : > { %v2061_v39 = vpop.permute.xlu2 %2060 }
 0x396   : > { %v2078_v33 = vpop.permute.xlu1 %2077  ;;  %v2139_v36 = vsel %vm939_vm4, %v7814_v59, %v2061_v39 }
 0x397   : > { %v2147_v30 = vsel %vm1397_vm9, %v2136_v11, %v2078_v33 }
 0x39d   : > { %v2119_v23 = vpop.permute.xlu2 %2118 }
 0x39e   : > { %v2108_v61 = vpop.permute.xlu0 %2107 }
 0x39f   : > { %v2168_v47 = vsel %vm939_vm4, %v2098_v13, %v2108_v61 }
 0x3a0   : > { %v2179_v56 = vsel %vm1397_vm9, %v2168_v47, %v2117_v48 }
 0x3a5   : > { %v2063_v24 = vpop.permute.xlu2 %2062 }
 0x3a6   : > { %v2090_v41 = vpop.permute.xlu0 %2089  ;;  %v2142_v59 = vsel %vm939_vm4, %v7867_v14, %v2063_v24  ;;  %v6646_v14 = vld [vmem:[#allocation4 + $0x8] sm:$0xff] }
 0x3a7   : > { %v2155_v37 = vsel %vm1406_vm10, %v2147_v30, %v2090_v41  ;;  %2482 = vmatpush.bf16.msra.mxu3 %v6646_v14 }
 0x3a8   : > { %2363 = vmatmul.bf16.vlgmr.msrb.gmra.mxu0 %v2155_v37 }
 0x3ab   : > { %3457 = vmatpush.bf16.msrb.mxu3 %v6678_v22 }
 0x3ad   : > { %v2126_v54 = vpop.permute.xlu1 %2125  ;;  %v2121_v28 = vpop.permute.xlu2 %2120 }
 0x3ae   : > { %v2187_v20 = vsel %vm1406_vm10, %v2179_v56, %v2126_v54  ;;  %v2110_v55 = vpop.permute.xlu0 %2109 }
 0x3af   : > { %2392 = vmatmul.bf16.vlgmr.msrb.gmra.mxu1 %v2187_v20  ;;  %v2171_v27 = vsel %vm939_vm4, %v2099_v58, %v2110_v55 }
 0x3b0   : > { %v2181_v13 = vsel %vm1397_vm9, %v2171_v27, %v2119_v23 }
 0x3b5   : > { %v2080_v12 = vpop.permute.xlu1 %2079  ;;  %v2065_v62 = vpop.permute.xlu2 %2064 }
 0x3b6   : > { %v2149_v40 = vsel %vm1397_vm9, %v2139_v36, %v2080_v12  ;;  %v2092_v43 = vpop.permute.xlu0 %2091  ;;  %v2145_v5 = vsel %vm939_vm4, %v7911_v44, %v2065_v62 }
 0x3b7   : > { %v2158_v52 = vsel %vm1406_vm10, %v2149_v40, %v2092_v43 }
 0x3b8   : > { %2368 = vmatmul.bf16.gmra.mxu0 %v2158_v52 }
 0x3b9   : > { %v2422_v44 = vpop.f32.mrf.mxu2 }
 0x3bd   : > { %v2128_v17 = vpop.permute.xlu1 %2127 }
 0x3be   : > { %v2190_v49 = vsel %vm1406_vm10, %v2181_v13, %v2128_v17  ;;  %v2112_v34 = vpop.permute.xlu0 %2111 }
 0x3bf   : > { %2397 = vmatmul.bf16.gmra.mxu1 %v2190_v49  ;;  %v2174_v19 = vsel %vm939_vm4, %v2100_v63, %v2112_v34  ;;  %v2123_v63 = vpop.permute.xlu2 %2122 }
 0x3c0   : > { %v2183_v18 = vsel %vm1397_vm9, %v2174_v19, %v2121_v28 }
 0x3c1   : > { %v2424_v37 = vpop.f32.mrf.mxu2 }
 0x3c5   : > { %v2082_v32 = vpop.permute.xlu1 %2081 }
 0x3c6   : > { %v2151_v31 = vsel %vm1397_vm9, %v2142_v59, %v2082_v32  ;;  %v2094_v42 = vpop.permute.xlu0 %2093 }
 0x3c7   : > { %v2161_v25 = vsel %vm1406_vm10, %v2151_v31, %v2094_v42 }
 0x3c8   : > { %2373 = vmatmul.bf16.gmra.mxu0 %v2161_v25 }
 0x3c9   : > { %v2427_v56 = vpop.f32.mrf.mxu2 }
 0x3cd   : > { %v2130_v58 = vpop.permute.xlu1 %2129 }
 0x3ce   : > { %v2193_v60 = vsel %vm1406_vm10, %v2183_v18, %v2130_v58  ;;  %v2114_v35 = vpop.permute.xlu0 %2113 }
 0x3cf   : > { %2402 = vmatmul.bf16.gmra.mxu1 %v2193_v60  ;;  %v2177_v2 = vsel %vm939_vm4, %v2101_v7, %v2114_v35 }
 0x3d0   : > { %v2185_v11 = vsel %vm1397_vm9, %v2177_v2, %v2123_v63 }
 0x3d1   : > { %v2429_v52 = vpop.f32.mrf.mxu2 }
 0x3d5   : > { %v2084_v61 = vpop.permute.xlu1 %2083 }
 0x3d6   : > { %v2153_v48 = vsel %vm1397_vm9, %v2145_v5, %v2084_v61  ;;  %v2096_v15 = vpop.permute.xlu0 %2095 }
 0x3d7   : > { %v2164_v57 = vsel %vm1406_vm10, %v2153_v48, %v2096_v15 }
 0x3d8   : > { %2378 = vmatmul.bf16.gmra.mxu0 %v2164_v57 }
 0x3d9   : > { %v2432_v59 = vpop.f32.mrf.mxu2 }
 0x3dd   : > { %v2132_v33 = vpop.permute.xlu1 %2131 }
 0x3de   : > { %v2196_v30 = vsel %vm1406_vm10, %v2185_v11, %v2132_v33 }
 0x3df   : > { %2407 = vmatmul.bf16.gmra.mxu1 %v2196_v30 }
 0x3e1   : > { %v2434_v58 = vpop.f32.mrf.mxu2 }
 0x3e9   : > { %v2437_v15 = vpop.f32.mrf.mxu2 }
 0x425   : > { %v2364_v41 = vpop.f32.mrf.mxu0 }
 0x42c   : > { %v2393_v39 = vpop.f32.mrf.mxu1 }
 0x42d   : > { %v2366_v47 = vpop.f32.mrf.mxu0  ;;  %v2394_v54 = vadd.f32 %v2393_v39, %v2364_v41 }
 0x42f   : > { %v2423_v55 = vadd.f32 %v2422_v44, %v2394_v54  ;;  %v2439_v44 = vpop.f32.mrf.mxu2 }
 0x431   : > { %v2442_v7 = vmax.f32 %v2423_v55, 0.0 }
 0x434   : > { %v2395_v20 = vpop.f32.mrf.mxu1 }
 0x435   : > { %v2396_v23 = vadd.f32 %v2395_v20, %v2366_v47  ;;  %v2369_v21 = vpop.f32.mrf.mxu0 }
 0x437   : > { %v2425_v29 = vadd.f32 %v2424_v37, %v2396_v23 }
 0x439   : > { %v2443_v36 = vmax.f32 %v2425_v29, 0.0 }
 0x43b   : > { %v2450_v12 = vpack.c.bf16 %v2443_v36, %v2442_v7 }
 0x43c   : > { %v2398_v40 = vpop.f32.mrf.mxu1 }
 0x43d   : > { %6039 = vmatmul.msk.bf16.vlgmr.msra.gmra.mxu3 %vm903_vm0, %v2450_v12  ;;  %v2371_v43 = vpop.f32.mrf.mxu0  ;;  %v2399_v27 = vadd.f32 %v2398_v40, %v2369_v21 }
 0x43f   : > { %v2428_v13 = vadd.f32 %v2427_v56, %v2399_v27 }
 0x441   : > { %v2444_v32 = vmax.f32 %v2428_v13, 0.0 }
 0x444   : > { %v2400_v17 = vpop.f32.mrf.mxu1 }
 0x445   : > { %v2401_v24 = vadd.f32 %v2400_v17, %v2371_v43  ;;  %v2374_v49 = vpop.f32.mrf.mxu0 }
 0x447   : > { %v2430_v34 = vadd.f32 %v2429_v52, %v2401_v24 }
 0x449   : > { %v2445_v31 = vmax.f32 %v2430_v34, 0.0 }
 0x44b   : > { %v2451_v42 = vpack.c.bf16 %v2445_v31, %v2444_v32 }
 0x44c   : > { %v2403_v25 = vpop.f32.mrf.mxu1 }
 0x44d   : > { %6040 = vmatmul.msk.bf16.gmra.mxu3 %vm903_vm0, %v2451_v42  ;;  %v2376_v28 = vpop.f32.mrf.mxu0  ;;  %v2404_v19 = vadd.f32 %v2403_v25, %v2374_v49 }
 0x44f   : > { %v2433_v60 = vadd.f32 %v2432_v59, %v2404_v19 }
 0x451   : > { %v2446_v62 = vmax.f32 %v2433_v60, 0.0 }
 0x454   : > { %v2405_v18 = vpop.f32.mrf.mxu1 }
 0x455   : > { %v2406_v35 = vadd.f32 %v2405_v18, %v2376_v28  ;;  %v2379_v61 = vpop.f32.mrf.mxu0 }
 0x457   : > { %v2435_v14 = vadd.f32 %v2434_v58, %v2406_v35 }
 0x459   : > { %v2447_v5 = vmax.f32 %v2435_v14, 0.0 }
 0x45b   : > { %v2452_v48 = vpack.c.bf16 %v2447_v5, %v2446_v62 }
 0x45c   : > { %v2408_v57 = vpop.f32.mrf.mxu1 }
 0x45d   : > { %6041 = vmatmul.msk.bf16.gmra.mxu3 %vm903_vm0, %v2452_v48  ;;  %v2409_v2 = vadd.f32 %v2408_v57, %v2379_v61  ;;  %v2381_v63 = vpop.f32.mrf.mxu0 }
 0x45f   : > { %v2438_v11 = vadd.f32 %v2437_v15, %v2409_v2 }
 0x461   : > { %v2448_v37 = vmax.f32 %v2438_v11, 0.0 }
 0x464   : > { %v2410_v33 = vpop.f32.mrf.mxu1 }
 0x465   : > { %v2411_v30 = vadd.f32 %v2410_v33, %v2381_v63 }
 0x467   : > { %v2440_v41 = vadd.f32 %v2439_v44, %v2411_v30 }
 0x469   : > { %v2449_v39 = vmax.f32 %v2440_v41, 0.0 }
 0x46b   : > { %v2453_v47 = vpack.c.bf16 %v2449_v39, %v2448_v37 }
 0x46d   : > { %6042 = vmatmul.msk.bf16.gmra.mxu3 %vm903_vm0, %v2453_v47 }
 0x4c0   : > { %v2484_v54 = vpop.f32.mrf.mxu3 }
 0x4c1   : > { %v2504_v56 = vadd.f32 %v2484_v54, %v7735_v9 }
 0x4c3   : > { %v2512_v20 = vmax.f32 %v2504_v56, 0.0 }
 0x4c5   : > { %v2520_v55 = vpack.c.bf16 %v2512_v20, %v2512_v20 }
 0x4c7   : > { %v2529_v23 = vshrl.u32 %v2520_v55, 16  ;;  %v2532_v7 = vshll.u32 %v2520_v55, 16 }
 0x4c8   : > { %v2486_v21 = vpop.f32.mrf.mxu3 }
 0x4c9   : > { %v2531_v29 = vrot.slane %v2529_v23, 7  ;;  %v2505_v36 = vadd.f32 %v2486_v21, %v7745_v16 }
 0x4cb   : > { %v2534_v12 = vor.u32 %v2532_v7, %v2531_v29  ;;  %v2513_v40 = vmax.f32 %v2505_v36, 0.0 }
 0x4cd   : > { %v2592_v43 = vsel %vm7133_vm2, 0, %v2534_v12  ;;  %v2521_v52 = vpack.c.bf16 %v2513_v40, %v2513_v40 }
 0x4ce   : > { %v2600_v27 = vsel %vm7140_vm5, %v2592_v43, 0 }
 0x4cf   : > { %v8050_v17 = vunpack.c.l.b16 %v2600_v27  ;;  %v2616_v9 = vunpack.c.h.b16 %v2600_v27  ;;  %v2536_v13 = vshrl.u32 %v2521_v52, 16  ;;  %v2539_v24 = vshll.u32 %v2521_v52, 16 }
 0x4d0   : > { %v2489_v49 = vpop.f32.mrf.mxu3 }
 0x4d1   : > { %v2629_v34 = vpack.c.b16 %v8050_v17, %v8050_v17  ;;  %v2630_v59 = vpack.c.b16 %v2616_v9, %v2616_v9  ;;  %v2538_v16 = vrot.slane %v2536_v13, 7  ;;  %v2506_v32 = vadd.f32 %v2489_v49, %v7755_v10 }
 0x4d3   : > { %v2541_v31 = vor.u32 %v2539_v24, %v2538_v16  ;;  %v2514_v42 = vmax.f32 %v2506_v32, 0.0  ;;  %v6075_v25 = vrot.slane %v2629_v34, 9  ;;  %v2955_v28 = vrot.slane %v2630_v59, 5 }
 0x4d4   : > { %v2644_v19 = vshrl.u32 %v2629_v34, 16  ;;  %v2647_v58 = vshll.u32 %v2629_v34, 16  ;;  %v2653_v14 = vshll.u32 %v2630_v59, 16 }
 0x4d5   : > { %v2593_v18 = vsel %vm7133_vm2, 0, %v2541_v31  ;;  %v2522_v60 = vpack.c.bf16 %v2514_v42, %v2514_v42  ;;  %v2956_v35 = vsel %vm7170_vm8, %v6075_v25, %v2955_v28 }
 0x4d6   : > { %v2985_v62 = vunpack.c.l.b16 %v2956_v35  ;;  %v2601_v5 = vsel %vm7140_vm5, %v2593_v18, 0  ;;  %v2646_v61 = vrot.slane %v2644_v19, 4  ;;  %v2649_v10 = vrot.slane %v2647_v58, 5 }
 0x4d7   : > { %v2543_v48 = vshrl.u32 %v2522_v60, 16  ;;  %v8061_v15 = vunpack.c.l.b16 %v2601_v5  ;;  %v2618_v57 = vunpack.c.h.b16 %v2601_v5  ;;  %v2546_v2 = vshll.u32 %v2522_v60, 16 }
 0x4d8   : > { %v2491_v63 = vpop.f32.mrf.mxu3  ;;  %v2992_v33 = vpack.c.b16 %v2985_v62, %v7177_v38  ;;  %v2650_v11 = vor.u32 %v2649_v10, %v2646_v61  ;;  %v2655_v54 = vrot.slane %v2653_v14, 5 }
 0x4d9   : > { %v2545_v30 = vrot.slane %v2543_v48, 7  ;;  %v2507_v44 = vadd.f32 %v2491_v63, %v7770_v45  ;;  %v2632_v41 = vpack.c.b16 %v2618_v57, %v2618_v57  ;;  %v8067_v37 = vpack.c.b16 %v8061_v15, %v8050_v17 }
 0x4da   : > { %2996 = vrot.lane.b32.xlu2 %v2992_v33, %s7008_s21  ;;  %v2631_v39 = vpack.c.b16 %v8061_v15, %v8061_v15  ;;  %v2651_v47 = vrot.slane %v2650_v11, 4 }
 0x4db   : > { %v2548_v56 = vor.u32 %v2546_v2, %v2545_v30  ;;  %v2515_v20 = vmax.f32 %v2507_v44, 0.0  ;;  %2787 = vrot.lane.b32.xlu1 %v8067_v37, %s7012_s12  ;;  %v2959_v55 = vrot.slane %v2632_v41, 5  ;;  %v2667_v12 = vshll.u32 %v2632_v41, 16 }
 0x4dc   : > { %v2656_v45 = vsel %vm7237_vm11, %v2651_v47, %v2655_v54  ;;  %v6076_v23 = vrot.slane %v2631_v39, 9  ;;  %v2658_v21 = vshrl.u32 %v2631_v39, 16  ;;  %v2661_v29 = vshll.u32 %v2631_v39, 16 }
 0x4dd   : > { %v2594_v7 = vsel %vm7133_vm2, 0, %v2548_v56  ;;  %v2523_v36 = vpack.c.bf16 %v2515_v20, %v2515_v20  ;;  %v2764_v40 = vunpack.c.l.b16 %v2656_v45  ;;  %v2669_v28 = vrot.slane %v2667_v12, 5 }
 0x4de   : > { %v2602_v43 = vsel %vm7140_vm5, %v2594_v7, 0  ;;  %v8082_v52 = vsel %vm7170_vm8, %v6076_v23, %v2959_v55  ;;  %v2660_v27 = vrot.slane %v2658_v21, 4  ;;  %v2663_v9 = vrot.slane %v2661_v29, 5 }
 0x4df   : > { %v2620_v13 = vunpack.c.h.b16 %v2602_v43  ;;  %v2550_v24 = vshrl.u32 %v2523_v36, 16  ;;  %v8085_v34 = vpack.c.b16 %v2764_v40, %v7274_v46  ;;  %v2986_v59 = vunpack.c.l.b16 %v8082_v52 }
 0x4e0   : > { %v2494_v49 = vpop.f32.mrf.mxu3  ;;  %v2664_v16 = vor.u32 %v2663_v9, %v2660_v27  ;;  %v8088_v32 = vunpack.c.l.b16 %v2602_v43  ;;  %v2553_v42 = vshll.u32 %v2523_v36, 16 }
 0x4e1   : > { %v2552_v31 = vrot.slane %v2550_v24, 7  ;;  %v2508_v25 = vadd.f32 %v2494_v49, %v7792_v51  ;;  %v3013_v19 = vpack.c.b16 %v2986_v59, %v2985_v62  ;;  %v2634_v60 = vpack.c.b16 %v2620_v13, %v2620_v13 }
 0x4e2   : > { %2775 = vrot.lane.b32.xlu2 %v8085_v34, %s7008_s21  ;;  %v2665_v58 = vrot.slane %v2664_v16, 4  ;;  %v2633_v18 = vpack.c.b16 %v8088_v32, %v8088_v32  ;;  %v8114_v45 = vpack.c.b16 %v8088_v32, %v8061_v15 }
 0x4e3   : > { %v2555_v35 = vor.u32 %v2553_v42, %v2552_v31  ;;  %v2516_v14 = vmax.f32 %v2508_v25, 0.0  ;;  %3017 = vrot.lane.b32.xlu1 %v3013_v19, %s7013_s14  ;;  %v2963_v44 = vrot.slane %v2634_v60, 5  ;;  %v2681_v54 = vshll.u32 %v2634_v60, 16 }
 0x4e4   : > { %v2670_v5 = vsel %vm7237_vm11, %v2665_v58, %v2669_v28  ;;  %v2672_v51 = vshrl.u32 %v2633_v18, 16  ;;  %v2675_v61 = vshll.u32 %v2633_v18, 16  ;;  %v6077_v30 = vrot.slane %v2633_v18, 9 }
 0x4e5   : > { %v2595_v10 = vsel %vm7133_vm2, 0, %v2555_v35  ;;  %v2524_v48 = vpack.c.bf16 %v2516_v14, %v2516_v14  ;;  %v2765_v57 = vunpack.c.l.b16 %v2670_v5  ;;  %v2683_v43 = vrot.slane %v2681_v54, 5 }
 0x4e6   : > { %v2674_v62 = vrot.slane %v2672_v51, 4  ;;  %v2677_v2 = vrot.slane %v2675_v61, 5  ;;  %v2603_v63 = vsel %vm7140_vm5, %v2595_v10, 0  ;;  %v8120_v7 = vsel %vm7170_vm8, %v6077_v30, %v2963_v44 }
 0x4e7   : > { %v2557_v33 = vshrl.u32 %v2524_v48, 16  ;;  %v8104_v11 = vpack.c.b16 %v2765_v57, %v2764_v40  ;;  %v8106_v47 = vunpack.c.l.b16 %v2603_v63  ;;  %v2560_v20 = vshll.u32 %v2524_v48, 16 }
 0x4e8   : > { %v2496_v41 = vpop.f32.mrf.mxu3  ;;  %v2678_v39 = vor.u32 %v2677_v2, %v2674_v62  ;;  %v2622_v36 = vunpack.c.h.b16 %v2603_v63  ;;  %v2987_v13 = vunpack.c.l.b16 %v8120_v7 }
 0x4e9   : > { %v2559_v56 = vrot.slane %v2557_v33, 7  ;;  %3004 = vrot.lane.b32.xlu0 %v8104_v11, %s7012_s12  ;;  %v2509_v55 = vadd.f32 %v2496_v41, %v7821_v26  ;;  %v2635_v23 = vpack.c.b16 %v8106_v47, %v8106_v47 }
 0x4ea   : > { %3335 = vrot.lane.b32.xlu2 %v3013_v19, %s7008_s21  ;;  %v2679_v26 = vrot.slane %v2678_v39, 4  ;;  %v2636_v31 = vpack.c.b16 %v2622_v36, %v2622_v36  ;;  %v2993_v35 = vpack.c.b16 %v2987_v13, %v2986_v59 }
 0x4eb   : > { %v2562_v21 = vor.u32 %v2560_v20, %v2559_v56  ;;  %v2517_v29 = vmax.f32 %v2509_v55, 0.0  ;;  %3176 = vrot.lane.b32.xlu1 %v8114_v45, %s7012_s12  ;;  %v2686_v12 = vshrl.u32 %v2635_v23, 16  ;;  %v2689_v40 = vshll.u32 %v2635_v23, 16 }
 0x4ec   : > { %v2684_v28 = vsel %vm7237_vm11, %v2679_v26, %v2683_v43  ;;  %v2695_v51 = vshll.u32 %v2636_v31, 16  ;;  %v6078_v59 = vrot.slane %v2635_v23, 9  ;;  %v2967_v33 = vrot.slane %v2636_v31, 5 }
 0x4ed   : > { %v2596_v15 = vsel %vm7133_vm2, 0, %v2562_v21  ;;  %v2525_v27 = vpack.c.bf16 %v2517_v29, %v2517_v29  ;;  %v2688_v24 = vrot.slane %v2686_v12, 4  ;;  %v2691_v49 = vrot.slane %v2689_v40, 5 }
 0x4ee   : > { %v2604_v9 = vsel %vm7140_vm5, %v2596_v15, 0  ;;  %v2766_v61 = vunpack.c.l.b16 %v2684_v28  ;;  %v2697_v52 = vrot.slane %v2695_v51, 5  ;;  %v8158_v20 = vpack.c.b16 %v8106_v47, %v8088_v32 }
 0x4ef   : > { %v2564_v16 = vshrl.u32 %v2525_v27, 16  ;;  %v2567_v42 = vshll.u32 %v2525_v27, 16  ;;  %v2692_v18 = vor.u32 %v2691_v49, %v2688_v24  ;;  %v8134_v60 = vunpack.c.l.b16 %v2604_v9 }
 0x4f0   : > { %v2499_v25 = vpop.f32.mrf.mxu3  ;;  %v8147_v44 = vpack.c.b16 %v2766_v61, %v2765_v57  ;;  %v2624_v55 = vunpack.c.h.b16 %v2604_v9  ;;  %v2968_v21 = vsel %vm7170_vm8, %v6078_v59, %v2967_v33 }
 0x4f1   : > { %v2566_v19 = vrot.slane %v2564_v16, 7  ;;  %2800 = vrot.lane.b32.xlu0 %v8104_v11, %s7013_s14  ;;  %v2510_v58 = vadd.f32 %v2499_v25, %v7845_v8  ;;  %v2693_v8 = vrot.slane %v2692_v18, 4  ;;  %v2637_v62 = vpack.c.b16 %v8134_v60, %v8134_v60 }
 0x4f2   : > { %3167 = vrot.lane.b32.xlu2 %v8104_v11, %s7008_s21  ;;  %v2988_v40 = vunpack.c.l.b16 %v2968_v21  ;;  %v2638_v32 = vpack.c.b16 %v2624_v55, %v2624_v55 }
 0x4f3   : > { %v2569_v14 = vor.u32 %v2567_v42, %v2566_v19  ;;  %v2518_v5 = vmax.f32 %v2510_v58, 0.0  ;;  %3352 = vrot.lane.b32.xlu1 %v2993_v35, %s7013_s14  ;;  %v2698_v39 = vsel %vm7237_vm11, %v2693_v8, %v2697_v52  ;;  %v2700_v54 = vshrl.u32 %v2637_v62, 16 }
 0x4f4   : > { %v2703_v56 = vshll.u32 %v2637_v62, 16  ;;  %v2767_v29 = vunpack.c.l.b16 %v2698_v39  ;;  %v3014_v49 = vpack.c.b16 %v2988_v40, %v2987_v13  ;;  %v2709_v16 = vshll.u32 %v2638_v32, 16 }
 0x4f5   : > { %v2597_v10 = vsel %vm7133_vm2, 0, %v2569_v14  ;;  %v2526_v48 = vpack.c.bf16 %v2518_v5, %v2518_v5  ;;  %v2702_v26 = vrot.slane %v2700_v54, 4  ;;  %v8188_v8 = vpack.c.b16 %v8134_v60, %v8106_v47 }
 0x4f6   : > { %v2605_v2 = vsel %vm7140_vm5, %v2597_v10, 0  ;;  %v2705_v12 = vrot.slane %v2703_v56, 5  ;;  %v8167_v27 = vpack.c.b16 %v2767_v29, %v2766_v61  ;;  %v2711_v14 = vrot.slane %v2709_v16, 5 }
 0x4f7   : > { %v2571_v63 = vshrl.u32 %v2526_v48, 16  ;;  %v8149_v41 = vunpack.c.l.b16 %v2605_v2  ;;  %v2574_v36 = vshll.u32 %v2526_v48, 16  ;;  %v2626_v31 = vunpack.c.h.b16 %v2605_v2 }
 0x4f8   : > { %v2501_v30 = vpop.f32.mrf.mxu3  ;;  %v2971_v61 = vrot.slane %v2638_v32, 5 }
 0x4f9   : > { %2998 = vrot.lane.b32.xlu0 %v2993_v35, %s7008_s21  ;;  %v2573_v23 = vrot.slane %v2571_v63, 7  ;;  %v2511_v57 = vadd.f32 %v2501_v30, %v7875_v50  ;;  %v2639_v7 = vpack.c.b16 %v8149_v41, %v8149_v41  ;;  %v2706_v50 = vor.u32 %v2705_v12, %v2702_v26 }
 0x4fa   : > { %2777 = vrot.lane.b32.xlu2 %v8147_v44, %s7008_s21  ;;  %v6079_v35 = vrot.slane %v2637_v62, 9  ;;  %v2640_v5 = vpack.c.b16 %v2626_v31, %v2626_v31 }
 0x4fb   : > { %2789 = vrot.lane.b32.xlu1 %v8158_v20, %s7012_s12  ;;  %v2576_v43 = vor.u32 %v2574_v36, %v2573_v23  ;;  %v2519_v15 = vmax.f32 %v2511_v57, 0.0  ;;  %v2714_v9 = vshrl.u32 %v2639_v7, 16  ;;  %v2717_v24 = vshll.u32 %v2639_v7, 16 }
 0x4fc   : > { %v2707_v28 = vrot.slane %v2706_v50, 4  ;;  %v2723_v62 = vshll.u32 %v2640_v5, 16  ;;  %v2972_v63 = vsel %vm7170_vm8, %v6079_v35, %v2971_v61  ;;  %v6080_v55 = vrot.slane %v2639_v7, 9 }
 0x4fd   : > { %v2598_v42 = vsel %vm7133_vm2, 0, %v2576_v43  ;;  %v2527_v25 = vpack.c.bf16 %v2519_v15, %v2519_v15  ;;  %v2716_v19 = vrot.slane %v2714_v9, 4  ;;  %v2719_v58 = vrot.slane %v2717_v24, 5 }
 0x4fe   : > { %v2606_v18 = vsel %vm7140_vm5, %v2598_v42, 0  ;;  %v2712_v13 = vsel %vm7237_vm11, %v2707_v28, %v2711_v14  ;;  %v2989_v39 = vunpack.c.l.b16 %v2972_v63  ;;  %v2725_v54 = vrot.slane %v2723_v62, 5  ;;  %v6662_v28 = vld [vmem:[%s9681_s5 + $0x78] sm:$0xff] }
 0x4ff   : > { %v2578_v51 = vshrl.u32 %v2527_v25, 16  ;;  %v2720_v10 = vor.u32 %v2719_v58, %v2716_v19  ;;  %v8182_v48 = vunpack.c.l.b16 %v2606_v18  ;;  %v2768_v52 = vunpack.c.l.b16 %v2712_v13  ;;  %3122 = vmatpush.bf16.msra.mxu1 %v6662_v28  ;;  %v6648_v28 = vld [vmem:[%s9681_s5 + $0x8] sm:$0xff] }
 0x500   : > { %v2581_v59 = vshll.u32 %v2527_v25, 16  ;;  %v2975_v47 = vrot.slane %v2640_v5, 5  ;;  %v2994_v26 = vpack.c.b16 %v2989_v39, %v2988_v40  ;;  %v2628_v12 = vunpack.c.h.b16 %v2606_v18 }
 0x501   : > { %3343 = vrot.lane.b32.xlu0 %v8147_v44, %s7012_s12  ;;  %v2580_v2 = vrot.slane %v2578_v51, 7  ;;  %v2721_v33 = vrot.slane %v2720_v10, 4  ;;  %v2641_v30 = vpack.c.b16 %v8182_v48, %v8182_v48  ;;  %v8196_v23 = vpack.c.b16 %v2768_v52, %v2767_v29  ;;  %v6661_v51 = vld [vmem:[%s9681_s5 + $0x70] sm:$0xff] }
 0x502   : > { %3006 = vrot.lane.b32.xlu2 %v8167_v27, %s7012_s12  ;;  %v2976_v7 = vsel %vm7170_vm8, %v6080_v55, %v2975_v47  ;;  %v2642_v24 = vpack.c.b16 %v2628_v12, %v2628_v12  ;;  %v8234_v61 = vpack.c.b16 %v8182_v48, %v8149_v41  ;;  %v6659_v55 = vld [vmem:[%s9681_s5 + $0x60] sm:$0xff] }
 0x503   : > { %3019 = vrot.lane.b32.xlu1 %v3014_v49, %s7013_s14  ;;  %v2583_v56 = vor.u32 %v2581_v59, %v2580_v2  ;;  %v2726_v57 = vsel %vm7237_vm11, %v2721_v33, %v2725_v54  ;;  %v2728_v21 = vshrl.u32 %v2641_v30, 16  ;;  %v2731_v36 = vshll.u32 %v2641_v30, 16  ;;  %3123 = vmatpush.bf16.msra.mxu1 %v6661_v51  ;;  %v6660_v59 = vld [vmem:[%s9681_s5 + $0x68] sm:$0xff] }
 0x504   : > { %v2769_v29 = vunpack.c.l.b16 %v2726_v57  ;;  %v2990_v9 = vunpack.c.l.b16 %v2976_v7  ;;  %v2737_v42 = vshll.u32 %v2642_v24, 16  ;;  %v6081_v58 = vrot.slane %v2641_v30, 9 }
 0x505   : > { %v2599_v32 = vsel %vm7133_vm2, 0, %v2583_v56  ;;  %v2730_v43 = vrot.slane %v2728_v21, 4  ;;  %v2733_v15 = vrot.slane %v2731_v36, 5  ;;  %v2979_v18 = vrot.slane %v2642_v24, 5  ;;  %v6653_v56 = vld [vmem:[%s9681_s5 + $0x30] sm:$0xff]  ;;  %v6652_v36 = vld [vmem:[%s9681_s5 + $0x28] sm:$0xff] }
 0x506   : > { %v2607_v50 = vsel %vm7140_vm5, %v2599_v32, 0  ;;  %v3015_v31 = vpack.c.b16 %v2990_v9, %v2989_v39  ;;  %v2739_v19 = vrot.slane %v2737_v42, 5  ;;  %v6649_v42 = vld [vmem:[%s9681_s5 + $0x10] sm:$0xff]  ;;  %vm4879_vm5 = vcmask 1046528  }
 0x507   : > { %v8212_v40 = vunpack.c.l.b16 %v2607_v50  ;;  %v2734_v16 = vor.u32 %v2733_v15, %v2730_v43  ;;  %v2743_v13 = vunpack.c.h.b16 %v2607_v50  ;;  %v8238_v10 = vsel %vm7170_vm8, %v6081_v58, %v2979_v18  ;;  %3124 = vmatpush.bf16.msra.mxu1 %v6660_v59  ;;  %v6651_v43 = vld [vmem:[%s9681_s5 + $0x20] sm:$0xff]  ;;  %v6657_v15 = vld [vmem:[%s9681_s5 + $0x50] sm:$0xff] }
 0x508   : > { %v2991_v33 = vunpack.c.l.b16 %v8238_v10  ;;  %v8286_v50 = vpack.c.b16 %v8149_v41, %v8134_v60  ;;  %v6656_v60 = vld [vmem:[%s9681_s5 + $0x48] sm:$0xff]  ;;  %v6667_v10 = vld [vmem:[%s9681_s5 + $0xa0] sm:$0xff] }
 0x509   : > { %3185 = vrot.lane.b32.xlu0 %v8147_v44, %s7013_s14  ;;  %v2744_v1 = vpack.c.b16 %v8212_v40, %v8212_v40  ;;  %v2735_v25 = vrot.slane %v2734_v16, 4  ;;  %v2745_v30 = vpack.c.b16 %v2743_v13, %v2743_v13  ;;  %v6650_v16 = vld [vmem:[%s9681_s5 + $0x18] sm:$0xff]  ;;  %v6668_v13 = vld [vmem:[%s9681_s5 + $0xa8] sm:$0xff] }
 0x50a   : > { %3169 = vrot.lane.b32.xlu2 %v8167_v27, %s7008_s21  ;;  %v2995_v47 = vpack.c.b16 %v2991_v33, %v2990_v9 }
 0x50b   : > { %3178 = vrot.lane.b32.xlu1 %v8188_v8, %s7012_s12  ;;  %v2740_v35 = vsel %vm7237_vm11, %v2735_v25, %v2739_v19  ;;  %v2747_v14 = vshrl.u32 %v2744_v1, 16  ;;  %v2750_v5 = vshll.u32 %v2744_v1, 16  ;;  %v2756_v57 = vshll.u32 %v2745_v30, 16  ;;  %3125 = vmatpush.bf16.msra.mxu1 %v6659_v55  ;;  %v6677_v25 = vld [vmem:[%s9681_s5 + $0xf0] sm:$0xff]  ;;  %v6670_v19 = vld [vmem:[%s9681_s5 + $0xb8] sm:$0xff]  ;;  %v6664_v55 = vld [vmem:[%s9681_s5 + $0x88] sm:$0xff] }
 0x50c   : > { %v8242_v62 = vunpack.c.l.b16 %v2740_v35  ;;  %v6082_v32 = vrot.slane %v2744_v1, 9  ;;  %v2983_v7 = vrot.slane %v2745_v30, 5  ;;  %v6655_v1 = vld [vmem:[%s9681_s5 + $0x40] sm:$0xff]  ;;  %3458 = vmatpush.bf16.msrb.mxu3 %v6677_v25  ;;  %3290 = vmatpush.bf16.msra.mxu2 %v6670_v19  ;;  %v6665_v30 = vld [vmem:[%s9681_s5 + $0x90] sm:$0xff] }
 0x50d   : > { %v2749_v2 = vrot.slane %v2747_v14, 4  ;;  %v2752_v63 = vrot.slane %v2750_v5, 5  ;;  %v2758_v12 = vrot.slane %v2756_v57, 5  ;;  %v6647_v35 = vld [vmem:[%s9681_s5] sm:$0xff]  ;;  %v6669_v14 = vld [vmem:[%s9681_s5 + $0xb0] sm:$0xff]  ;;  %v3175_v57 = vpack.c.b16 %v7160_v6, %v8212_v40 }
 0x50e   : > { %v8252_v39 = vpack.c.b16 %v8242_v62, %v2769_v29  ;;  %v2984_v9 = vsel %vm7170_vm8, %v6082_v32, %v2983_v7  ;;  %v6675_v5 = vld [vmem:[%s9681_s5 + $0xe0] sm:$0xff]  ;;  %vm4258_vm8 = vsmask.f32 7424 }
 0x50f   : > { %v2753_v54 = vor.u32 %v2752_v63, %v2749_v2  ;;  %v6673_v63 = vld [vmem:[%s9681_s5 + $0xd0] sm:$0xff] }
 0x510   : > { %3291 = vmatpush.bf16.msra.mxu2 %v6669_v14 }
 0x511   : > { %3337 = vrot.lane.b32.xlu0 %v3014_v49, %s7008_s21  ;;  %v8210_v49 = vpack.c.b16 %v2769_v29, %v2768_v52  ;;  %v6654_v52 = vld [vmem:[%s9681_s5 + $0x38] sm:$0xff]  ;;  %v2754_v21 = vrot.slane %v2753_v54, 4 }
 0x512   : > { %3345 = vrot.lane.b32.xlu2 %v8196_v23, %s7012_s12  ;;  %2908 = vmatpush.bf16.msra.mxu0 %v6654_v52  ;;  %v6666_v52 = vld [vmem:[%s9681_s5 + $0x98] sm:$0xff] }
 0x513   : > { %3354 = vrot.lane.b32.xlu1 %v2994_v26, %s7013_s14  ;;  %v2759_v29 = vsel %vm7237_vm11, %v2754_v21, %v2758_v12  ;;  %v6663_v21 = vld [vmem:[%s9681_s5 + $0x80] sm:$0xff]  ;;  %vm4639_vm11 = vcmask 392192  }
 0x514   : > { %v2795_v24 = vunpack.c.l.b16 %v2759_v29  ;;  %3292 = vmatpush.bf16.msra.mxu2 %v6668_v13 }
 0x516   : > { %2909 = vmatpush.bf16.msra.mxu0 %v6653_v56  ;;  %v3184_v41 = vpack.c.b16 %v7274_v46, %v2795_v24  ;;  %v8327_v18 = vpack.c.b16 %v2795_v24, %v8242_v62  ;;  %v6674_v62 = vld [vmem:[%s9681_s5 + $0xd8] sm:$0xff]  ;;  %v6671_v56 = vld [vmem:[%s9681_s5 + $0xc0] sm:$0xff] }
 0x518   : > { %3293 = vmatpush.bf16.msra.mxu2 %v6667_v10 }
 0x519   : > { %2802 = vrot.lane.b32.xlu0 %v8167_v27, %s7013_s14 }
 0x51a   : > { %3008 = vrot.lane.b32.xlu2 %v8210_v49, %s7012_s12  ;;  %2910 = vmatpush.bf16.msra.mxu0 %v6652_v36 }
 0x51b   : > { %3021 = vrot.lane.b32.xlu1 %v3015_v31, %s7013_s14 }
 0x51c   : > { %3294 = vmatpush.bf16.msra.mxu2 %v6666_v52 }
 0x51e   : > { %2911 = vmatpush.bf16.msra.mxu0 %v6651_v43  ;;  %v8395_v43 = vpack.c.b16 %v8212_v40, %v8182_v48 }
 0x520   : > { %3295 = vmatpush.bf16.msra.mxu2 %v6665_v30 }
 0x521   : > { %3000 = vrot.lane.b32.xlu0 %v2994_v26, %s7008_s21  ;;  %v6658_v26 = vld [vmem:[%s9681_s5 + $0x58] sm:$0xff] }
 0x522   : > { %3171 = vrot.lane.b32.xlu2 %v8210_v49, %s7008_s21  ;;  %3126 = vmatpush.bf16.msra.mxu1 %v6658_v26 }
 0x523   : > { %3180 = vrot.lane.b32.xlu1 %v8234_v61, %s7012_s12  ;;  %2912 = vmatpush.bf16.msra.mxu0 %v6650_v16 }
 0x524   : > { %3296 = vmatpush.bf16.msra.mxu2 %v6664_v55 }
 0x526   : > { %3127 = vmatpush.bf16.msra.mxu1 %v6657_v15  ;;  %v2760_v15 = vpack.c.b16 %v8050_v17, %v7160_v6 }
 0x527   : > { %2913 = vmatpush.bf16.msra.mxu0 %v6649_v42 }
 0x528   : > { %3297 = vmatpush.bf16.msra.mxu2 %v6663_v21 }
 0x529   : > { %3187 = vrot.lane.b32.xlu0 %v8196_v23, %s7013_s14 }
 0x52a   : > { %3347 = vrot.lane.b32.xlu2 %v8252_v39, %s7012_s12  ;;  %3128 = vmatpush.bf16.msra.mxu1 %v6656_v60 }
 0x52b   : > { %3356 = vrot.lane.b32.xlu1 %v2995_v47, %s7013_s14  ;;  %2914 = vmatpush.bf16.msra.mxu0 %v6648_v28 }
 0x52e   : > { %3129 = vmatpush.bf16.msra.mxu1 %v6655_v1 }
 0x52f   : > { %2915 = vmatpush.bf16.msra.mxu0 %v6647_v35 }
 0x531   : > { %3339 = vrot.lane.b32.xlu0 %v3015_v31, %s7008_s21  ;;  %v3012_v31 = vunpack.c.l.b16 %v2984_v9 }
 0x532   : > { %2779 = vrot.lane.b32.xlu2 %v8196_v23, %s7008_s21 }
 0x533   : > { %2791 = vrot.lane.b32.xlu1 %v8286_v50, %s7012_s12  ;;  %v3351_v46 = vpack.c.b16 %v7177_v38, %v3012_v31  ;;  %v6676_v38 = vld [vmem:[%s9681_s5 + $0xe8] sm:$0xff]  ;;  %v3016_v51 = vpack.c.b16 %v3012_v31, %v2991_v33 }
 0x534   : > { %v8292_v53 = vpop.permute.xlu2 %2996  ;;  %3459 = vmatpush.bf16.msrb.mxu3 %v6676_v38  ;;  %v6672_v33 = vld [vmem:[%s9681_s5 + $0xc8] sm:$0xff] }
 0x535   : > { %v3027_v36 = vsel %vm939_vm4, %v8085_v34, %v8292_v53 }
 0x538   : > { %3460 = vmatpush.bf16.msrb.mxu3 %v6675_v5 }
 0x539   : > { %3002 = vrot.lane.b32.xlu0 %v2995_v47, %s7008_s21 }
 0x53a   : > { %3349 = vrot.lane.b32.xlu2 %v3184_v41, %s7012_s12 }
 0x53b   : > { %3358 = vrot.lane.b32.xlu1 %v3351_v46, %s7013_s14 }
 0x53c   : > { %v2776_v58 = vpop.permute.xlu2 %2775  ;;  %3461 = vmatpush.bf16.msrb.mxu3 %v6674_v62 }
 0x53d   : > { %v2810_v34 = vsel %vm939_vm4, %v2760_v15, %v2776_v58 }
 0x540   : > { %3462 = vmatpush.bf16.msrb.mxu3 %v6673_v63 }
 0x541   : > { %3189 = vrot.lane.b32.xlu0 %v8252_v39, %s7013_s14 }
 0x542   : > { %3010 = vrot.lane.b32.xlu2 %v8327_v18, %s7012_s12 }
 0x543   : > { %3023 = vrot.lane.b32.xlu1 %v3016_v51, %s7013_s14 }
 0x544   : > { %v3336_v2 = vpop.permute.xlu2 %3335  ;;  %3463 = vmatpush.bf16.msrb.mxu3 %v6672_v33 }
 0x545   : > { %v3362_v40 = vsel %vm939_vm4, %v8104_v11, %v3336_v2 }
 0x548   : > { %3464 = vmatpush.bf16.msrb.mxu3 %v6671_v56 }
 0x549   : > { %3341 = vrot.lane.b32.xlu0 %v3016_v51, %s7008_s21 }
 0x54a   : > { %3173 = vrot.lane.b32.xlu2 %v8327_v18, %s7008_s21 }
 0x54b   : > { %3191 = vrot.lane.b32.xlu1 %v3184_v41, %s7013_s14 }
 0x54c   : > { %v3168_v54 = vpop.permute.xlu2 %3167 }
 0x54d   : > { %v2788_v59 = vpop.permute.xlu1 %2787  ;;  %v3195_v19 = vsel %vm939_vm4, %v8067_v37, %v3168_v54 }
 0x54e   : > { %v2821_v9 = vsel %vm1397_vm9, %v2810_v34, %v2788_v59 }
 0x551   : > { %2804 = vrot.lane.b32.xlu0 %v8210_v49, %s7013_s14 }
 0x552   : > { %2781 = vrot.lane.b32.xlu2 %v8252_v39, %s7008_s21 }
 0x553   : > { %2806 = vrot.lane.b32.xlu1 %v8327_v18, %s7013_s14 }
 0x554   : > { %v2778_v26 = vpop.permute.xlu2 %2777 }
 0x555   : > { %v3018_v47 = vpop.permute.xlu1 %3017  ;;  %v2813_v37 = vsel %vm939_vm4, %v8114_v45, %v2778_v26 }
 0x559   : > { %3182 = vrot.lane.b32.xlu0 %v3175_v57, %s7012_s12 }
 0x55b   : > { %v3005_v12 = vpop.permute.xlu0 %3004 }
 0x55c   : > { %v3038_v32 = vsel %vm1397_vm9, %v3027_v36, %v3005_v12  ;;  %v3007_v16 = vpop.permute.xlu2 %3006 }
 0x55d   : > { %v3046_v7 = vsel %vm1406_vm10, %v3038_v32, %v3018_v47  ;;  %v3177_v29 = vpop.permute.xlu1 %3176 }
 0x55e   : > { %3130 = vmatmul.bf16.vlgmr.msra.gmra.mxu1 %v3046_v7  ;;  %v3206_v11 = vsel %vm1397_vm9, %v3195_v19, %v3177_v29 }
 0x561   : > { %2793 = vrot.lane.b32.xlu0 %v8395_v43, %s7012_s12 }
 0x563   : > { %v2801_v53 = vpop.permute.xlu0 %2800 }
 0x564   : > { %v2829_v24 = vsel %vm1406_vm10, %v2821_v9, %v2801_v53  ;;  %v3170_v48 = vpop.permute.xlu2 %3169 }
 0x565   : > { %2916 = vmatmul.bf16.vlgmr.msra.gmra.mxu0 %v2829_v24  ;;  %v3353_v31 = vpop.permute.xlu1 %3352  ;;  %v3198_v45 = vsel %vm939_vm4, %v8158_v20, %v3170_v48 }
 0x56b   : > { %v2999_v60 = vpop.permute.xlu0 %2998 }
 0x56c   : > { %v3030_v6 = vsel %vm939_vm4, %v8147_v44, %v2999_v60  ;;  %v3346_v28 = vpop.permute.xlu2 %3345 }
 0x56d   : > { %v2790_v22 = vpop.permute.xlu1 %2789  ;;  %v3040_v25 = vsel %vm1397_vm9, %v3030_v6, %v3007_v16 }
 0x56e   : > { %v2823_v2 = vsel %vm1397_vm9, %v2813_v37, %v2790_v22 }
 0x573   : > { %v3344_v17 = vpop.permute.xlu0 %3343 }
 0x574   : > { %v3373_v41 = vsel %vm1397_vm9, %v3362_v40, %v3344_v17  ;;  %v3009_v35 = vpop.permute.xlu2 %3008 }
 0x575   : > { %v3381_v42 = vsel %vm1406_vm10, %v3373_v41, %v3353_v31  ;;  %v3020_v1 = vpop.permute.xlu1 %3019 }
 0x576   : > { %3465 = vmatmul.bf16.vlgmr.msrb.gmra.mxu3 %v3381_v42  ;;  %v3049_v46 = vsel %vm1406_vm10, %v3040_v25, %v3020_v1 }
 0x577   : > { %3135 = vmatmul.bf16.gmra.mxu1 %v3049_v46 }
 0x57b   : > { %v3186_v58 = vpop.permute.xlu0 %3185 }
 0x57c   : > { %v3214_v44 = vsel %vm1406_vm10, %v3206_v11, %v3186_v58  ;;  %v3172_v52 = vpop.permute.xlu2 %3171 }
 0x57d   : > { %3298 = vmatmul.bf16.vlgmr.msra.gmra.mxu2 %v3214_v44  ;;  %v3179_v38 = vpop.permute.xlu1 %3178  ;;  %v3201_v9 = vsel %vm939_vm4, %v8286_v50, %v3172_v52 }
 0x57e   : > { %v3208_v47 = vsel %vm1397_vm9, %v3198_v45, %v3179_v38  ;;  %v8478_v45 = vld [vmem:[#allocation6] ss:$0 sm:$0xff] }
 0x583   : > { %v3338_v14 = vpop.permute.xlu0 %3337 }
 0x584   : > { %v3365_v5 = vsel %vm939_vm4, %v8167_v27, %v3338_v14  ;;  %v3348_v55 = vpop.permute.xlu2 %3347 }
 0x585   : > { %v3375_v51 = vsel %vm1397_vm9, %v3365_v5, %v3346_v28  ;;  %v3355_v13 = vpop.permute.xlu1 %3354 }
 0x586   : > { %v3384_v62 = vsel %vm1406_vm10, %v3375_v51, %v3355_v13 }
 0x587   : > { %3470 = vmatmul.bf16.gmra.mxu3 %v3384_v62 }
 0x58b   : > { %v2803_v10 = vpop.permute.xlu0 %2802 }
 0x58c   : > { %v2832_v63 = vsel %vm1406_vm10, %v2823_v2, %v2803_v10  ;;  %v2780_v26 = vpop.permute.xlu2 %2779 }
 0x58d   : > { %2921 = vmatmul.bf16.gmra.mxu0 %v2832_v63  ;;  %v3022_v59 = vpop.permute.xlu1 %3021 }
 0x593   : > { %v3001_v33 = vpop.permute.xlu0 %3000 }
 0x594   : > { %v3033_v27 = vsel %vm939_vm4, %v8196_v23, %v3001_v33  ;;  %v3350_v15 = vpop.permute.xlu2 %3349 }
 0x595   : > { %v3042_v30 = vsel %vm1397_vm9, %v3033_v27, %v3009_v35  ;;  %v3181_v54 = vpop.permute.xlu1 %3180 }
 0x596   : > { %v3052_v56 = vsel %vm1406_vm10, %v3042_v30, %v3022_v59  ;;  %v3210_v53 = vsel %vm1397_vm9, %v3201_v9, %v3181_v54 }
 0x597   : > { %3140 = vmatmul.bf16.gmra.mxu1 %v3052_v56 }
 0x59b   : > { %v3188_v57 = vpop.permute.xlu0 %3187 }
 0x59c   : > { %v3217_v21 = vsel %vm1406_vm10, %v3208_v47, %v3188_v57  ;;  %v3011_v31 = vpop.permute.xlu2 %3010 }
 0x59d   : > { %3303 = vmatmul.bf16.gmra.mxu2 %v3217_v21  ;;  %v3357_v36 = vpop.permute.xlu1 %3356 }
 0x5a3   : > { %v3340_v12 = vpop.permute.xlu0 %3339 }
 0x5a4   : > { %v3368_v23 = vsel %vm939_vm4, %v8210_v49, %v3340_v12  ;;  %v3174_v25 = vpop.permute.xlu2 %3173 }
 0x5a5   : > { %v3377_v32 = vsel %vm1397_vm9, %v3368_v23, %v3348_v55  ;;  %v2792_v7 = vpop.permute.xlu1 %2791  ;;  %v3204_v28 = vsel %vm939_vm4, %v8395_v43, %v3174_v25 }
 0x5a6   : > { %v3387_v29 = vsel %vm1406_vm10, %v3377_v32, %v3357_v36 }
 0x5a7   : > { %3475 = vmatmul.bf16.gmra.mxu3 %v3387_v29 }
 0x5ab   : > { %v3003_v20 = vpop.permute.xlu0 %3002 }
 0x5ac   : > { %v3036_v24 = vsel %vm939_vm4, %v8252_v39, %v3003_v20  ;;  %v2816_v39 = vsel %vm939_vm4, %v8188_v8, %v2780_v26  ;;  %v2782_v58 = vpop.permute.xlu2 %2781 }
 0x5ad   : > { %v3359_v34 = vpop.permute.xlu1 %3358  ;;  %v3044_v22 = vsel %vm1397_vm9, %v3036_v24, %v3011_v31  ;;  %v2825_v41 = vsel %vm1397_vm9, %v2816_v39, %v2792_v7  ;;  %v2819_v8 = vsel %vm939_vm4, %v8234_v61, %v2782_v58 }
 0x5b3   : > { %v3190_v16 = vpop.permute.xlu0 %3189 }
 0x5b4   : > { %v3220_v49 = vsel %vm1406_vm10, %v3210_v53, %v3190_v16 }
 0x5b5   : > { %3308 = vmatmul.bf16.gmra.mxu2 %v3220_v49  ;;  %v3024_v60 = vpop.permute.xlu1 %3023 }
 0x5b6   : > { %v3055_v48 = vsel %vm1406_vm10, %v3044_v22, %v3024_v60 }
 0x5b7   : > { %3145 = vmatmul.bf16.gmra.mxu1 %v3055_v48 }
 0x5bb   : > { %v3342_v40 = vpop.permute.xlu0 %3341 }
 0x5bc   : > { %v3371_v50 = vsel %vm939_vm4, %v8327_v18, %v3342_v40 }
 0x5bd   : > { %v3379_v6 = vsel %vm1397_vm9, %v3371_v50, %v3350_v15  ;;  %v3192_v46 = vpop.permute.xlu1 %3191 }
 0x5be   : > { %v3390_v17 = vsel %vm1406_vm10, %v3379_v6, %v3359_v34 }
 0x5bf   : > { %3480 = vmatmul.bf16.gmra.mxu3 %v3390_v17 }
 0x5c3   : > { %v2805_v42 = vpop.permute.xlu0 %2804 }
 0x5c4   : > { %v2835_v1 = vsel %vm1406_vm10, %v2825_v41, %v2805_v42 }
 0x5c5   : > { %2926 = vmatmul.bf16.gmra.mxu0 %v2835_v1  ;;  %v2807_v38 = vpop.permute.xlu1 %2806 }
 0x5cb   : > { %v3183_v18 = vpop.permute.xlu0 %3182 }
 0x5cc   : > { %v3212_v19 = vsel %vm1397_vm9, %v3204_v28, %v3183_v18 }
 0x5cd   : > { %v3223_v11 = vsel %vm1406_vm10, %v3212_v19, %v3192_v46 }
 0x5ce   : > { %3313 = vmatmul.bf16.gmra.mxu2 %v3223_v11 }
 0x5d3   : > { %v2794_v44 = vpop.permute.xlu0 %2793 }
 0x5d4   : > { %v2827_v35 = vsel %vm1397_vm9, %v2819_v8, %v2794_v44 }
 0x5d5   : > { %v2838_v14 = vsel %vm1406_vm10, %v2827_v35, %v2807_v38 }
 0x5d6   : > { %2931 = vmatmul.bf16.gmra.mxu0 %v2838_v14 }
 0x5db   : > { %v3131_v5 = vpop.f32.mrf.mxu1 }
 0x5dc   : > { %v3132_v40 = vadd.f32 %v8478_v45, %v3131_v5 }
 0x5de   : > { %v3151_v18 = vmax.f32 %v3132_v40, 0.0 }
 0x5e2   : > { %v8466_v10 = vpop.f32.mrf.mxu0 }
 0x5e3   : > { %v3133_v51 = vpop.f32.mrf.mxu1 }
 0x5e4   : > { %v3134_v16 = vadd.f32 %v8478_v45, %v3133_v51 }
 0x5e6   : > { %v3152_v42 = vmax.f32 %v3134_v16, 0.0 }
 0x5e8   : > { %v3160_v38 = vpack.c.bf16 %v3152_v42, %v3152_v42 }
 0x5ea   : > { %v8472_v59 = vpop.f32.mrf.mxu0 }
 0x5f4   : > { %v3136_v13 = vpop.f32.mrf.mxu1 }
 0x5f5   : > { %v3137_v34 = vadd.f32 %v8478_v45, %v3136_v13 }
 0x5f7   : > { %v3153_v50 = vmax.f32 %v3137_v34, 0.0 }
 0x5f9   : > { %v8460_v43 = vpop.f32.mrf.mxu3  ;;  %v3161_v19 = vpack.c.bf16 %v3153_v50, %v3153_v50 }
 0x5fc   : > { %v3138_v37 = vpop.f32.mrf.mxu1 }
 0x5fd   : > { %v3139_v7 = vadd.f32 %v8478_v45, %v3138_v37 }
 0x5ff   : > { %v3154_v49 = vmax.f32 %v3139_v7, 0.0 }
 0x600   : > { %v8464_v2 = vpop.f32.mrf.mxu2 }
 0x601   : > { %v8462_v62 = vpop.f32.mrf.mxu3  ;;  %v3162_v1 = vpack.c.bf16 %v3154_v49, %v3154_v49 }
 0x603   : > { %v3537_v35 = vunpack.c.l.b16 %v3162_v1 }
 0x608   : > { %v8470_v52 = vpop.f32.mrf.mxu2 }
 0x60a   : > { %v8468_v61 = vpop.f32.mrf.mxu3  ;;  %v8476_v54 = vpop.f32.mrf.mxu0 }
 0x612   : > { %v3473_v33 = vpop.f32.mrf.mxu3  ;;  %v8483_v21 = vpop.f32.mrf.mxu0 }
 0x613   : > { %v3474_v13 = vadd.f32 %v8478_v45, %v3473_v33  ;;  %v3469_v33 = vadd.f32 %v8478_v45, %v8462_v62 }
 0x614   : > { %v3141_v63 = vpop.f32.mrf.mxu1 }
 0x615   : > { %v3142_v12 = vadd.f32 %v8478_v45, %v3141_v63  ;;  %v3489_v7 = vmax.f32 %v3474_v13, 0.0  ;;  %v3487_v49 = vmax.f32 %v3469_v33, 0.0 }
 0x617   : > { %v3155_v9 = vmax.f32 %v3142_v12, 0.0 }
 0x619   : > { %v3163_v6 = vpack.c.bf16 %v3155_v9, %v3155_v9 }
 0x61b   : > { %v3538_v11 = vunpack.c.l.b16 %v3163_v6 }
 0x61c   : > { %v3143_v27 = vpop.f32.mrf.mxu1 }
 0x61d   : > { %v3144_v36 = vadd.f32 %v8478_v45, %v3143_v27  ;;  %v3159_v27 = vpack.c.bf16 %v3151_v18, %v3151_v18 }
 0x61f   : > { %v3156_v29 = vmax.f32 %v3144_v36, 0.0  ;;  %v3534_v34 = vunpack.c.l.b16 %v3159_v27 }
 0x620   : > { %v8474_v30 = vpop.f32.mrf.mxu2 }
 0x621   : > { %v3164_v31 = vpack.c.bf16 %v3156_v29, %v3156_v29 }
 0x623   : > { %v3539_v25 = vunpack.c.l.b16 %v3164_v31 }
 0x625   : > { %v3544_v51 = vpack.c.b16 %v3539_v25, %v3538_v11  ;;  %v8517_v11 = vadd.f32 %v8478_v45, %v8472_v59 }
 0x628   : > { %v8480_v47 = vpop.f32.mrf.mxu2 }
 0x629   : > { %v3307_v59 = vadd.f32 %v8478_v45, %v8480_v47 }
 0x62a   : > { %v3476_v56 = vpop.f32.mrf.mxu3 }
 0x62b   : > { %v3477_v58 = vadd.f32 %v8478_v45, %v3476_v56  ;;  %v3472_v56 = vadd.f32 %v8478_v45, %v8468_v61 }
 0x62d   : > { %v3490_v36 = vmax.f32 %v3477_v58, 0.0 }
 0x632   : > { %v3478_v26 = vpop.f32.mrf.mxu3 }
 0x633   : > { %v3479_v28 = vadd.f32 %v8478_v45, %v3478_v26 }
 0x634   : > { %v3146_v55 = vpop.f32.mrf.mxu1 }
 0x635   : > { %v3147_v57 = vadd.f32 %v8478_v45, %v3146_v55  ;;  %v3491_v37 = vmax.f32 %v3479_v28, 0.0  ;;  %v3536_v55 = vunpack.c.l.b16 %v3161_v19  ;;  %v8512_v28 = vadd.f32 %v8478_v45, %v8466_v10 }
 0x637   : > { %v3157_v23 = vmax.f32 %v3147_v57, 0.0  ;;  %v3467_v57 = vadd.f32 %v8478_v45, %v8460_v43  ;;  %v3499_v29 = vpack.c.bf16 %v3491_v37, %v3491_v37  ;;  %v3488_v43 = vmax.f32 %v3472_v56, 0.0 }
 0x638   : > { %v8489_v20 = vpop.f32.mrf.mxu2  ;;  %v2923_v56 = vadd.f32 %v8478_v45, %v8476_v54  ;;  %v3300_v54 = vadd.f32 %v8478_v45, %v8464_v2 }
 0x639   : > { %v3165_v53 = vpack.c.bf16 %v3157_v23, %v3157_v23  ;;  %v3535_v23 = vunpack.c.l.b16 %v3160_v38  ;;  %v3486_v9 = vmax.f32 %v3467_v57, 0.0  ;;  %v3310_v38 = vadd.f32 %v8478_v45, %v8489_v20 }
 0x63b   : > { %v3540_v17 = vunpack.c.l.b16 %v3165_v53  ;;  %v3498_v53 = vpack.c.bf16 %v3490_v36, %v3490_v36  ;;  %v3542_v31 = vpack.c.b16 %v3535_v23, %v3534_v34  ;;  %v3494_v6 = vpack.c.bf16 %v3486_v9, %v3486_v9 }
 0x63c   : > { %v3148_v32 = vpop.f32.mrf.mxu1  ;;  %v3323_v36 = vmax.f32 %v3310_v38, 0.0 }
 0x63d   : > { %v3149_v15 = vadd.f32 %v8478_v45, %v3148_v32  ;;  %v3543_v32 = vpack.c.b16 %v3537_v35, %v3536_v55  ;;  %v3582_v58 = vunpack.c.l.b16 %v3494_v6 }
 0x63f   : > { %v3158_v24 = vmax.f32 %v3149_v15, 0.0 }
 0x640   : > { %v3311_v8 = vpop.f32.mrf.mxu2 }
 0x641   : > { %v3166_v60 = vpack.c.bf16 %v3158_v24, %v3158_v24  ;;  %v3312_v25 = vadd.f32 %v8478_v45, %v3311_v8 }
 0x642   : > { %v8493_v22 = vpop.f32.mrf.mxu0  ;;  %v3481_v48 = vpop.f32.mrf.mxu3 }
 0x643   : > { %v3541_v39 = vunpack.c.l.b16 %v3166_v60  ;;  %v3482_v41 = vadd.f32 %v8478_v45, %v3481_v48  ;;  %v3497_v60 = vpack.c.bf16 %v3489_v7, %v3489_v7  ;;  %v3587_v48 = vunpack.c.l.b16 %v3499_v29 }
 0x644   : > { %v2928_v10 = vadd.f32 %v8478_v45, %v8493_v22  ;;  %v3324_v13 = vmax.f32 %v3312_v25, 0.0  ;;  %v3302_v22 = vadd.f32 %v8478_v45, %v8470_v52 }
 0x645   : > { %v3545_v46 = vpack.c.b16 %v3541_v39, %v3540_v17  ;;  %v3492_v44 = vmax.f32 %v3482_v41, 0.0  ;;  %v3496_v17 = vpack.c.bf16 %v3488_v43, %v3488_v43  ;;  %v3586_v39 = vunpack.c.l.b16 %v3498_v53 }
 0x646   : > { %v3495_v41 = vpack.c.bf16 %v3487_v49, %v3487_v49  ;;  %v3585_v1 = vunpack.c.l.b16 %v3497_v60  ;;  %v2941_v47 = vmax.f32 %v2928_v10, 0.0  ;;  %v3332_v7 = vpack.c.bf16 %v3324_v13, %v3324_v13 }
 0x647   : > { %3790 = vmatpush.bf16.msrb.mxu0 %v3545_v46  ;;  %6727 = vmatpush.bf16.msra.mxu3 %v3545_v46  ;;  %v3500_v26 = vpack.c.bf16 %v3492_v44, %v3492_v44  ;;  %v3592_v46 = vpack.c.b16 %v3587_v48, %v3586_v39  ;;  %v3584_v44 = vunpack.c.l.b16 %v3496_v17  ;;  %v2939_v43 = vmax.f32 %v2923_v56, 0.0  ;;  %v6239_v56 = vld [vmem:[#allocation9 + $0x18] sm:$0xf0] }
 0x648   : > { %v3583_v8 = vunpack.c.l.b16 %v3495_v41  ;;  %v3331_v53 = vpack.c.bf16 %v3323_v36, %v3323_v36  ;;  %v3563_v48 = vunpack.c.l.b16 %v3332_v7  ;;  %v3319_v17 = vmax.f32 %v3300_v54, 0.0  ;;  %v6682_v36 = vld [vmem:[#allocation9 + $0x14] sm:$0xf0] }
 0x649   : > { %v3588_v24 = vunpack.c.l.b16 %v3500_v26  ;;  %v2947_v41 = vpack.c.bf16 %v2939_v43, %v2939_v43 }
 0x64a   : > { %v2929_v14 = vpop.f32.mrf.mxu0  ;;  %v3483_v5 = vpop.f32.mrf.mxu3  ;;  %v3590_v29 = vpack.c.b16 %v3583_v8, %v3582_v58  ;;  %v3562_v2 = vunpack.c.l.b16 %v3331_v53  ;;  %v3327_v58 = vpack.c.bf16 %v3319_v17, %v3319_v17  ;;  %v6263_v53 = vld [vmem:[#allocation9 + $0x48] sm:$0xf0] }
 0x64b   : > { %v3484_v63 = vadd.f32 %v8478_v45, %v3483_v5  ;;  %3791 = vmatpush.bf16.msrb.mxu0 %v3544_v51  ;;  %6728 = vmatpush.bf16.msra.mxu3 %v3544_v51  ;;  %v2930_v18 = vadd.f32 %v8478_v45, %v2929_v14  ;;  %v2925_v51 = vadd.f32 %v8478_v45, %v8483_v21  ;;  %v6279_v17 = vld [vmem:[#allocation9 + $0x68] sm:$0xf0] }
 0x64c   : > { %v3305_v21 = vadd.f32 %v8478_v45, %v8474_v30 }
 0x64d   : > { %v3493_v12 = vmax.f32 %v3484_v63, 0.0  ;;  %v3591_v63 = vpack.c.b16 %v3585_v1, %v3584_v44  ;;  %v2942_v20 = vmax.f32 %v2930_v18, 0.0  ;;  %v2940_v33 = vmax.f32 %v2925_v51, 0.0  ;;  %v6679_v51 = vld [vmem:[#allocation9 + $0x4] sm:$0xf] }
 0x64e   : > { %v3321_v30 = vmax.f32 %v3305_v21, 0.0  ;;  %v6237_v21 = vld [vmem:[#allocation9 + $0x10] sm:$0xf] }
 0x64f   : > { %v3501_v15 = vpack.c.bf16 %v3493_v12, %v3493_v12  ;;  %3792 = vmatpush.bf16.msrb.mxu0 %v3543_v32  ;;  %6729 = vmatpush.bf16.msra.mxu3 %v3543_v32  ;;  %v3322_v32 = vmax.f32 %v3307_v59, 0.0  ;;  %v6231_v59 = vld [vmem:[#allocation9 + $0x8] sm:$0xf0] }
 0x650   : > { %v3329_v39 = vpack.c.bf16 %v3321_v30, %v3321_v30  ;;  %v6687_v30 = vld [vmem:[#allocation9 + $0x44] sm:$0xf] }
 0x651   : > { %v3589_v16 = vunpack.c.l.b16 %v3501_v15  ;;  %v3314_v61 = vpop.f32.mrf.mxu2  ;;  %v2950_v15 = vpack.c.bf16 %v2942_v20, %v2942_v20  ;;  %v3330_v60 = vpack.c.bf16 %v3322_v32, %v3322_v32  ;;  %v6684_v32 = vld [vmem:[#allocation9 + $0x24] sm:$0xf0] }
 0x652   : > { %v3315_v62 = vadd.f32 %v8478_v45, %v3314_v61  ;;  %v3560_v44 = vunpack.c.l.b16 %v3329_v39  ;;  %v6277_v39 = vld [vmem:[#allocation9 + $0x60] sm:$0xf] }
 0x653   : > { %v3593_v40 = vpack.c.b16 %v3589_v16, %v3588_v24  ;;  %v2932_v50 = vpop.f32.mrf.mxu0  ;;  %3793 = vmatpush.bf16.msrb.mxu0 %v3542_v31  ;;  %6730 = vmatpush.bf16.msra.mxu3 %v3542_v31  ;;  %v2949_v24 = vpack.c.bf16 %v2941_v47, %v2941_v47  ;;  %v3320_v31 = vmax.f32 %v3302_v22, 0.0  ;;  %v3561_v25 = vunpack.c.l.b16 %v3330_v60  ;;  %v6681_v22 = vld [vmem:[#allocation9 + $0x14] sm:$0xf]  ;;  %v6271_v60 = vld [vmem:[#allocation9 + $0x58] sm:$0xf0] }
 0x654   : > { %v2933_v42 = vadd.f32 %v8478_v45, %v2932_v50  ;;  %v3325_v19 = vmax.f32 %v3315_v62, 0.0  ;;  %v2948_v50 = vpack.c.bf16 %v2940_v33, %v2940_v33  ;;  %v3515_v62 = vunpack.c.l.b16 %v2950_v15  ;;  %v6245_v33 = vld [vmem:[#allocation9 + $0x20] sm:$0xf]  ;;  %v6685_v15 = vld [vmem:[#allocation9 + $0x34] sm:$0xf] }
 0x655   : > { %3879 = vmatpush.bf16.msrb.mxu1 %v3593_v40  ;;  %6735 = vmatpush.bf16.msrb.mxu2 %v3593_v40  ;;  %v2938_v40 = vmax.f32 %v8517_v11, 0.0  ;;  %v3328_v1 = vpack.c.bf16 %v3320_v31, %v3320_v31  ;;  %v6242_v47 = vor.u32 %v6681_v22, %v6239_v56  ;;  %v6689_v31 = vld [vmem:[#allocation9 + $0x54] sm:$0xf]  ;;  %v6295_v22 = vld [vmem:[#allocation9 + $0x88] sm:$0xf0] }
 0x656   : > { %v2943_v5 = vmax.f32 %v2933_v42, 0.0  ;;  %v3333_v27 = vpack.c.bf16 %v3325_v19, %v3325_v19  ;;  %v3514_v42 = vunpack.c.l.b16 %v2949_v24  ;;  %v3513_v19 = vunpack.c.l.b16 %v2948_v50  ;;  %v6261_v24 = vld [vmem:[#allocation9 + $0x40] sm:$0xf] }
 0x657   : > { %v2946_v18 = vpack.c.bf16 %v2938_v40, %v2938_v40  ;;  %v3559_v8 = vunpack.c.l.b16 %v3328_v1  ;;  %v6690_v40 = vld [vmem:[#allocation9 + $0x54] sm:$0xf0]  ;;  %v6274_v50 = vor.u32 %v6689_v31, %v6271_v60  ;;  %v6303_v1 = vld [vmem:[#allocation9 + $0x98] sm:$0xf0]  ;;  %v6293_v56 = vld [vmem:[#allocation9 + $0x80] sm:$0xf] }
 0x658   : > { %v2951_v26 = vpack.c.bf16 %v2943_v5, %v2943_v5  ;;  %v3564_v34 = vunpack.c.l.b16 %v3333_v27  ;;  %v3520_v11 = vpack.c.b16 %v3515_v62, %v3514_v42  ;;  %v6697_v42 = vld [vmem:[#allocation9 + $0x94] sm:$0xf] }
 0x659   : > { %v3316_v35 = vpop.f32.mrf.mxu2  ;;  %3880 = vmatpush.bf16.msrb.mxu1 %v3592_v46  ;;  %6736 = vmatpush.bf16.msrb.mxu2 %v3592_v46  ;;  %v3568_v46 = vpack.c.b16 %v3563_v48, %v3562_v2  ;;  %v3511_v10 = vunpack.c.l.b16 %v2946_v18  ;;  %v6269_v48 = vld [vmem:[#allocation9 + $0x50] sm:$0xf]  ;;  %v6692_v2 = vld [vmem:[#allocation9 + $0x64] sm:$0xf0]  ;;  %v4880_v18 = vrot.slane %v7150_v4, 1 }
 0x65a   : > { %v3317_v14 = vadd.f32 %v8478_v45, %v3316_v35  ;;  %v3516_v16 = vunpack.c.l.b16 %v2951_v26  ;;  %v3512_v35 = vunpack.c.l.b16 %v2947_v41  ;;  %v6238_v26 = vor.u32 %v6682_v36, %v6237_v21  ;;  %v6696_v21 = vld [vmem:[#allocation9 + $0x84] sm:$0xf0] }
 0x65b   : > { %v2934_v37 = vpop.f32.mrf.mxu0  ;;  %v6270_v62 = vor.u32 %v6690_v40, %v6269_v48  ;;  %v6278_v41 = vor.u32 %v6692_v2, %v6277_v39  ;;  %v6325_v39 = vld [vmem:[#allocation9 + $0xc0] sm:$0xf]  ;;  %v6704_v2 = vld [vmem:[#allocation9 + $0xc4] sm:$0xf0] }
 0x65c   : > { %v3326_v55 = vmax.f32 %v3317_v14, 0.0  ;;  %v2935_v57 = vadd.f32 %v8478_v45, %v2934_v37  ;;  %v2937_v45 = vmax.f32 %v8512_v28, 0.0  ;;  %v3567_v28 = vpack.c.b16 %v3561_v25, %v3560_v44  ;;  %v6229_v37 = vld [vmem:[#allocation9] sm:$0xf]  ;;  %v6287_v44 = vld [vmem:[#allocation9 + $0x78] sm:$0xf0] }
 0x65d   : > { %3881 = vmatpush.bf16.msrb.mxu1 %v3591_v63  ;;  %6737 = vmatpush.bf16.msrb.mxu2 %v3591_v63  ;;  %v3519_v5 = vpack.c.b16 %v3513_v19, %v3512_v35  ;;  %v3558_v14 = vunpack.c.l.b16 %v3327_v58  ;;  %v6680_v63 = vld [vmem:[#allocation9 + $0x4] sm:$0xf0]  ;;  %v6306_v25 = vor.u32 %v6697_v42, %v6303_v1  ;;  %v6693_v58 = vld [vmem:[#allocation9 + $0x74] sm:$0xf]  ;;  %v6694_v35 = vld [vmem:[#allocation9 + $0x74] sm:$0xf0] }
 0x65e   : > { %v3334_v12 = vpack.c.bf16 %v3326_v55, %v3326_v55  ;;  %v2944_v23 = vmax.f32 %v2935_v57, 0.0  ;;  %v2945_v38 = vpack.c.bf16 %v2937_v45, %v2937_v45  ;;  %v6234_v55 = vor.u32 %v6679_v51, %v6231_v59  ;;  %v6311_v51 = vld [vmem:[#allocation9 + $0xa8] sm:$0xf0] }
 0x65f   : > { %v3566_v20 = vpack.c.b16 %v3559_v8, %v3558_v14  ;;  %v6230_v57 = vor.u32 %v6680_v63, %v6229_v37  ;;  %v6290_v8 = vor.u32 %v6693_v58, %v6287_v44  ;;  %v4260_v37 = vshrl.u32 %v7150_v4, 16  ;;  %v6327_v42 = vld [vmem:[#allocation9 + $0xc8] sm:$0xf0] }
 0x660   : > { %v3565_v52 = vunpack.c.l.b16 %v3334_v12  ;;  %v2952_v9 = vpack.c.bf16 %v2944_v23, %v2944_v23  ;;  %v3510_v13 = vunpack.c.l.b16 %v2945_v38  ;;  %v6683_v12 = vld [vmem:[#allocation9 + $0x24] sm:$0xf]  ;;  %v6247_v23 = vld [vmem:[#allocation9 + $0x28] sm:$0xf0]  ;;  %v6285_v38 = vld [vmem:[#allocation9 + $0x70] sm:$0xf] }
 0x661   : > { %3882 = vmatpush.bf16.msrb.mxu1 %v3590_v29  ;;  %6738 = vmatpush.bf16.msrb.mxu2 %v3590_v29  ;;  %v6250_v7 = vor.u32 %v6683_v12, %v6247_v23  ;;  %v6246_v29 = vor.u32 %v6684_v32, %v6245_v33  ;;  %v4262_v63 = vshll.u32 %v7150_v4, 16  ;;  %v6294_v12 = vor.u32 %v6696_v21, %v6293_v56  ;;  %v6317_v33 = vld [vmem:[#allocation9 + $0xb0] sm:$0xf]  ;;  %v6702_v32 = vld [vmem:[#allocation9 + $0xb4] sm:$0xf0] }
 0x662   : > { %v3517_v61 = vunpack.c.l.b16 %v2952_v9  ;;  %v3569_v49 = vpack.c.b16 %v3565_v52, %v3564_v34  ;;  %v3518_v27 = vpack.c.b16 %v3511_v10, %v3510_v13  ;;  %v6255_v34 = vld [vmem:[#allocation9 + $0x38] sm:$0xf0]  ;;  %v6253_v52 = vld [vmem:[#allocation9 + $0x30] sm:$0xf]  ;;  %v6686_v9 = vld [vmem:[#allocation9 + $0x34] sm:$0xf0] }
 0x663   : > { %v6258_v54 = vor.u32 %v6685_v15, %v6255_v34  ;;  %v6254_v43 = vor.u32 %v6686_v9, %v6253_v52  ;;  %v6309_v10 = vld [vmem:[#allocation9 + $0xa0] sm:$0xf]  ;;  %v6319_v15 = vld [vmem:[#allocation9 + $0xb8] sm:$0xf0] }
 0x664   : > { %v3521_v6 = vpack.c.b16 %v3517_v61, %v3516_v16  ;;  %v6688_v16 = vld [vmem:[#allocation9 + $0x44] sm:$0xf0]  ;;  %v6266_v61 = vor.u32 %v6687_v30, %v6263_v53 }
 0x665   : > { %3883 = vmatpush.bf16.msrb.mxu1 %v3569_v49  ;;  %6739 = vmatpush.bf16.msrb.mxu2 %v3569_v49  ;;  %v6262_v49 = vor.u32 %v6688_v16, %v6261_v24  ;;  %v6722_v52 = vld [vmem:[%s9683_s7 + $0x58] sm:$0xff]  ;;  %v6301_v16 = vld [vmem:[#allocation9 + $0x90] sm:$0xf] }
 0x666   : > { %3794 = vmatpush.bf16.msrb.mxu0 %v3521_v6  ;;  %6731 = vmatpush.bf16.msra.mxu3 %v3521_v6  ;;  %v6691_v6 = vld [vmem:[#allocation9 + $0x64] sm:$0xf] }
 0x667   : > { %v6282_v45 = vor.u32 %v6691_v6, %v6279_v17 }
 0x669   : > { %3884 = vmatpush.bf16.msrb.mxu1 %v3568_v46  ;;  %6740 = vmatpush.bf16.msrb.mxu2 %v3568_v46  ;;  %v4241_v46 = vsel %vm7133_vm2, %v7144_v3, 0  ;;  %v6700_v3 = vld [vmem:[#allocation9 + $0xa4] sm:$0xf0] }
 0x66a   : > { %3795 = vmatpush.bf16.msrb.mxu0 %v3520_v11  ;;  %6732 = vmatpush.bf16.msra.mxu3 %v3520_v11  ;;  %v4881_v19 = vrot.slane %v4241_v46, 1  ;;  %v6310_v14 = vor.u32 %v6700_v3, %v6309_v10  ;;  %v4267_v59 = vshll.u32 %v4241_v46, 16 }
 0x66c   : > { %v8544_v11 = vsel %vm4879_vm5, %v4880_v18, %v4881_v19  ;;  %v6726_v18 = vld [vmem:[%s9683_s7 + $0x78] sm:$0xff] }
 0x66d   : > { %3885 = vmatpush.bf16.msrb.mxu1 %v3567_v28  ;;  %6741 = vmatpush.bf16.msrb.mxu2 %v3567_v28  ;;  %v6286_v28 = vor.u32 %v6694_v35, %v6285_v38 }
 0x66e   : > { %3796 = vmatpush.bf16.msrb.mxu0 %v3519_v5  ;;  %6733 = vmatpush.bf16.msra.mxu3 %v3519_v5  ;;  %v6699_v5 = vld [vmem:[#allocation9 + $0xa4] sm:$0xf] }
 0x66f   : > { %4932 = vrot.lane.b32.xlu0 %v8544_v11, %s7009_s22  ;;  %v6314_v13 = vor.u32 %v6699_v5, %v6311_v51 }
 0x671   : > { %3886 = vmatpush.bf16.msrb.mxu1 %v3566_v20  ;;  %6742 = vmatpush.bf16.msrb.mxu2 %v3566_v20  ;;  %v4264_v20 = vrot.slane %v4262_v63, 1 }
 0x672   : > { %3797 = vmatpush.bf16.msrb.mxu0 %v3518_v27  ;;  %6734 = vmatpush.bf16.msra.mxu3 %v3518_v27  ;;  %v4269_v27 = vrot.slane %v4267_v59, 1 }
 0x674   : > { %3887 = vmatmul.bf16.vlgmr.msrb.gmra.mxu1 %v6234_v55  ;;  %3932 = vmatmul.bf16.vlgmr.msrb.gmra.mxu2 %v6306_v25  ;;  %v4265_v55 = vor.u32 %v4264_v20, %v4260_v37 }
 0x675   : > { %3798 = vmatmul.bf16.vlgmr.msrb.gmra.mxu0 %v6230_v57  ;;  %3848 = vmatmul.bf16.vlgmr.msra.gmra.mxu3 %v6310_v14  ;;  %v6695_v57 = vld [vmem:[#allocation9 + $0x84] sm:$0xf] }
 0x676   : > { %v8551_v36 = vsel %vm4258_vm8, %v4265_v55, %v4269_v27  ;;  %5386 = vmatpush.bf16.msra.mxu0 %v6722_v52  ;;  %5560 = vmatpush.bf16.msra.mxu1 %v6726_v18  ;;  %v6708_v18 = vld [vmem:[#allocation9 + $0xe4] sm:$0xf0] }
 0x677   : > { %4463 = vrot.lane.b32.xlu2 %v8551_v36, %s7009_s22 }
 0x684   : > { %3892 = vmatmul.bf16.gmra.mxu1 %v6242_v47  ;;  %3937 = vmatmul.bf16.gmra.mxu2 %v6314_v13  ;;  %v6298_v47 = vor.u32 %v6695_v57, %v6295_v22 }
 0x685   : > { %3803 = vmatmul.bf16.gmra.mxu0 %v6238_v26 }
 0x694   : > { %3897 = vmatmul.bf16.gmra.mxu1 %v6250_v7  ;;  %v6701_v7 = vld [vmem:[#allocation9 + $0xb4] sm:$0xf] }
 0x695   : > { %3808 = vmatmul.bf16.gmra.mxu0 %v6246_v29  ;;  %v6318_v29 = vor.u32 %v6702_v32, %v6317_v33  ;;  %v6322_v9 = vor.u32 %v6701_v7, %v6319_v15  ;;  %v6705_v32 = vld [vmem:[#allocation9 + $0xd4] sm:$0xf]  ;;  %v6335_v7 = vld [vmem:[#allocation9 + $0xd8] sm:$0xf0] }
 0x696   : > { %v6338_v52 = vor.u32 %v6705_v32, %v6335_v7 }
 0x697   : > { %3853 = vmatmul.bf16.gmra.mxu3 %v6318_v29  ;;  %3942 = vmatmul.bf16.gmra.mxu2 %v6322_v9 }
 0x6a4   : > { %3902 = vmatmul.bf16.gmra.mxu1 %v6258_v54 }
 0x6a5   : > { %3813 = vmatmul.bf16.gmra.mxu0 %v6254_v43 }
 0x6b4   : > { %3907 = vmatmul.bf16.gmra.mxu1 %v6266_v61  ;;  %v6698_v61 = vld [vmem:[#allocation9 + $0x94] sm:$0xf0] }
 0x6b5   : > { %3818 = vmatmul.bf16.gmra.mxu0 %v6262_v49  ;;  %v6302_v40 = vor.u32 %v6698_v61, %v6301_v16 }
 0x6c4   : > { %3912 = vmatmul.bf16.gmra.mxu1 %v6274_v50 }
 0x6c5   : > { %3823 = vmatmul.bf16.gmra.mxu0 %v6270_v62 }
 0x6d4   : > { %3917 = vmatmul.bf16.gmra.mxu1 %v6282_v45  ;;  %v6326_v45 = vor.u32 %v6704_v2, %v6325_v39 }
 0x6d5   : > { %3828 = vmatmul.bf16.gmra.mxu0 %v6278_v41  ;;  %v6703_v41 = vld [vmem:[#allocation9 + $0xc4] sm:$0xf] }
 0x6d6   : > { %v6330_v19 = vor.u32 %v6703_v41, %v6327_v42  ;;  %3858 = vmatmul.bf16.gmra.mxu3 %v6326_v45 }
 0x6d8   : > { %3947 = vmatmul.bf16.gmra.mxu2 %v6330_v19 }
 0x6e4   : > { %3922 = vmatmul.bf16.gmra.mxu1 %v6290_v8 }
 0x6e5   : > { %3833 = vmatmul.bf16.gmra.mxu0 %v6286_v28 }
 0x6e8   : > { %3952 = vmatmul.bf16.gmra.mxu2 %v6338_v52 }
 0x6f1   : > { %v3888_v26 = vpop.f32.mrf.mxu1 }
 0x6f2   : > { %v3799_v23 = vpop.f32.mrf.mxu0 }
 0x6f3   : > { %v3889_v34 = vadd.f32 %v3888_v26, %v3799_v23  ;;  %v6706_v23 = vld [vmem:[#allocation9 + $0xd4] sm:$0xf0] }
 0x6f4   : > { %3927 = vmatmul.bf16.gmra.mxu1 %v6298_v47 }
 0x6f5   : > { %3838 = vmatmul.bf16.gmra.mxu0 %v6294_v12  ;;  %v3968_v30 = vpack.c.bf16 %v3889_v34, %v3889_v34  ;;  %v6333_v12 = vld [vmem:[#allocation9 + $0xd0] sm:$0xf] }
 0x6f6   : > { %v6334_v33 = vor.u32 %v6706_v23, %v6333_v12 }
 0x6f7   : > { %v4032_v49 = vunpack.c.l.b16 %v3968_v30 }
 0x6f8   : > { %3863 = vmatmul.bf16.gmra.mxu3 %v6334_v33 }
 0x6f9   : > { %v3890_v54 = vpop.f32.mrf.mxu1 }
 0x6fa   : > { %v3801_v43 = vpop.f32.mrf.mxu0 }
 0x6fb   : > { %v3891_v53 = vadd.f32 %v3890_v54, %v3801_v43 }
 0x6fd   : > { %v3969_v24 = vpack.c.bf16 %v3891_v53, %v3891_v53 }
 0x6ff   : > { %v4033_v31 = vunpack.c.l.b16 %v3969_v24 }
 0x701   : > { %v4064_v60 = vpack.c.b16 %v4033_v31, %v4032_v49  ;;  %v3893_v48 = vpop.f32.mrf.mxu1 }
 0x702   : > { %v3804_v50 = vpop.f32.mrf.mxu0 }
 0x703   : > { %v4081_v62 = vshrl.u32 %v4064_v60, 16  ;;  %v4084_v17 = vshll.u32 %v4064_v60, 16  ;;  %v3894_v1 = vadd.f32 %v3893_v48, %v3804_v50 }
 0x705   : > { %v4083_v6 = vrot.slane %v4081_v62, 7  ;;  %3843 = vmatmul.bf16.gmra.mxu0 %v6302_v40  ;;  %v3970_v3 = vpack.c.bf16 %v3894_v1, %v3894_v1 }
 0x707   : > { %v4086_v25 = vor.u32 %v4084_v17, %v4083_v6  ;;  %v4242_v46 = vsel %vm7133_vm2, %v4083_v6, 0  ;;  %v4034_v20 = vunpack.c.l.b16 %v3970_v3  ;;  %v6714_v3 = vld [vmem:[%s9683_s7 + $0x18] sm:$0xff] }
 0x708   : > { %v4279_v35 = vshll.u32 %v4242_v46, 16  ;;  %v4884_v28 = vrot.slane %v4242_v46, 1  ;;  %v6341_v46 = vld [vmem:[#allocation9 + $0xe0] sm:$0xf]  ;;  %4744 = vmatpush.bf16.msra.mxu2 %v6714_v3 }
 0x709   : > { %v3895_v58 = vpop.f32.mrf.mxu1  ;;  %v8565_v44 = vsel %vm7133_vm2, 0, %v4086_v25  ;;  %v6342_v19 = vor.u32 %v6708_v18, %v6341_v46 }
 0x70a   : > { %4511 = vrot.lane.b32.xlu1 %v8565_v44, %s7008_s21  ;;  %v3806_v38 = vpop.f32.mrf.mxu0  ;;  %v4883_v8 = vrot.slane %v8565_v44, 1  ;;  %v4274_v10 = vshll.u32 %v8565_v44, 16  ;;  %v4272_v51 = vshrl.u32 %v8565_v44, 16  ;;  %v4281_v63 = vrot.slane %v4279_v35, 1 }
 0x70b   : > { %v3896_v5 = vadd.f32 %v3895_v58, %v3806_v38  ;;  %v6707_v58 = vld [vmem:[#allocation9 + $0xe4] sm:$0xf]  ;;  %v6343_v38 = vld [vmem:[#allocation9 + $0xe8] sm:$0xf0]  ;;  %3868 = vmatmul.bf16.gmra.mxu3 %v6342_v19 }
 0x70c   : > { %v4885_v14 = vsel %vm4879_vm5, %v4883_v8, %v4884_v28  ;;  %v4276_v59 = vrot.slane %v4274_v10, 1  ;;  %v6721_v10 = vld [vmem:[%s9683_s7 + $0x50] sm:$0xff] }
 0x70d   : > { %v3971_v13 = vpack.c.bf16 %v3896_v5, %v3896_v5  ;;  %4934 = vrot.lane.b32.xlu0 %v4885_v14, %s7009_s22  ;;  %v6346_v5 = vor.u32 %v6707_v58, %v6343_v38  ;;  %5387 = vmatpush.bf16.msra.mxu0 %v6721_v10 }
 0x70e   : > { %v4277_v37 = vor.u32 %v4276_v59, %v4272_v51  ;;  %v6725_v59 = vld [vmem:[%s9683_s7 + $0x70] sm:$0xff] }
 0x70f   : > { %v4035_v27 = vunpack.c.l.b16 %v3971_v13  ;;  %5561 = vmatpush.bf16.msra.mxu1 %v6725_v59  ;;  %3957 = vmatmul.bf16.gmra.mxu2 %v6346_v5 }
 0x710   : > { %v8575_v55 = vsel %vm4258_vm8, %v4277_v37, %v4281_v63 }
 0x711   : > { %v4065_v57 = vpack.c.b16 %v4035_v27, %v4034_v20  ;;  %4964 = vrot.lane.b32.xlu2 %v8575_v55, %s7008_s21  ;;  %v3898_v22 = vpop.f32.mrf.mxu1 }
 0x712   : > { %4996 = vrot.lane.b32.xlu1 %v4885_v14, %s7014_s26  ;;  %v3809_v56 = vpop.f32.mrf.mxu0 }
 0x713   : > { %v4088_v21 = vshrl.u32 %v4065_v57, 16  ;;  %v4091_v26 = vshll.u32 %v4065_v57, 16  ;;  %v3899_v15 = vadd.f32 %v3898_v22, %v3809_v56 }
 0x715   : > { %v4090_v47 = vrot.slane %v4088_v21, 7  ;;  %4543 = vrot.lane.b32.xlu0 %v8575_v55, %s7014_s26  ;;  %v3972_v24 = vpack.c.bf16 %v3899_v15, %v3899_v15 }
 0x717   : > { %v4243_v29 = vsel %vm7133_vm2, %v4090_v47, 0  ;;  %v4093_v34 = vor.u32 %v4091_v26, %v4090_v47  ;;  %v4036_v50 = vunpack.c.l.b16 %v3972_v24 }
 0x718   : > { %v4291_v53 = vshll.u32 %v4243_v29, 16  ;;  %v4887_v6 = vrot.slane %v4243_v29, 1 }
 0x719   : > { %4465 = vrot.lane.b32.xlu2 %v8575_v55, %s7009_s22  ;;  %v3900_v9 = vpop.f32.mrf.mxu1  ;;  %v8588_v54 = vsel %vm7133_vm2, 0, %v4093_v34 }
 0x71a   : > { %4513 = vrot.lane.b32.xlu1 %v8588_v54, %s7008_s21  ;;  %v3811_v43 = vpop.f32.mrf.mxu0  ;;  %v4286_v30 = vshll.u32 %v8588_v54, 16  ;;  %v4284_v61 = vshrl.u32 %v8588_v54, 16  ;;  %v4886_v60 = vrot.slane %v8588_v54, 1  ;;  %v4293_v40 = vrot.slane %v4291_v53, 1  ;;  %v6710_v53 = vld [vmem:[#allocation9 + $0xf4] sm:$0xf0] }
 0x71b   : > { %v3901_v16 = vadd.f32 %v3900_v9, %v3811_v43 }
 0x71c   : > { %v4288_v49 = vrot.slane %v4286_v30, 1  ;;  %v4888_v45 = vsel %vm4879_vm5, %v4886_v60, %v4887_v6  ;;  %v6349_v30 = vld [vmem:[#allocation9 + $0xf0] sm:$0xf] }
 0x71d   : > { %v3973_v31 = vpack.c.bf16 %v3901_v16, %v3901_v16  ;;  %v6350_v24 = vor.u32 %v6710_v53, %v6349_v30  ;;  %v6709_v16 = vld [vmem:[#allocation9 + $0xf4] sm:$0xf] }
 0x71e   : > { %v4289_v48 = vor.u32 %v4288_v49, %v4284_v61  ;;  %v6351_v61 = vld [vmem:[#allocation9 + $0xf8] sm:$0xf0] }
 0x71f   : > { %v4037_v62 = vunpack.c.l.b16 %v3973_v31  ;;  %3873 = vmatmul.bf16.gmra.mxu3 %v6350_v24 }
 0x720   : > { %v8596_v17 = vsel %vm4258_vm8, %v4289_v48, %v4293_v40  ;;  %v6718_v48 = vld [vmem:[%s9683_s7 + $0x38] sm:$0xff]  ;;  %v6354_v40 = vor.u32 %v6709_v16, %v6351_v61 }
 0x721   : > { %v4066_v39 = vpack.c.b16 %v4037_v62, %v4036_v50  ;;  %4545 = vrot.lane.b32.xlu0 %v8596_v17, %s7014_s26  ;;  %4966 = vrot.lane.b32.xlu2 %v8596_v17, %s7008_s21  ;;  %v3903_v2 = vpop.f32.mrf.mxu1 }
 0x722   : > { %4998 = vrot.lane.b32.xlu1 %v4888_v45, %s7014_s26  ;;  %v3814_v41 = vpop.f32.mrf.mxu0  ;;  %5213 = vmatpush.bf16.msrb.mxu3 %v6718_v48 }
 0x723   : > { %v4095_v42 = vshrl.u32 %v4066_v39, 16  ;;  %v4098_v25 = vshll.u32 %v4066_v39, 16  ;;  %v3904_v8 = vadd.f32 %v3903_v2, %v3814_v41  ;;  %3962 = vmatmul.bf16.gmra.mxu2 %v6354_v40 }
 0x725   : > { %v4097_v1 = vrot.slane %v4095_v42, 7  ;;  %v3974_v20 = vpack.c.bf16 %v3904_v8, %v3904_v8 }
 0x727   : > { %v4244_v35 = vsel %vm7133_vm2, %v4097_v1, 0  ;;  %v4100_v28 = vor.u32 %v4098_v25, %v4097_v1  ;;  %v4038_v12 = vunpack.c.l.b16 %v3974_v20 }
 0x728   : > { %v4303_v63 = vshll.u32 %v4244_v35, 16  ;;  %v4890_v33 = vrot.slane %v4244_v35, 1 }
 0x729   : > { %4936 = vrot.lane.b32.xlu0 %v4888_v45, %s7009_s22  ;;  %4467 = vrot.lane.b32.xlu2 %v8596_v17, %s7009_s22  ;;  %v3905_v14 = vpop.f32.mrf.mxu1  ;;  %v8617_v51 = vsel %vm7133_vm2, 0, %v4100_v28 }
 0x72a   : > { %4515 = vrot.lane.b32.xlu1 %v8617_v51, %s7008_s21  ;;  %v3816_v13 = vpop.f32.mrf.mxu0  ;;  %v4298_v37 = vshll.u32 %v8617_v51, 16  ;;  %v4296_v57 = vshrl.u32 %v8617_v51, 16  ;;  %v4889_v21 = vrot.slane %v8617_v51, 1  ;;  %v4305_v26 = vrot.slane %v4303_v63, 1 }
 0x72b   : > { %v3906_v27 = vadd.f32 %v3905_v14, %v3816_v13 }
 0x72c   : > { %v4300_v22 = vrot.slane %v4298_v37, 1  ;;  %v4891_v15 = vsel %vm4879_vm5, %v4889_v21, %v4890_v33 }
 0x72d   : > { %v3975_v56 = vpack.c.bf16 %v3906_v27, %v3906_v27  ;;  %v6713_v27 = vld [vmem:[%s9683_s7 + $0x10] sm:$0xff] }
 0x72e   : > { %v4301_v47 = vor.u32 %v4300_v22, %v4296_v57  ;;  %v6720_v57 = vld [vmem:[%s9683_s7 + $0x48] sm:$0xff]  ;;  %v6717_v22 = vld [vmem:[%s9683_s7 + $0x30] sm:$0xff]  ;;  %4745 = vmatpush.bf16.msra.mxu2 %v6713_v27 }
 0x72f   : > { %v4039_v23 = vunpack.c.l.b16 %v3975_v56  ;;  %5388 = vmatpush.bf16.msra.mxu0 %v6720_v57  ;;  %5214 = vmatpush.bf16.msrb.mxu3 %v6717_v22  ;;  %v8724_v57 = vpop.permute.xlu2 %4463 }
 0x730   : > { %v8628_v32 = vsel %vm4258_vm8, %v4301_v47, %v4305_v26 }
 0x731   : > { %v4067_v7 = vpack.c.b16 %v4039_v23, %v4038_v12  ;;  %4547 = vrot.lane.b32.xlu0 %v8628_v32, %s7014_s26  ;;  %4968 = vrot.lane.b32.xlu2 %v8628_v32, %s7008_s21  ;;  %v3908_v29 = vpop.f32.mrf.mxu1 }
 0x732   : > { %5000 = vrot.lane.b32.xlu1 %v4891_v15, %s7014_s26  ;;  %v3819_v34 = vpop.f32.mrf.mxu0 }
 0x733   : > { %v4102_v52 = vshrl.u32 %v4067_v7, 16  ;;  %v4105_v43 = vshll.u32 %v4067_v7, 16  ;;  %v3909_v31 = vadd.f32 %v3908_v29, %v3819_v34 }
 0x735   : > { %v4104_v9 = vrot.slane %v4102_v52, 7  ;;  %v3976_v45 = vpack.c.bf16 %v3909_v31, %v3909_v31 }
 0x737   : > { %v4245_v49 = vsel %vm7133_vm2, %v4104_v9, 0  ;;  %v4107_v60 = vor.u32 %v4105_v43, %v4104_v9  ;;  %v4040_v58 = vunpack.c.l.b16 %v3976_v45  ;;  %v6712_v45 = vld [vmem:[%s9683_s7 + $0x8] sm:$0xff] }
 0x738   : > { %v4315_v2 = vshll.u32 %v4245_v49, 16  ;;  %v4893_v35 = vrot.slane %v4245_v49, 1  ;;  %4746 = vmatpush.bf16.msra.mxu2 %v6712_v45 }
 0x739   : > { %4938 = vrot.lane.b32.xlu0 %v4891_v15, %s7009_s22  ;;  %4469 = vrot.lane.b32.xlu2 %v8628_v32, %s7009_s22  ;;  %v3910_v50 = vpop.f32.mrf.mxu1  ;;  %v8646_v62 = vsel %vm7133_vm2, 0, %v4107_v60 }
 0x73a   : > { %4517 = vrot.lane.b32.xlu1 %v8646_v62, %s7008_s21  ;;  %v3821_v6 = vpop.f32.mrf.mxu0  ;;  %v4310_v39 = vshll.u32 %v8646_v62, 16  ;;  %v4308_v42 = vshrl.u32 %v8646_v62, 16  ;;  %v4892_v46 = vrot.slane %v8646_v62, 1  ;;  %v4317_v19 = vrot.slane %v4315_v2, 1  ;;  %v6724_v2 = vld [vmem:[%s9683_s7 + $0x68] sm:$0xff] }
 0x73b   : > { %v3911_v41 = vadd.f32 %v3910_v50, %v3821_v6  ;;  %5562 = vmatpush.bf16.msra.mxu1 %v6724_v2 }
 0x73c   : > { %v4312_v1 = vrot.slane %v4310_v39, 1  ;;  %v4894_v3 = vsel %vm4879_vm5, %v4892_v46, %v4893_v35 }
 0x73d   : > { %v3977_v25 = vpack.c.bf16 %v3911_v41, %v3911_v41 }
 0x73e   : > { %v4313_v18 = vor.u32 %v4312_v1, %v4308_v42 }
 0x73f   : > { %v4041_v38 = vunpack.c.l.b16 %v3977_v25 }
 0x740   : > { %v8654_v8 = vsel %vm4258_vm8, %v4313_v18, %v4317_v19 }
 0x741   : > { %v4068_v28 = vpack.c.b16 %v4041_v38, %v4040_v58  ;;  %4549 = vrot.lane.b32.xlu0 %v8654_v8, %s7014_s26  ;;  %4970 = vrot.lane.b32.xlu2 %v8654_v8, %s7008_s21  ;;  %v3913_v10 = vpop.f32.mrf.mxu1  ;;  %v8712_v58 = vpop.f32.mrf.mxu2 }
 0x742   : > { %5002 = vrot.lane.b32.xlu1 %v4894_v3, %s7014_s26  ;;  %v3824_v5 = vpop.f32.mrf.mxu0 }
 0x743   : > { %v4109_v14 = vshrl.u32 %v4068_v28, 16  ;;  %v4112_v13 = vshll.u32 %v4068_v28, 16  ;;  %v3914_v63 = vadd.f32 %v3913_v10, %v3824_v5 }
 0x745   : > { %v4111_v59 = vrot.slane %v4109_v14, 7  ;;  %v3978_v23 = vpack.c.bf16 %v3914_v63, %v3914_v63 }
 0x747   : > { %v4246_v37 = vsel %vm7133_vm2, %v4111_v59, 0  ;;  %v4114_v20 = vor.u32 %v4112_v13, %v4111_v59  ;;  %v4042_v43 = vunpack.c.l.b16 %v3978_v23 }
 0x748   : > { %v4327_v12 = vshll.u32 %v4246_v37, 16  ;;  %v4896_v53 = vrot.slane %v4246_v37, 1 }
 0x749   : > { %4940 = vrot.lane.b32.xlu0 %v4894_v3, %s7009_s22  ;;  %4471 = vrot.lane.b32.xlu2 %v8654_v8, %s7009_s22  ;;  %v3915_v56 = vpop.f32.mrf.mxu1  ;;  %v8678_v21 = vsel %vm7133_vm2, 0, %v4114_v20 }
 0x74a   : > { %4519 = vrot.lane.b32.xlu1 %v8678_v21, %s7008_s21  ;;  %v3826_v47 = vpop.f32.mrf.mxu0  ;;  %v4322_v26 = vshll.u32 %v8678_v21, 16  ;;  %v4320_v7 = vshrl.u32 %v8678_v21, 16  ;;  %v4895_v34 = vrot.slane %v8678_v21, 1  ;;  %v4329_v9 = vrot.slane %v4327_v12, 1 }
 0x74b   : > { %v3916_v33 = vadd.f32 %v3915_v56, %v3826_v47  ;;  %v6716_v56 = vld [vmem:[%s9683_s7 + $0x28] sm:$0xff] }
 0x74c   : > { %v4324_v29 = vrot.slane %v4322_v26, 1  ;;  %v4897_v49 = vsel %vm4879_vm5, %v4895_v34, %v4896_v53  ;;  %v8730_v26 = vpop.f32.mrf.mxu2  ;;  %5215 = vmatpush.bf16.msrb.mxu3 %v6716_v56  ;;  %v6711_v34 = vld [vmem:[%s9683_s7] sm:$0xff] }
 0x74d   : > { %v3979_v15 = vpack.c.bf16 %v3916_v33, %v3916_v33  ;;  %v6715_v33 = vld [vmem:[%s9683_s7 + $0x20] sm:$0xff]  ;;  %4747 = vmatpush.bf16.msra.mxu2 %v6711_v34 }
 0x74e   : > { %v4325_v52 = vor.u32 %v4324_v29, %v4320_v7 }
 0x74f   : > { %v4043_v30 = vunpack.c.l.b16 %v3979_v15 }
 0x750   : > { %v8686_v24 = vsel %vm4258_vm8, %v4325_v52, %v4329_v9  ;;  %5216 = vmatpush.bf16.msrb.mxu3 %v6715_v33 }
 0x751   : > { %v4069_v16 = vpack.c.b16 %v4043_v30, %v4042_v43  ;;  %4551 = vrot.lane.b32.xlu0 %v8686_v24, %s7014_s26  ;;  %4972 = vrot.lane.b32.xlu2 %v8686_v24, %s7008_s21  ;;  %v3918_v61 = vpop.f32.mrf.mxu1 }
 0x752   : > { %5004 = vrot.lane.b32.xlu1 %v4897_v49, %s7014_s26  ;;  %v3829_v31 = vpop.f32.mrf.mxu0 }
 0x753   : > { %v4116_v60 = vshrl.u32 %v4069_v16, 16  ;;  %v4119_v40 = vshll.u32 %v4069_v16, 16  ;;  %v3919_v6 = vadd.f32 %v3918_v61, %v3829_v31  ;;  %v8752_v31 = vpop.f32.mrf.mxu3 }
 0x755   : > { %v4118_v48 = vrot.slane %v4116_v60, 7  ;;  %v3980_v18 = vpack.c.bf16 %v3919_v6, %v3919_v6 }
 0x757   : > { %v4247_v50 = vsel %vm7133_vm2, %v4118_v48, 0  ;;  %v4121_v39 = vor.u32 %v4119_v40, %v4118_v48  ;;  %v4044_v14 = vunpack.c.l.b16 %v3980_v18  ;;  %v8755_v40 = vpop.f32.mrf.mxu2 }
 0x758   : > { %v4339_v46 = vshll.u32 %v4247_v50, 16  ;;  %v4899_v13 = vrot.slane %v4247_v50, 1 }
 0x759   : > { %4942 = vrot.lane.b32.xlu0 %v4897_v49, %s7009_s22  ;;  %4473 = vrot.lane.b32.xlu2 %v8686_v24, %s7009_s22  ;;  %v3920_v41 = vpop.f32.mrf.mxu1  ;;  %v8707_v42 = vsel %vm7133_vm2, 0, %v4121_v39 }
 0x75a   : > { %4521 = vrot.lane.b32.xlu1 %v8707_v42, %s7008_s21  ;;  %v3831_v1 = vpop.f32.mrf.mxu0  ;;  %v4334_v25 = vshll.u32 %v8707_v42, 16  ;;  %v4332_v38 = vshrl.u32 %v8707_v42, 16  ;;  %v4898_v10 = vrot.slane %v8707_v42, 1  ;;  %v4341_v5 = vrot.slane %v4339_v46, 1 }
 0x75b   : > { %v3921_v19 = vadd.f32 %v3920_v41, %v3831_v1 }
 0x75c   : > { %v4336_v35 = vrot.slane %v4334_v25, 1  ;;  %v4900_v27 = vsel %vm4879_vm5, %v4898_v10, %v4899_v13  ;;  %v3851_v10 = vpop.f32.mrf.mxu3  ;;  %v6723_v13 = vld [vmem:[%s9683_s7 + $0x60] sm:$0xff] }
 0x75d   : > { %v3981_v28 = vpack.c.bf16 %v3921_v19, %v3921_v19  ;;  %5563 = vmatpush.bf16.msra.mxu1 %v6723_v13  ;;  %v3939_v13 = vadd.f32 %v8755_v40, %v8752_v31 }
 0x75e   : > { %v4337_v3 = vor.u32 %v4336_v35, %v4332_v38 }
 0x75f   : > { %v4045_v59 = vunpack.c.l.b16 %v3981_v28  ;;  %v3988_v31 = vpack.c.bf16 %v3939_v13, %v3939_v13 }
 0x760   : > { %v8717_v37 = vsel %vm4258_vm8, %v4337_v3, %v4341_v5  ;;  %v3940_v3 = vpop.f32.mrf.mxu2 }
 0x761   : > { %v4070_v63 = vpack.c.b16 %v4045_v59, %v4044_v14  ;;  %4553 = vrot.lane.b32.xlu0 %v8717_v37, %s7014_s26  ;;  %4974 = vrot.lane.b32.xlu2 %v8717_v37, %s7008_s21  ;;  %v3923_v20 = vpop.f32.mrf.mxu1  ;;  %v6719_v59 = vld [vmem:[%s9683_s7 + $0x40] sm:$0xff] }
 0x762   : > { %5006 = vrot.lane.b32.xlu1 %v4900_v27, %s7014_s26  ;;  %v3834_v22 = vpop.f32.mrf.mxu0  ;;  %5389 = vmatpush.bf16.msra.mxu0 %v6719_v59 }
 0x763   : > { %v4123_v47 = vshrl.u32 %v4070_v63, 16  ;;  %v4126_v23 = vshll.u32 %v4070_v63, 16  ;;  %v3924_v29 = vadd.f32 %v3923_v20, %v3834_v22 }
 0x764   : > { %v8789_v34 = vpop.f32.mrf.mxu3 }
 0x765   : > { %v4125_v12 = vrot.slane %v4123_v47, 7  ;;  %v3982_v16 = vpack.c.bf16 %v3924_v29, %v3924_v29 }
 0x767   : > { %v4248_v7 = vsel %vm7133_vm2, %v4125_v12, 0  ;;  %v4128_v15 = vor.u32 %v4126_v23, %v4125_v12  ;;  %v4046_v45 = vunpack.c.l.b16 %v3982_v16 }
 0x768   : > { %v4351_v53 = vshll.u32 %v4248_v7, 16  ;;  %v4902_v1 = vrot.slane %v4248_v7, 1 }
 0x769   : > { %4944 = vrot.lane.b32.xlu0 %v4900_v27, %s7009_s22  ;;  %4475 = vrot.lane.b32.xlu2 %v8717_v37, %s7009_s22  ;;  %v3925_v52 = vpop.f32.mrf.mxu1  ;;  %v8745_v9 = vsel %vm7133_vm2, 0, %v4128_v15  ;;  %v4933_v27 = vpop.permute.xlu0 %4932 }
 0x76a   : > { %4523 = vrot.lane.b32.xlu1 %v8745_v9, %s7008_s21  ;;  %v3836_v43 = vpop.f32.mrf.mxu0  ;;  %v4346_v30 = vshll.u32 %v8745_v9, 16  ;;  %v4344_v60 = vshrl.u32 %v8745_v9, 16  ;;  %v4901_v6 = vrot.slane %v8745_v9, 1  ;;  %v4353_v2 = vrot.slane %v4351_v53, 1  ;;  %v8792_v53 = vpop.f32.mrf.mxu2 }
 0x76b   : > { %v3926_v61 = vadd.f32 %v3925_v52, %v3836_v43  ;;  %v8750_v49 = vpop.permute.xlu2 %4964 }
 0x76c   : > { %v4348_v48 = vrot.slane %v4346_v30, 1  ;;  %v4903_v19 = vsel %vm4879_vm5, %v4901_v6, %v4902_v1 }
 0x76d   : > { %v3983_v50 = vpack.c.bf16 %v3926_v61, %v3926_v61 }
 0x76e   : > { %v4349_v39 = vor.u32 %v4348_v48, %v4344_v60 }
 0x76f   : > { %v4047_v41 = vunpack.c.l.b16 %v3983_v50 }
 0x770   : > { %v8759_v25 = vsel %vm4258_vm8, %v4349_v39, %v4353_v2 }
 0x771   : > { %v4071_v46 = vpack.c.b16 %v4047_v41, %v4046_v45  ;;  %4555 = vrot.lane.b32.xlu0 %v8759_v25, %s7014_s26  ;;  %4976 = vrot.lane.b32.xlu2 %v8759_v25, %s7008_s21  ;;  %v3928_v18 = vpop.f32.mrf.mxu1  ;;  %v5030_v41 = vsel %vm903_vm0, %v8551_v36, %v4933_v27 }
 0x772   : > { %5008 = vrot.lane.b32.xlu1 %v4903_v19, %s7014_s26  ;;  %v3839_v38 = vpop.f32.mrf.mxu0  ;;  %v5077_v59 = vsel %vm939_vm4, %v5030_v41, %v8750_v49 }
 0x773   : > { %v4130_v35 = vshrl.u32 %v4071_v46, 16  ;;  %v8767_v28 = vpop.permute.xlu2 %4465  ;;  %v4133_v14 = vshll.u32 %v4071_v46, 16  ;;  %v3929_v20 = vadd.f32 %v3928_v18, %v3839_v38 }
 0x775   : > { %v4132_v5 = vrot.slane %v4130_v35, 7  ;;  %v3984_v7 = vpack.c.bf16 %v3929_v20, %v3929_v20  ;;  %v8808_v35 = vpop.f32.mrf.mxu3  ;;  %v3945_v20 = vpop.f32.mrf.mxu2 }
 0x777   : > { %v4249_v63 = vsel %vm7133_vm2, %v4132_v5, 0  ;;  %v4135_v22 = vor.u32 %v4133_v14, %v4132_v5  ;;  %v4048_v50 = vunpack.c.l.b16 %v3984_v7  ;;  %v4576_v5 = vsel %vm903_vm0, %v7150_v4, %v8724_v57 }
 0x778   : > { %v4363_v33 = vshll.u32 %v4249_v63, 16  ;;  %v4905_v2 = vrot.slane %v4249_v63, 1  ;;  %v3941_v63 = vadd.f32 %v3940_v3, %v3851_v10 }
 0x779   : > { %4946 = vrot.lane.b32.xlu0 %v4903_v19, %s7009_s22  ;;  %4477 = vrot.lane.b32.xlu2 %v8759_v25, %s7009_s22  ;;  %v3930_v56 = vpop.f32.mrf.mxu1  ;;  %v8782_v47 = vsel %vm7133_vm2, 0, %v4135_v22 }
 0x77a   : > { %4525 = vrot.lane.b32.xlu1 %v8782_v47, %s7008_s21  ;;  %v3841_v12 = vpop.f32.mrf.mxu0  ;;  %v4358_v23 = vshll.u32 %v8782_v47, 16  ;;  %v4356_v43 = vshrl.u32 %v8782_v47, 16  ;;  %v4904_v61 = vrot.slane %v8782_v47, 1  ;;  %v4365_v48 = vrot.slane %v4363_v33, 1 }
 0x77b   : > { %v3931_v29 = vadd.f32 %v3930_v56, %v3841_v12  ;;  %v8787_v15 = vpop.permute.xlu2 %4966  ;;  %v3989_v40 = vpack.c.bf16 %v3941_v63, %v3941_v63 }
 0x77c   : > { %v4512_v52 = vpop.permute.xlu1 %4511  ;;  %v4360_v30 = vrot.slane %v4358_v23, 1  ;;  %v4906_v46 = vsel %vm4879_vm5, %v4904_v61, %v4905_v2 }
 0x77d   : > { %v3985_v16 = vpack.c.bf16 %v3931_v29, %v3931_v29  ;;  %v4608_v57 = vsel %vm939_vm4, %v4576_v5, %v4512_v52  ;;  %v8841_v2 = vpop.f32.mrf.mxu2 }
 0x77e   : > { %v4361_v60 = vor.u32 %v4360_v30, %v4356_v43 }
 0x77f   : > { %v4049_v6 = vunpack.c.l.b16 %v3985_v16  ;;  %v4935_v39 = vpop.permute.xlu0 %4934  ;;  %v8838_v16 = vpop.f32.mrf.mxu3 }
 0x780   : > { %v8796_v45 = vsel %vm4258_vm8, %v4361_v60, %v4365_v48  ;;  %v5033_v13 = vsel %vm903_vm0, %v8575_v55, %v4935_v39 }
 0x781   : > { %v4072_v1 = vpack.c.b16 %v4049_v6, %v4048_v50  ;;  %4557 = vrot.lane.b32.xlu0 %v8796_v45, %s7014_s26  ;;  %4978 = vrot.lane.b32.xlu2 %v8796_v45, %s7008_s21  ;;  %v4052_v50 = vunpack.c.l.b16 %v3988_v31  ;;  %v4053_v6 = vunpack.c.l.b16 %v3989_v40 }
 0x782   : > { %5010 = vrot.lane.b32.xlu1 %v4906_v46, %s7014_s26  ;;  %v3844_v18 = vpop.f32.mrf.mxu0 }
 0x783   : > { %v4137_v19 = vshrl.u32 %v4072_v1, 16  ;;  %v8806_v38 = vpop.permute.xlu2 %4467  ;;  %v4140_v22 = vshll.u32 %v4072_v1, 16  ;;  %v3934_v23 = vadd.f32 %v8712_v58, %v3844_v18 }
 0x784   : > { %v4997_v14 = vpop.permute.xlu1 %4996 }
 0x785   : > { %v4139_v27 = vrot.slane %v4137_v19, 7  ;;  %v5109_v56 = vsel %vm4639_vm11, %v5077_v59, %v4997_v14  ;;  %v3986_v52 = vpack.c.bf16 %v3934_v23, %v3934_v23  ;;  %v4074_v59 = vpack.c.b16 %v4053_v6, %v4052_v50 }
 0x786   : > { %6411 = vmatmul.msk.bf16.vlgmr.msrb.gmra.mxu3 %vm1397_vm9, %v5109_v56 }
 0x787   : > { %v4250_v12 = vsel %vm7133_vm2, %v4139_v27, 0  ;;  %v4544_v33 = vpop.permute.xlu0 %4543  ;;  %v4142_v49 = vor.u32 %v4140_v22, %v4139_v27  ;;  %v4050_v19 = vunpack.c.l.b16 %v3986_v52  ;;  %v4578_v22 = vsel %vm903_vm0, %v8565_v44, %v8767_v28  ;;  %v3861_v31 = vpop.f32.mrf.mxu3 }
 0x788   : > { %v4641_v7 = vsel %vm4639_vm11, %v4608_v57, %v4544_v33  ;;  %v4375_v29 = vshll.u32 %v4250_v12, 16  ;;  %v5079_v33 = vsel %vm939_vm4, %v5033_v13, %v8787_v15  ;;  %v4154_v52 = vshll.u32 %v4074_v59, 16 }
 0x789   : > { %4948 = vrot.lane.b32.xlu0 %v4906_v46, %s7009_s22  ;;  %4479 = vrot.lane.b32.xlu2 %v8796_v45, %s7009_s22  ;;  %v8829_v10 = vsel %vm7133_vm2, 0, %v4142_v49  ;;  %v4151_v49 = vshrl.u32 %v4074_v59, 16 }
 0x78a   : > { %6371 = vmatmul.msk.bf16.vlgmr.msra.gmra.mxu2 %vm1397_vm9, %v4641_v7  ;;  %4527 = vrot.lane.b32.xlu1 %v8829_v10, %s7008_s21  ;;  %v3846_v58 = vpop.f32.mrf.mxu0  ;;  %v4370_v3 = vshll.u32 %v8829_v10, 16  ;;  %v4368_v60 = vshrl.u32 %v8829_v10, 16  ;;  %v4907_v1 = vrot.slane %v8829_v10, 1  ;;  %v4377_v18 = vrot.slane %v4375_v29, 1 }
 0x78b   : > { %v3936_v43 = vadd.f32 %v8730_v26, %v3846_v58  ;;  %v8836_v30 = vpop.permute.xlu2 %4968  ;;  %v4908_v26 = vrot.slane %v4250_v12, 1  ;;  %v3944_v7 = vadd.f32 %v8792_v53, %v8789_v34  ;;  %v3946_v58 = vadd.f32 %v3945_v20, %v8808_v35 }
 0x78c   : > { %v4514_v61 = vpop.permute.xlu1 %4513  ;;  %v4372_v48 = vrot.slane %v4370_v3, 1  ;;  %v3950_v3 = vpop.f32.mrf.mxu2  ;;  %v4153_v34 = vrot.slane %v4151_v49, 7 }
 0x78d   : > { %v3987_v41 = vpack.c.bf16 %v3936_v43, %v3936_v43  ;;  %v4909_v27 = vsel %vm4879_vm5, %v4907_v1, %v4908_v26  ;;  %v4610_v12 = vsel %vm939_vm4, %v4578_v22, %v4514_v61  ;;  %v3990_v35 = vpack.c.bf16 %v3944_v7, %v3944_v7 }
 0x78e   : > { %v4373_v46 = vor.u32 %v4372_v48, %v4368_v60  ;;  %v3991_v20 = vpack.c.bf16 %v3946_v58, %v3946_v58  ;;  %v4252_v49 = vsel %vm7133_vm2, %v4153_v34, 0  ;;  %v3949_v58 = vadd.f32 %v8841_v2, %v8838_v16 }
 0x78f   : > { %v4051_v5 = vunpack.c.l.b16 %v3987_v41  ;;  %v4054_v1 = vunpack.c.l.b16 %v3990_v35  ;;  %v8888_v59 = vpop.f32.mrf.mxu3 }
 0x790   : > { %v8845_v14 = vsel %vm4258_vm8, %v4373_v46, %v4377_v18  ;;  %v4055_v18 = vunpack.c.l.b16 %v3991_v20 }
 0x791   : > { %v4073_v63 = vpack.c.b16 %v4051_v5, %v4050_v19  ;;  %4559 = vrot.lane.b32.xlu0 %v8845_v14, %s7014_s26  ;;  %4980 = vrot.lane.b32.xlu2 %v8845_v14, %s7008_s21  ;;  %v4156_v19 = vor.u32 %v4154_v52, %v4153_v34  ;;  %v4399_v34 = vshll.u32 %v4252_v49, 16 }
 0x792   : > { %5012 = vrot.lane.b32.xlu1 %v4909_v27, %s7014_s26 }
 0x793   : > { %v4144_v56 = vshrl.u32 %v4073_v63, 16  ;;  %v8859_v57 = vpop.permute.xlu2 %4469  ;;  %v4546_v55 = vpop.permute.xlu0 %4545  ;;  %v4147_v28 = vshll.u32 %v4073_v63, 16 }
 0x794   : > { %v4643_v39 = vsel %vm4639_vm11, %v4610_v12, %v4546_v55  ;;  %v4999_v23 = vpop.permute.xlu1 %4998  ;;  %v4075_v12 = vpack.c.b16 %v4055_v18, %v4054_v1  ;;  %v8904_v55 = vsel %vm7133_vm2, 0, %v4156_v19  ;;  %v4914_v1 = vrot.slane %v4252_v49, 1 }
 0x795   : > { %v4146_v44 = vrot.slane %v4144_v56, 7  ;;  %v5111_v40 = vsel %vm4639_vm11, %v5079_v33, %v4999_v23  ;;  %6483 = vmatmul.msk.bf16.vlgmr.msra.gmra.mxu0 %vm1397_vm9, %v4643_v39 }
 0x796   : > { %6412 = vmatmul.msk.bf16.gmra.mxu3 %vm1397_vm9, %v5111_v40  ;;  %6555 = vmatmul.msk.bf16.vlgmr.msra.gmra.mxu1 %vm1397_vm9, %v5111_v40  ;;  %v4394_v40 = vshll.u32 %v8904_v55, 16  ;;  %v4161_v20 = vshll.u32 %v4075_v12, 16 }
 0x797   : > { %v4251_v15 = vsel %vm7133_vm2, %v4146_v44, 0  ;;  %v4149_v29 = vor.u32 %v4147_v28, %v4146_v44 }
 0x798   : > { %v4387_v61 = vshll.u32 %v4251_v15, 16  ;;  %v4911_v13 = vrot.slane %v4251_v15, 1  ;;  %v3951_v15 = vadd.f32 %v3950_v3, %v3861_v31  ;;  %v4396_v52 = vrot.slane %v4394_v40, 1 }
 0x799   : > { %4950 = vrot.lane.b32.xlu0 %v4909_v27, %s7009_s22  ;;  %4481 = vrot.lane.b32.xlu2 %v8845_v14, %s7009_s22  ;;  %v8878_v53 = vsel %vm7133_vm2, 0, %v4149_v29  ;;  %v8893_v27 = vpop.f32.mrf.mxu2  ;;  %v4392_v29 = vshrl.u32 %v8904_v55, 16 }
 0x79a   : > { %6372 = vmatmul.msk.bf16.gmra.mxu2 %vm1397_vm9, %v4643_v39  ;;  %4529 = vrot.lane.b32.xlu1 %v8878_v53, %s7008_s21  ;;  %v4382_v43 = vshll.u32 %v8878_v53, 16  ;;  %v4380_v6 = vshrl.u32 %v8878_v53, 16  ;;  %v4910_v46 = vrot.slane %v8878_v53, 1  ;;  %v4389_v26 = vrot.slane %v4387_v61, 1 }
 0x79b   : > { %v8884_v60 = vpop.permute.xlu2 %4970  ;;  %v4937_v48 = vpop.permute.xlu0 %4936  ;;  %v4580_v39 = vsel %vm903_vm0, %v8588_v54, %v8806_v38  ;;  %v4158_v38 = vshrl.u32 %v4075_v12, 16  ;;  %v3993_v61 = vpack.c.bf16 %v3951_v15, %v3951_v15 }
 0x79c   : > { %v4516_v50 = vpop.permute.xlu1 %4515  ;;  %v4384_v41 = vrot.slane %v4382_v43, 1  ;;  %v5036_v22 = vsel %vm903_vm0, %v8596_v17, %v4937_v48  ;;  %v4912_v56 = vsel %vm4879_vm5, %v4910_v46, %v4911_v13  ;;  %v3992_v43 = vpack.c.bf16 %v3949_v58, %v3949_v58 }
 0x79d   : > { %v4612_v17 = vsel %vm939_vm4, %v4580_v39, %v4516_v50  ;;  %v5081_v28 = vsel %vm939_vm4, %v5036_v22, %v8836_v30  ;;  %v3866_v30 = vpop.f32.mrf.mxu3  ;;  %v4160_v35 = vrot.slane %v4158_v38, 7  ;;  %v4397_v48 = vor.u32 %v4396_v52, %v4392_v29 }
 0x79e   : > { %v4385_v5 = vor.u32 %v4384_v41, %v4380_v6  ;;  %v4401_v50 = vrot.slane %v4399_v34, 1  ;;  %v4913_v6 = vrot.slane %v8904_v55, 1  ;;  %v4056_v41 = vunpack.c.l.b16 %v3992_v43 }
 0x79f   : > { %v4057_v46 = vunpack.c.l.b16 %v3993_v61  ;;  %v4163_v18 = vor.u32 %v4161_v20, %v4160_v35 }
 0x7a0   : > { %v8891_v63 = vsel %vm4258_vm8, %v4385_v5, %v4389_v26  ;;  %v8936_v19 = vsel %vm4258_vm8, %v4397_v48, %v4401_v50  ;;  %v4915_v26 = vsel %vm4879_vm5, %v4913_v6, %v4914_v1 }
 0x7a1   : > { %4561 = vrot.lane.b32.xlu0 %v8891_v63, %s7014_s26  ;;  %4982 = vrot.lane.b32.xlu2 %v8891_v63, %s7008_s21  ;;  %v3955_v16 = vpop.f32.mrf.mxu2  ;;  %v4076_v13 = vpack.c.b16 %v4057_v46, %v4056_v41  ;;  %v8947_v22 = vsel %vm7133_vm2, 0, %v4163_v18 }
 0x7a2   : > { %5014 = vrot.lane.b32.xlu1 %v4912_v56, %s7014_s26  ;;  %v3956_v38 = vadd.f32 %v3955_v16, %v3866_v30  ;;  %v4404_v58 = vshrl.u32 %v8947_v22, 16 }
 0x7a3   : > { %v8911_v23 = vpop.permute.xlu2 %4471  ;;  %v4548_v33 = vpop.permute.xlu0 %4547  ;;  %v4165_v40 = vshrl.u32 %v4076_v13, 16  ;;  %v4168_v52 = vshll.u32 %v4076_v13, 16 }
 0x7a4   : > { %v4645_v7 = vsel %vm4639_vm11, %v4612_v17, %v4548_v33  ;;  %v5001_v44 = vpop.permute.xlu1 %5000  ;;  %v4253_v33 = vsel %vm7133_vm2, %v4160_v35, 0  ;;  %v3995_v35 = vpack.c.bf16 %v3956_v38, %v3956_v38 }
 0x7a5   : > { %v5113_v54 = vsel %vm4639_vm11, %v5081_v28, %v5001_v44  ;;  %6484 = vmatmul.msk.bf16.gmra.mxu0 %vm1397_vm9, %v4645_v7  ;;  %v4406_v28 = vshll.u32 %v8947_v22, 16  ;;  %v4167_v29 = vrot.slane %v4165_v40, 7  ;;  %v4917_v61 = vrot.slane %v4253_v33, 1 }
 0x7a6   : > { %6413 = vmatmul.msk.bf16.gmra.mxu3 %vm1397_vm9, %v5113_v54  ;;  %6556 = vmatmul.msk.bf16.gmra.mxu1 %vm1397_vm9, %v5113_v54  ;;  %v3954_v54 = vadd.f32 %v8893_v27, %v8888_v59 }
 0x7a7   : > { %v4408_v15 = vrot.slane %v4406_v28, 1  ;;  %v4170_v48 = vor.u32 %v4168_v52, %v4167_v29 }
 0x7a8   : > { %v3994_v34 = vpack.c.bf16 %v3954_v54, %v3954_v54 }
 0x7a9   : > { %4952 = vrot.lane.b32.xlu0 %v4912_v56, %s7009_s22  ;;  %4483 = vrot.lane.b32.xlu2 %v8891_v63, %s7009_s22  ;;  %v4582_v56 = vsel %vm903_vm0, %v8617_v51, %v8859_v57  ;;  %v3958_v51 = vpop.f32.mrf.mxu2  ;;  %v4409_v20 = vor.u32 %v4408_v15, %v4404_v58 }
 0x7aa   : > { %6373 = vmatmul.msk.bf16.gmra.mxu2 %vm1397_vm9, %v4645_v7  ;;  %4531 = vrot.lane.b32.xlu1 %v8904_v55, %s7008_s21  ;;  %v4058_v16 = vunpack.c.l.b16 %v3994_v34 }
 0x7ab   : > { %v8932_v2 = vpop.permute.xlu2 %4972  ;;  %v4939_v31 = vpop.permute.xlu0 %4938 }
 0x7ac   : > { %v4518_v3 = vpop.permute.xlu1 %4517  ;;  %v5039_v5 = vsel %vm903_vm0, %v8628_v32, %v4939_v31  ;;  %v3869_v32 = vpop.f32.mrf.mxu3  ;;  %v4916_v31 = vrot.slane %v8947_v22, 1 }
 0x7ad   : > { %v4614_v12 = vsel %vm939_vm4, %v4582_v56, %v4518_v3  ;;  %v5083_v44 = vsel %vm939_vm4, %v5039_v5, %v8884_v60  ;;  %v4411_v60 = vshll.u32 %v4253_v33, 16  ;;  %v4059_v3 = vunpack.c.l.b16 %v3995_v35 }
 0x7ae   : > { %v4918_v46 = vsel %vm4879_vm5, %v4916_v31, %v4917_v61  ;;  %v8990_v5 = vsel %vm7133_vm2, 0, %v4170_v48 }
 0x7af   : > { %v4413_v43 = vrot.slane %v4411_v60, 1  ;;  %v4077_v18 = vpack.c.b16 %v4059_v3, %v4058_v16 }
 0x7b1   : > { %4563 = vrot.lane.b32.xlu0 %v8936_v19, %s7014_s26  ;;  %4984 = vrot.lane.b32.xlu2 %v8936_v19, %s7008_s21  ;;  %v3960_v6 = vpop.f32.mrf.mxu2  ;;  %v8979_v41 = vsel %vm4258_vm8, %v4409_v20, %v4413_v43  ;;  %v4175_v15 = vshll.u32 %v4077_v18, 16 }
 0x7b2   : > { %5016 = vrot.lane.b32.xlu1 %v4915_v26, %s7014_s26 }
 0x7b3   : > { %v8954_v39 = vpop.permute.xlu2 %4473  ;;  %v4550_v17 = vpop.permute.xlu0 %4549 }
 0x7b4   : > { %v4647_v49 = vsel %vm4639_vm11, %v4614_v12, %v4550_v17  ;;  %v5003_v7 = vpop.permute.xlu1 %5002  ;;  %v3871_v50 = vpop.f32.mrf.mxu3  ;;  %v4254_v12 = vsel %vm7133_vm2, %v4167_v29, 0 }
 0x7b5   : > { %v5115_v57 = vsel %vm4639_vm11, %v5083_v44, %v5003_v7  ;;  %6485 = vmatmul.msk.bf16.gmra.mxu0 %vm1397_vm9, %v4647_v49  ;;  %v4418_v7 = vshll.u32 %v8990_v5, 16  ;;  %v3959_v44 = vadd.f32 %v3958_v51, %v3869_v32  ;;  %v3961_v28 = vadd.f32 %v3960_v6, %v3871_v50 }
 0x7b6   : > { %6414 = vmatmul.msk.bf16.gmra.mxu3 %vm1397_vm9, %v5115_v57  ;;  %6557 = vmatmul.msk.bf16.gmra.mxu1 %vm1397_vm9, %v5115_v57  ;;  %v4416_v57 = vshrl.u32 %v8990_v5, 16  ;;  %v4423_v54 = vshll.u32 %v4254_v12, 16  ;;  %v4920_v20 = vrot.slane %v4254_v12, 1  ;;  %v4586_v6 = vsel %vm903_vm0, %v8678_v21, %v8954_v39 }
 0x7b7   : > { %v4420_v40 = vrot.slane %v4418_v7, 1  ;;  %v3996_v60 = vpack.c.bf16 %v3959_v44, %v3959_v44  ;;  %v3997_v32 = vpack.c.bf16 %v3961_v28, %v3961_v28 }
 0x7b8   : > { %v4425_v35 = vrot.slane %v4423_v54, 1 }
 0x7b9   : > { %4954 = vrot.lane.b32.xlu0 %v4915_v26, %s7009_s22  ;;  %4485 = vrot.lane.b32.xlu2 %v8936_v19, %s7009_s22  ;;  %v4584_v26 = vsel %vm903_vm0, %v8646_v62, %v8911_v23  ;;  %v4172_v23 = vshrl.u32 %v4077_v18, 16  ;;  %v3963_v58 = vpop.f32.mrf.mxu2  ;;  %v4421_v34 = vor.u32 %v4420_v40, %v4416_v57  ;;  %v4061_v43 = vunpack.c.l.b16 %v3997_v32 }
 0x7ba   : > { %6374 = vmatmul.msk.bf16.gmra.mxu2 %vm1397_vm9, %v4647_v49  ;;  %4533 = vrot.lane.b32.xlu1 %v8947_v22, %s7008_s21 }
 0x7bb   : > { %v8975_v59 = vpop.permute.xlu2 %4974  ;;  %v4941_v27 = vpop.permute.xlu0 %4940  ;;  %v9020_v16 = vsel %vm4258_vm8, %v4421_v34, %v4425_v35 }
 0x7bc   : > { %v4520_v30 = vpop.permute.xlu1 %4519  ;;  %v5042_v1 = vsel %vm903_vm0, %v8654_v8, %v4941_v27  ;;  %v3874_v38 = vpop.f32.mrf.mxu3  ;;  %v4919_v27 = vrot.slane %v8990_v5, 1 }
 0x7bd   : > { %v4616_v8 = vsel %vm939_vm4, %v4584_v26, %v4520_v30  ;;  %v5085_v49 = vsel %vm939_vm4, %v5042_v1, %v8932_v2  ;;  %v4174_v2 = vrot.slane %v4172_v23, 7  ;;  %v4060_v30 = vunpack.c.l.b16 %v3996_v60 }
 0x7be   : > { %v4921_v3 = vsel %vm4879_vm5, %v4919_v27, %v4920_v20 }
 0x7bf   : > { %v4177_v61 = vor.u32 %v4175_v15, %v4174_v2  ;;  %v4078_v48 = vpack.c.b16 %v4061_v43, %v4060_v30 }
 0x7c1   : > { %4565 = vrot.lane.b32.xlu0 %v8979_v41, %s7014_s26  ;;  %4986 = vrot.lane.b32.xlu2 %v8979_v41, %s7008_s21  ;;  %v9031_v50 = vsel %vm7133_vm2, 0, %v4177_v61  ;;  %v3965_v1 = vpop.f32.mrf.mxu2  ;;  %v4182_v28 = vshll.u32 %v4078_v48, 16 }
 0x7c2   : > { %5018 = vrot.lane.b32.xlu1 %v4918_v46, %s7014_s26  ;;  %v4430_v21 = vshll.u32 %v9031_v50, 16  ;;  %v4922_v60 = vrot.slane %v9031_v50, 1 }
 0x7c3   : > { %v8997_v13 = vpop.permute.xlu2 %4475  ;;  %v4552_v56 = vpop.permute.xlu0 %4551 }
 0x7c4   : > { %v4649_v17 = vsel %vm4639_vm11, %v4616_v8, %v4552_v56  ;;  %v5005_v33 = vpop.permute.xlu1 %5004  ;;  %v4255_v8 = vsel %vm7133_vm2, %v4174_v2, 0  ;;  %v4432_v23 = vrot.slane %v4430_v21, 1  ;;  %v4588_v61 = vsel %vm903_vm0, %v8707_v42, %v8997_v13 }
 0x7c5   : > { %v5117_v62 = vsel %vm4639_vm11, %v5085_v49, %v5005_v33  ;;  %6486 = vmatmul.msk.bf16.gmra.mxu0 %vm1397_vm9, %v4649_v17  ;;  %v4179_v33 = vshrl.u32 %v4078_v48, 16  ;;  %v3964_v49 = vadd.f32 %v3963_v58, %v3874_v38  ;;  %v4435_v44 = vshll.u32 %v4255_v8, 16 }
 0x7c6   : > { %6415 = vmatmul.msk.bf16.gmra.mxu3 %vm1397_vm9, %v5117_v62  ;;  %6558 = vmatmul.msk.bf16.gmra.mxu1 %vm1397_vm9, %v5117_v62  ;;  %v4428_v62 = vshrl.u32 %v9031_v50, 16 }
 0x7c7   : > { %v3998_v57 = vpack.c.bf16 %v3964_v49, %v3964_v49  ;;  %v4437_v15 = vrot.slane %v4435_v44, 1 }
 0x7c8   : > { %v4433_v2 = vor.u32 %v4432_v23, %v4428_v62 }
 0x7c9   : > { %4956 = vrot.lane.b32.xlu0 %v4918_v46, %s7009_s22  ;;  %4487 = vrot.lane.b32.xlu2 %v8979_v41, %s7009_s22  ;;  %v4062_v32 = vunpack.c.l.b16 %v3998_v57 }
 0x7ca   : > { %6375 = vmatmul.msk.bf16.gmra.mxu2 %vm1397_vm9, %v4649_v17  ;;  %4535 = vrot.lane.b32.xlu1 %v8990_v5, %s7008_s21  ;;  %v9061_v35 = vsel %vm4258_vm8, %v4433_v2, %v4437_v15 }
 0x7cb   : > { %v9016_v51 = vpop.permute.xlu2 %4976  ;;  %v4943_v29 = vpop.permute.xlu0 %4942 }
 0x7cc   : > { %v4522_v52 = vpop.permute.xlu1 %4521  ;;  %v5045_v31 = vsel %vm903_vm0, %v8686_v24, %v4943_v29  ;;  %v3876_v24 = vpop.f32.mrf.mxu3  ;;  %v4923_v29 = vrot.slane %v4255_v8, 1 }
 0x7cd   : > { %v4618_v46 = vsel %vm939_vm4, %v4586_v6, %v4522_v52  ;;  %v5087_v17 = vsel %vm939_vm4, %v5045_v31, %v8975_v59  ;;  %v3966_v7 = vadd.f32 %v3965_v1, %v3876_v24  ;;  %v4181_v59 = vrot.slane %v4179_v33, 7 }
 0x7ce   : > { %v4924_v30 = vsel %vm4879_vm5, %v4922_v60, %v4923_v29 }
 0x7cf   : > { %v3999_v40 = vpack.c.bf16 %v3966_v7, %v3966_v7  ;;  %v4184_v34 = vor.u32 %v4182_v28, %v4181_v59 }
 0x7d1   : > { %4567 = vrot.lane.b32.xlu0 %v9020_v16, %s7014_s26  ;;  %4988 = vrot.lane.b32.xlu2 %v9020_v16, %s7008_s21  ;;  %v4063_v52 = vunpack.c.l.b16 %v3999_v40  ;;  %v9072_v43 = vsel %vm7133_vm2, 0, %v4184_v34 }
 0x7d2   : > { %5020 = vrot.lane.b32.xlu1 %v4921_v3, %s7014_s26  ;;  %v4442_v1 = vshll.u32 %v9072_v43, 16  ;;  %v4925_v7 = vrot.slane %v9072_v43, 1 }
 0x7d3   : > { %v9038_v18 = vpop.permute.xlu2 %4477  ;;  %v4554_v26 = vpop.permute.xlu0 %4553  ;;  %v4079_v20 = vpack.c.b16 %v4063_v52, %v4062_v32 }
 0x7d4   : > { %v4651_v56 = vsel %vm4639_vm11, %v4618_v46, %v4554_v26  ;;  %v5007_v12 = vpop.permute.xlu1 %5006  ;;  %v4256_v46 = vsel %vm7133_vm2, %v4181_v59, 0  ;;  %v4440_v26 = vshrl.u32 %v9072_v43, 16  ;;  %v4444_v8 = vrot.slane %v4442_v1, 1 }
 0x7d5   : > { %v5119_v39 = vsel %vm4639_vm11, %v5087_v17, %v5007_v12  ;;  %6487 = vmatmul.msk.bf16.gmra.mxu0 %vm1397_vm9, %v4651_v56  ;;  %v4186_v13 = vshrl.u32 %v4079_v20, 16  ;;  %v4189_v12 = vshll.u32 %v4079_v20, 16  ;;  %v4926_v62 = vrot.slane %v4256_v46, 1 }
 0x7d6   : > { %6416 = vmatmul.msk.bf16.gmra.mxu3 %vm1397_vm9, %v5119_v39  ;;  %6559 = vmatmul.msk.bf16.gmra.mxu1 %vm1397_vm9, %v5119_v39  ;;  %v4445_v33 = vor.u32 %v4444_v8, %v4440_v26  ;;  %v4590_v40 = vsel %vm903_vm0, %v8745_v9, %v9038_v18 }
 0x7d7   : > { %v4927_v28 = vsel %vm4879_vm5, %v4925_v7, %v4926_v62  ;;  %v9187_v7 = vld [vmem:[#allocation7] ss:$0 sm:$0xff] }
 0x7d9   : > { %4958 = vrot.lane.b32.xlu0 %v4921_v3, %s7009_s22  ;;  %4489 = vrot.lane.b32.xlu2 %v9020_v16, %s7009_s22 }
 0x7da   : > { %6376 = vmatmul.msk.bf16.gmra.mxu2 %vm1397_vm9, %v4651_v56  ;;  %4537 = vrot.lane.b32.xlu1 %v9031_v50, %s7008_s21  ;;  %v4447_v56 = vshll.u32 %v4256_v46, 16 }
 0x7db   : > { %v9057_v54 = vpop.permute.xlu2 %4978  ;;  %v4945_v38 = vpop.permute.xlu0 %4944 }
 0x7dc   : > { %v4524_v58 = vpop.permute.xlu1 %4523  ;;  %v5048_v27 = vsel %vm903_vm0, %v8717_v37, %v4945_v38  ;;  %v4449_v49 = vrot.slane %v4447_v56, 1 }
 0x7dd   : > { %v4620_v37 = vsel %vm939_vm4, %v4588_v61, %v4524_v58  ;;  %v5089_v24 = vsel %vm939_vm4, %v5048_v27, %v9016_v51  ;;  %v4188_v51 = vrot.slane %v4186_v13, 7 }
 0x7de   : > { %v9100_v44 = vsel %vm4258_vm8, %v4445_v33, %v4449_v49  ;;  %v9183_v49 = vld [vmem:[#allocation7] ss:$0 sm:$0xff] }
 0x7df   : > { %v4191_v23 = vor.u32 %v4189_v12, %v4188_v51  ;;  %v4257_v29 = vsel %vm7133_vm2, %v4188_v51, 0  ;;  %v9176_v51 = vld [vmem:[#allocation7] ss:$0 sm:$0xff] }
 0x7e0   : > { %v4459_v34 = vshll.u32 %v4257_v29, 16 }
 0x7e1   : > { %4569 = vrot.lane.b32.xlu0 %v9061_v35, %s7014_s26  ;;  %4990 = vrot.lane.b32.xlu2 %v9061_v35, %s7008_s21  ;;  %v9111_v57 = vsel %vm7133_vm2, 0, %v4191_v23  ;;  %vm4829_vm2 = vcmask 23552  }
 0x7e2   : > { %5022 = vrot.lane.b32.xlu1 %v4924_v30, %s7014_s26  ;;  %v4454_v32 = vshll.u32 %v9111_v57, 16  ;;  %v4452_v18 = vshrl.u32 %v9111_v57, 16  ;;  %v4461_v20 = vrot.slane %v4459_v34, 1  ;;  %v4929_v61 = vrot.slane %v9111_v57, 1 }
 0x7e3   : > { %v9079_v31 = vpop.permute.xlu2 %4479  ;;  %v4556_v3 = vpop.permute.xlu0 %4555 }
 0x7e4   : > { %v4653_v48 = vsel %vm4639_vm11, %v4620_v37, %v4556_v3  ;;  %v5009_v6 = vpop.permute.xlu1 %5008  ;;  %v4456_v52 = vrot.slane %v4454_v32, 1  ;;  %v4930_v37 = vrot.slane %v4257_v29, 1 }
 0x7e5   : > { %v5121_v42 = vsel %vm4639_vm11, %v5089_v24, %v5009_v6  ;;  %6488 = vmatmul.msk.bf16.gmra.mxu0 %vm1397_vm9, %v4653_v48  ;;  %v4592_v24 = vsel %vm903_vm0, %v8782_v47, %v9079_v31  ;;  %v9162_v47 = vld [vmem:[#allocation7] ss:$0 sm:$0xff] }
 0x7e6   : > { %6417 = vmatmul.msk.bf16.gmra.mxu3 %vm1397_vm9, %v5121_v42  ;;  %6560 = vmatmul.msk.bf16.gmra.mxu1 %vm1397_vm9, %v5121_v42  ;;  %v4931_v6 = vsel %vm4879_vm5, %v4929_v61, %v4930_v37 }
 0x7e9   : > { %4960 = vrot.lane.b32.xlu0 %v4924_v30, %s7009_s22  ;;  %4491 = vrot.lane.b32.xlu2 %v9061_v35, %s7009_s22  ;;  %v4457_v30 = vor.u32 %v4456_v52, %v4452_v18 }
 0x7ea   : > { %6377 = vmatmul.msk.bf16.gmra.mxu2 %vm1397_vm9, %v4653_v48  ;;  %4539 = vrot.lane.b32.xlu1 %v9072_v43, %s7008_s21 }
 0x7eb   : > { %v4981_v17 = vpop.permute.xlu2 %4980  ;;  %v4947_v21 = vpop.permute.xlu0 %4946  ;;  %v9139_v3 = vsel %vm4258_vm8, %v4457_v30, %v4461_v20 }
 0x7ec   : > { %v4526_v39 = vpop.permute.xlu1 %4525  ;;  %v5051_v59 = vsel %vm903_vm0, %v8759_v25, %v4947_v21 }
 0x7ed   : > { %v4622_v25 = vsel %vm939_vm4, %v4590_v40, %v4526_v39  ;;  %v5091_v60 = vsel %vm939_vm4, %v5051_v59, %v9057_v54 }
 0x7f1   : > { %4571 = vrot.lane.b32.xlu0 %v9100_v44, %s7014_s26  ;;  %4992 = vrot.lane.b32.xlu2 %v9100_v44, %s7008_s21 }
 0x7f2   : > { %5024 = vrot.lane.b32.xlu1 %v4927_v28, %s7014_s26 }
 0x7f3   : > { %v9118_v38 = vpop.permute.xlu2 %4481  ;;  %v4558_v58 = vpop.permute.xlu0 %4557 }
 0x7f4   : > { %v4655_v2 = vsel %vm4639_vm11, %v4622_v25, %v4558_v58  ;;  %v5011_v15 = vpop.permute.xlu1 %5010 }
 0x7f5   : > { %v5123_v9 = vsel %vm4639_vm11, %v5091_v60, %v5011_v15  ;;  %6489 = vmatmul.msk.bf16.gmra.mxu0 %vm1397_vm9, %v4655_v2 }
 0x7f6   : > { %6418 = vmatmul.msk.bf16.gmra.mxu3 %vm1397_vm9, %v5123_v9  ;;  %6561 = vmatmul.msk.bf16.gmra.mxu1 %vm1397_vm9, %v5123_v9 }
 0x7f9   : > { %4962 = vrot.lane.b32.xlu0 %v4927_v28, %s7009_s22  ;;  %4493 = vrot.lane.b32.xlu2 %v9100_v44, %s7009_s22  ;;  %v4594_v28 = vsel %vm903_vm0, %v8829_v10, %v9118_v38 }
 0x7fa   : > { %6378 = vmatmul.msk.bf16.gmra.mxu2 %vm1397_vm9, %v4655_v2  ;;  %4541 = vrot.lane.b32.xlu1 %v9111_v57, %s7008_s21 }
 0x7fb   : > { %v4983_v0 = vpop.permute.xlu2 %4982  ;;  %v4949_v54 = vpop.permute.xlu0 %4948 }
 0x7fc   : > { %v4528_v27 = vpop.permute.xlu1 %4527  ;;  %v5054_v48 = vsel %vm903_vm0, %v8796_v45, %v4949_v54 }
 0x7fd   : > { %v4624_v1 = vsel %vm939_vm4, %v4592_v24, %v4528_v27  ;;  %v5093_v26 = vsel %vm939_vm4, %v5054_v48, %v4981_v17 }
 0x801   : > { %4573 = vrot.lane.b32.xlu0 %v9139_v3, %s7014_s26  ;;  %4994 = vrot.lane.b32.xlu2 %v9139_v3, %s7008_s21 }
 0x802   : > { %5026 = vrot.lane.b32.xlu1 %v4931_v6, %s7014_s26 }
 0x803   : > { %v9153_v46 = vpop.permute.xlu2 %4483  ;;  %v4560_v42 = vpop.permute.xlu0 %4559 }
 0x804   : > { %v4657_v45 = vsel %vm4639_vm11, %v4624_v1, %v4560_v42  ;;  %v5013_v13 = vpop.permute.xlu1 %5012  ;;  %v4596_v1 = vsel %vm903_vm0, %v8878_v53, %v9153_v46 }
 0x805   : > { %v5125_v8 = vsel %vm4639_vm11, %v5093_v26, %v5013_v13  ;;  %6490 = vmatmul.msk.bf16.gmra.mxu0 %vm1397_vm9, %v4657_v45 }
 0x806   : > { %6419 = vmatmul.msk.bf16.gmra.mxu3 %vm1397_vm9, %v5125_v8  ;;  %6562 = vmatmul.msk.bf16.gmra.mxu1 %vm1397_vm9, %v5125_v8 }
 0x809   : > { %5504 = vrot.lane.b32.xlu0 %v4931_v6, %s7009_s22  ;;  %5331 = vrot.lane.b32.xlu2 %v9139_v3, %s7009_s22  ;;  %v5218_v31 = vpop.f32.mrf.mxu3 }
 0x80a   : > { %6379 = vmatmul.msk.bf16.gmra.mxu2 %vm1397_vm9, %v4657_v45  ;;  %v5219_v56 = vadd.f32 %v9162_v47, %v5218_v31  ;;  %5333 = vrot.lane.b32.xlu1 %v7150_v4, %s7008_s21 }
 0x80b   : > { %v9178_v12 = vpop.permute.xlu2 %4984  ;;  %v4951_v17 = vpop.permute.xlu0 %4950 }
 0x80c   : > { %6427 = vst.msk [vmem:[%s9167_s18 + $0x100] sm:$0xff] %vm4829_vm2, %v5219_v56  ;;  %v4530_v21 = vpop.permute.xlu1 %4529  ;;  %v5057_v4 = vsel %vm903_vm0, %v8845_v14, %v4951_v17 }
 0x80d   : > { %v4749_v39 = vpop.f32.mrf.mxu2  ;;  %v4626_v25 = vsel %vm939_vm4, %v4594_v28, %v4530_v21 }
 0x80e   : > { %v4750_v33 = vadd.f32 %v9176_v51, %v4749_v39 }
 0x810   : > { %4830 = vst.msk [vmem:[%s9167_s18] sm:$0xff] %vm4829_vm2, %v4750_v33 }
 0x811   : > { %5335 = vrot.lane.b32.xlu0 %v8551_v36, %s7014_s26  ;;  %v5220_v62 = vpop.f32.mrf.mxu3  ;;  %5506 = vrot.lane.b32.xlu2 %v8551_v36, %s7008_s21 }
 0x812   : > { %v5221_v23 = vadd.f32 %v9162_v47, %v5220_v62  ;;  %5508 = vrot.lane.b32.xlu1 %v8544_v11, %s7014_s26  ;;  %v5391_v59 = vpop.f32.mrf.mxu0  ;;  %v5095_v11 = vsel %vm939_vm4, %v5057_v4, %v4983_v0 }
 0x813   : > { %v5392_v14 = vadd.f32 %v9183_v49, %v5391_v59  ;;  %v5565_v40 = vpop.f32.mrf.mxu1  ;;  %v4562_v58 = vpop.permute.xlu0 %4561 }
 0x814   : > { %6428 = vst.msk [vmem:[%s9167_s18 + $0x108] sm:$0xff] %vm4829_vm2, %v5221_v23  ;;  %v5566_v36 = vadd.f32 %v9187_v7, %v5565_v40  ;;  %v5015_v2 = vpop.permute.xlu1 %5014  ;;  %v9209_v15 = vpop.permute.xlu2 %4485  ;;  %v4659_v10 = vsel %vm4639_vm11, %v4626_v25, %v4562_v58 }
 0x815   : > { %6499 = vst.msk [vmem:[%s9167_s18 + $0x200] sm:$0xff] %vm4829_vm2, %v5392_v14  ;;  %v5127_v38 = vsel %vm4639_vm11, %v5095_v11, %v5015_v2  ;;  %v4751_v60 = vpop.f32.mrf.mxu2  ;;  %6491 = vmatmul.msk.bf16.gmra.mxu0 %vm1397_vm9, %v4659_v10  ;;  %v4598_v11 = vsel %vm903_vm0, %v8904_v55, %v9209_v15 }
 0x816   : > { %6571 = vst.msk [vmem:[%s9167_s18 + $0x300] sm:$0xff] %vm4829_vm2, %v5566_v36  ;;  %v4752_v32 = vadd.f32 %v9176_v51, %v4751_v60  ;;  %6420 = vmatmul.msk.bf16.gmra.mxu3 %vm1397_vm9, %v5127_v38  ;;  %6563 = vmatmul.msk.bf16.gmra.mxu1 %vm1397_vm9, %v5127_v38 }
 0x818   : > { %4831 = vst.msk [vmem:[%s9167_s18 + $0x8] sm:$0xff] %vm4829_vm2, %v4752_v32 }
 0x819   : > { %v5223_v29 = vpop.f32.mrf.mxu3 }
 0x81a   : > { %6380 = vmatmul.msk.bf16.gmra.mxu2 %vm1397_vm9, %v4659_v10  ;;  %v5224_v9 = vadd.f32 %v9162_v47, %v5223_v29  ;;  %v5393_v18 = vpop.f32.mrf.mxu0 }
 0x81b   : > { %v5394_v52 = vadd.f32 %v9183_v49, %v5393_v18  ;;  %v5567_v34 = vpop.f32.mrf.mxu1  ;;  %v4953_v54 = vpop.permute.xlu0 %4952 }
 0x81c   : > { %6429 = vst.msk [vmem:[%s9167_s18 + $0x110] sm:$0xff] %vm4829_vm2, %v5224_v9  ;;  %v5568_v0 = vadd.f32 %v9187_v7, %v5567_v34  ;;  %v4532_v27 = vpop.permute.xlu1 %4531  ;;  %v4987_v61 = vpop.permute.xlu2 %4986  ;;  %v5060_v37 = vsel %vm903_vm0, %v8891_v63, %v4953_v54 }
 0x81d   : > { %6500 = vst.msk [vmem:[%s9167_s18 + $0x208] sm:$0xff] %vm4829_vm2, %v5394_v52  ;;  %v4754_v30 = vpop.f32.mrf.mxu2  ;;  %v4628_v13 = vsel %vm939_vm4, %v4596_v1, %v4532_v27  ;;  %v5097_v31 = vsel %vm939_vm4, %v5060_v37, %v9178_v12 }
 0x81e   : > { %6572 = vst.msk [vmem:[%s9167_s18 + $0x308] sm:$0xff] %vm4829_vm2, %v5568_v0  ;;  %v4755_v20 = vadd.f32 %v9176_v51, %v4754_v30 }
 0x820   : > { %4832 = vst.msk [vmem:[%s9167_s18 + $0x10] sm:$0xff] %vm4829_vm2, %v4755_v20 }
 0x821   : > { %v5225_v48 = vpop.f32.mrf.mxu3 }
 0x822   : > { %v5226_v6 = vadd.f32 %v9162_v47, %v5225_v48  ;;  %v5396_v24 = vpop.f32.mrf.mxu0 }
 0x823   : > { %v5397_v42 = vadd.f32 %v9183_v49, %v5396_v24  ;;  %v5570_v45 = vpop.f32.mrf.mxu1  ;;  %v4564_v63 = vpop.permute.xlu0 %4563 }
 0x824   : > { %6430 = vst.msk [vmem:[%s9167_s18 + $0x118] sm:$0xff] %vm4829_vm2, %v5226_v6  ;;  %v5571_v26 = vadd.f32 %v9187_v7, %v5570_v45  ;;  %v5017_v8 = vpop.permute.xlu1 %5016  ;;  %v4661_v56 = vsel %vm4639_vm11, %v4628_v13, %v4564_v63  ;;  %v4488_v12 = vpop.permute.xlu2 %4487 }
 0x825   : > { %6501 = vst.msk [vmem:[%s9167_s18 + $0x210] sm:$0xff] %vm4829_vm2, %v5397_v42  ;;  %v5129_v53 = vsel %vm4639_vm11, %v5097_v31, %v5017_v8  ;;  %v4756_v46 = vpop.f32.mrf.mxu2  ;;  %6492 = vmatmul.msk.bf16.gmra.mxu0 %vm1397_vm9, %v4661_v56  ;;  %v4600_v63 = vsel %vm903_vm0, %v8947_v22, %v4488_v12 }
 0x826   : > { %6573 = vst.msk [vmem:[%s9167_s18 + $0x310] sm:$0xff] %vm4829_vm2, %v5571_v26  ;;  %v4757_v17 = vadd.f32 %v9176_v51, %v4756_v46  ;;  %6421 = vmatmul.msk.bf16.gmra.mxu3 %vm1397_vm9, %v5129_v53  ;;  %6564 = vmatmul.msk.bf16.gmra.mxu1 %vm1397_vm9, %v5129_v53 }
 0x828   : > { %4833 = vst.msk [vmem:[%s9167_s18 + $0x18] sm:$0xff] %vm4829_vm2, %v4757_v17 }
 0x829   : > { %v5228_v21 = vpop.f32.mrf.mxu3 }
 0x82a   : > { %6381 = vmatmul.msk.bf16.gmra.mxu2 %vm1397_vm9, %v4661_v56  ;;  %v5229_v39 = vadd.f32 %v9162_v47, %v5228_v21  ;;  %v5398_v33 = vpop.f32.mrf.mxu0 }
 0x82b   : > { %v5399_v4 = vadd.f32 %v9183_v49, %v5398_v33  ;;  %v5572_v62 = vpop.f32.mrf.mxu1  ;;  %v4955_v59 = vpop.permute.xlu0 %4954 }
 0x82c   : > { %6431 = vst.msk [vmem:[%s9167_s18 + $0x120] sm:$0xff] %vm4829_vm2, %v5229_v39  ;;  %v5573_v23 = vadd.f32 %v9187_v7, %v5572_v62  ;;  %v4534_v28 = vpop.permute.xlu1 %4533  ;;  %v5063_v25 = vsel %vm903_vm0, %v8936_v19, %v4955_v59  ;;  %v4989_v10 = vpop.permute.xlu2 %4988 }
 0x82d   : > { %6502 = vst.msk [vmem:[%s9167_s18 + $0x218] sm:$0xff] %vm4829_vm2, %v5399_v4  ;;  %v4759_v14 = vpop.f32.mrf.mxu2  ;;  %v4630_v32 = vsel %vm939_vm4, %v4598_v11, %v4534_v28  ;;  %v5099_v18 = vsel %vm939_vm4, %v5063_v25, %v4987_v61 }
 0x82e   : > { %6574 = vst.msk [vmem:[%s9167_s18 + $0x318] sm:$0xff] %vm4829_vm2, %v5573_v23  ;;  %v4760_v40 = vadd.f32 %v9176_v51, %v4759_v14 }
 0x830   : > { %4834 = vst.msk [vmem:[%s9167_s18 + $0x20] sm:$0xff] %vm4829_vm2, %v4760_v40 }
 0x831   : > { %v5230_v36 = vpop.f32.mrf.mxu3 }
 0x832   : > { %v5231_v58 = vadd.f32 %v9162_v47, %v5230_v36  ;;  %v5401_v2 = vpop.f32.mrf.mxu0 }
 0x833   : > { %v5402_v38 = vadd.f32 %v9183_v49, %v5401_v2  ;;  %v5575_v60 = vpop.f32.mrf.mxu1  ;;  %v4566_v29 = vpop.permute.xlu0 %4565 }
 0x834   : > { %6432 = vst.msk [vmem:[%s9167_s18 + $0x128] sm:$0xff] %vm4829_vm2, %v5231_v58  ;;  %v5576_v19 = vadd.f32 %v9187_v7, %v5575_v60  ;;  %v5019_v9 = vpop.permute.xlu1 %5018  ;;  %v4663_v55 = vsel %vm4639_vm11, %v4630_v32, %v4566_v29  ;;  %v4490_v6 = vpop.permute.xlu2 %4489 }
 0x835   : > { %6503 = vst.msk [vmem:[%s9167_s18 + $0x220] sm:$0xff] %vm4829_vm2, %v5402_v38  ;;  %v5131_v15 = vsel %vm4639_vm11, %v5099_v18, %v5019_v9  ;;  %v4761_v52 = vpop.f32.mrf.mxu2  ;;  %6493 = vmatmul.msk.bf16.gmra.mxu0 %vm1397_vm9, %v4663_v55  ;;  %v4602_v32 = vsel %vm903_vm0, %v8990_v5, %v4490_v6 }
 0x836   : > { %6575 = vst.msk [vmem:[%s9167_s18 + $0x320] sm:$0xff] %vm4829_vm2, %v5576_v19  ;;  %v4762_v34 = vadd.f32 %v9176_v51, %v4761_v52  ;;  %6422 = vmatmul.msk.bf16.gmra.mxu3 %vm1397_vm9, %v5131_v15  ;;  %6565 = vmatmul.msk.bf16.gmra.mxu1 %vm1397_vm9, %v5131_v15 }
 0x838   : > { %4835 = vst.msk [vmem:[%s9167_s18 + $0x28] sm:$0xff] %vm4829_vm2, %v4762_v34 }
 0x839   : > { %v5233_v0 = vpop.f32.mrf.mxu3 }
 0x83a   : > { %6382 = vmatmul.msk.bf16.gmra.mxu2 %vm1397_vm9, %v4663_v55  ;;  %v5234_v54 = vadd.f32 %v9162_v47, %v5233_v0  ;;  %v5403_v27 = vpop.f32.mrf.mxu0 }
 0x83b   : > { %v5404_v30 = vadd.f32 %v9183_v49, %v5403_v27  ;;  %v5577_v20 = vpop.f32.mrf.mxu1  ;;  %v4957_v37 = vpop.permute.xlu0 %4956 }
 0x83c   : > { %6433 = vst.msk [vmem:[%s9167_s18 + $0x130] sm:$0xff] %vm4829_vm2, %v5234_v54  ;;  %v5578_v61 = vadd.f32 %v9187_v7, %v5577_v20  ;;  %v4536_v48 = vpop.permute.xlu1 %4535  ;;  %v5066_v42 = vsel %vm903_vm0, %v8979_v41, %v4957_v37  ;;  %v4991_v33 = vpop.permute.xlu2 %4990 }
 0x83d   : > { %6504 = vst.msk [vmem:[%s9167_s18 + $0x228] sm:$0xff] %vm4829_vm2, %v5404_v30  ;;  %v4764_v24 = vpop.f32.mrf.mxu2  ;;  %v4632_v56 = vsel %vm939_vm4, %v4600_v63, %v4536_v48  ;;  %v5101_v17 = vsel %vm939_vm4, %v5066_v42, %v4989_v10 }
 0x83e   : > { %6576 = vst.msk [vmem:[%s9167_s18 + $0x328] sm:$0xff] %vm4829_vm2, %v5578_v61  ;;  %v4765_v1 = vadd.f32 %v9176_v51, %v4764_v24 }
 0x840   : > { %4836 = vst.msk [vmem:[%s9167_s18 + $0x30] sm:$0xff] %vm4829_vm2, %v4765_v1 }
 0x841   : > { %v5235_v45 = vpop.f32.mrf.mxu3 }
 0x842   : > { %v5236_v13 = vadd.f32 %v9162_v47, %v5235_v45  ;;  %v5406_v26 = vpop.f32.mrf.mxu0 }
 0x843   : > { %v5407_v8 = vadd.f32 %v9183_v49, %v5406_v26  ;;  %v5580_v31 = vpop.f32.mrf.mxu1  ;;  %v4568_v46 = vpop.permute.xlu0 %4567 }
 0x844   : > { %6434 = vst.msk [vmem:[%s9167_s18 + $0x138] sm:$0xff] %vm4829_vm2, %v5236_v13  ;;  %v5581_v53 = vadd.f32 %v9187_v7, %v5580_v31  ;;  %v5021_v41 = vpop.permute.xlu1 %5020  ;;  %v4665_v21 = vsel %vm4639_vm11, %v4632_v56, %v4568_v46  ;;  %v4492_v2 = vpop.permute.xlu2 %4491 }
 0x845   : > { %6505 = vst.msk [vmem:[%s9167_s18 + $0x230] sm:$0xff] %vm4829_vm2, %v5407_v8  ;;  %v5133_v22 = vsel %vm4639_vm11, %v5101_v17, %v5021_v41  ;;  %v4766_v12 = vpop.f32.mrf.mxu2  ;;  %6494 = vmatmul.msk.bf16.gmra.mxu0 %vm1397_vm9, %v4665_v21  ;;  %v4604_v8 = vsel %vm903_vm0, %v9031_v50, %v4492_v2 }
 0x846   : > { %6577 = vst.msk [vmem:[%s9167_s18 + $0x330] sm:$0xff] %vm4829_vm2, %v5581_v53  ;;  %v4767_v39 = vadd.f32 %v9176_v51, %v4766_v12  ;;  %6423 = vmatmul.msk.bf16.gmra.mxu3 %vm1397_vm9, %v5133_v22  ;;  %6566 = vmatmul.msk.bf16.gmra.mxu1 %vm1397_vm9, %v5133_v22 }
 0x848   : > { %4837 = vst.msk [vmem:[%s9167_s18 + $0x38] sm:$0xff] %vm4829_vm2, %v4767_v39 }
 0x849   : > { %v5238_v4 = vpop.f32.mrf.mxu3 }
 0x84a   : > { %6383 = vmatmul.msk.bf16.gmra.mxu2 %vm1397_vm9, %v4665_v21  ;;  %v5239_v62 = vadd.f32 %v9162_v47, %v5238_v4  ;;  %v5408_v23 = vpop.f32.mrf.mxu0 }
 0x84b   : > { %v5409_v59 = vadd.f32 %v9183_v49, %v5408_v23  ;;  %v5582_v28 = vpop.f32.mrf.mxu1  ;;  %v4959_v40 = vpop.permute.xlu0 %4958 }
 0x84c   : > { %6435 = vst.msk [vmem:[%s9167_s18 + $0x140] sm:$0xff] %vm4829_vm2, %v5239_v62  ;;  %v5583_v14 = vadd.f32 %v9187_v7, %v5582_v28  ;;  %v4538_v25 = vpop.permute.xlu1 %4537  ;;  %v5069_v11 = vsel %vm903_vm0, %v9020_v16, %v4959_v40  ;;  %v4993_v20 = vpop.permute.xlu2 %4992 }
 0x84d   : > { %6506 = vst.msk [vmem:[%s9167_s18 + $0x238] sm:$0xff] %vm4829_vm2, %v5409_v59  ;;  %v4769_v36 = vpop.f32.mrf.mxu2  ;;  %v4634_v9 = vsel %vm939_vm4, %v4602_v32, %v4538_v25  ;;  %v5103_v15 = vsel %vm939_vm4, %v5069_v11, %v4991_v33 }
 0x84e   : > { %6578 = vst.msk [vmem:[%s9167_s18 + $0x338] sm:$0xff] %vm4829_vm2, %v5583_v14  ;;  %v4770_v58 = vadd.f32 %v9176_v51, %v4769_v36 }
 0x850   : > { %4838 = vst.msk [vmem:[%s9167_s18 + $0x40] sm:$0xff] %vm4829_vm2, %v4770_v58 }
 0x851   : > { %v5240_v10 = vpop.f32.mrf.mxu3 }
 0x852   : > { %v5241_v38 = vadd.f32 %v9162_v47, %v5240_v10  ;;  %v5411_v60 = vpop.f32.mrf.mxu0 }
 0x853   : > { %v5412_v19 = vadd.f32 %v9183_v49, %v5411_v60  ;;  %v5585_v29 = vpop.f32.mrf.mxu1  ;;  %v4570_v55 = vpop.permute.xlu0 %4569 }
 0x854   : > { %6436 = vst.msk [vmem:[%s9167_s18 + $0x148] sm:$0xff] %vm4829_vm2, %v5241_v38  ;;  %v5586_v18 = vadd.f32 %v9187_v7, %v5585_v29  ;;  %v5023_v16 = vpop.permute.xlu1 %5022  ;;  %v4667_v52 = vsel %vm4639_vm11, %v4634_v9, %v4570_v55  ;;  %v4494_v21 = vpop.permute.xlu2 %4493 }
 0x855   : > { %6507 = vst.msk [vmem:[%s9167_s18 + $0x240] sm:$0xff] %vm4829_vm2, %v5412_v19  ;;  %v5135_v5 = vsel %vm4639_vm11, %v5103_v15, %v5023_v16  ;;  %v4771_v34 = vpop.f32.mrf.mxu2  ;;  %6495 = vmatmul.msk.bf16.gmra.mxu0 %vm1397_vm9, %v4667_v52  ;;  %v4606_v60 = vsel %vm903_vm0, %v9072_v43, %v4494_v21 }
 0x856   : > { %6579 = vst.msk [vmem:[%s9167_s18 + $0x340] sm:$0xff] %vm4829_vm2, %v5586_v18  ;;  %v4772_v0 = vadd.f32 %v9176_v51, %v4771_v34  ;;  %6424 = vmatmul.msk.bf16.gmra.mxu3 %vm1397_vm9, %v5135_v5  ;;  %6567 = vmatmul.msk.bf16.gmra.mxu1 %vm1397_vm9, %v5135_v5 }
 0x858   : > { %4839 = vst.msk [vmem:[%s9167_s18 + $0x48] sm:$0xff] %vm4829_vm2, %v4772_v0 }
 0x859   : > { %v5243_v54 = vpop.f32.mrf.mxu3 }
 0x85a   : > { %6384 = vmatmul.msk.bf16.gmra.mxu2 %vm1397_vm9, %v4667_v52  ;;  %v5244_v27 = vadd.f32 %v9162_v47, %v5243_v54  ;;  %v5413_v30 = vpop.f32.mrf.mxu0 }
 0x85b   : > { %v5414_v61 = vadd.f32 %v9183_v49, %v5413_v30  ;;  %v5587_v37 = vpop.f32.mrf.mxu1  ;;  %v4961_v6 = vpop.permute.xlu0 %4960 }
 0x85c   : > { %6437 = vst.msk [vmem:[%s9167_s18 + $0x150] sm:$0xff] %vm4829_vm2, %v5244_v27  ;;  %v5588_v48 = vadd.f32 %v9187_v7, %v5587_v37  ;;  %v4540_v24 = vpop.permute.xlu1 %4539  ;;  %v5072_v45 = vsel %vm903_vm0, %v9061_v35, %v4961_v6  ;;  %v4995_v58 = vpop.permute.xlu2 %4994 }
 0x85d   : > { %6508 = vst.msk [vmem:[%s9167_s18 + $0x248] sm:$0xff] %vm4829_vm2, %v5414_v61  ;;  %v4774_v1 = vpop.f32.mrf.mxu2  ;;  %v4636_v53 = vsel %vm939_vm4, %v4604_v8, %v4540_v24  ;;  %v5105_v17 = vsel %vm939_vm4, %v5072_v45, %v4993_v20 }
 0x85e   : > { %6580 = vst.msk [vmem:[%s9167_s18 + $0x348] sm:$0xff] %vm4829_vm2, %v5588_v48  ;;  %v4775_v42 = vadd.f32 %v9176_v51, %v4774_v1 }
 0x860   : > { %4840 = vst.msk [vmem:[%s9167_s18 + $0x50] sm:$0xff] %vm4829_vm2, %v4775_v42 }
 0x861   : > { %v5245_v13 = vpop.f32.mrf.mxu3 }
 0x862   : > { %v5246_v26 = vadd.f32 %v9162_v47, %v5245_v13  ;;  %v5416_v63 = vpop.f32.mrf.mxu0 }
 0x863   : > { %v5417_v31 = vadd.f32 %v9183_v49, %v5416_v63  ;;  %v5590_v56 = vpop.f32.mrf.mxu1  ;;  %v4572_v41 = vpop.permute.xlu0 %4571 }
 0x864   : > { %6438 = vst.msk [vmem:[%s9167_s18 + $0x158] sm:$0xff] %vm4829_vm2, %v5246_v26  ;;  %v5591_v46 = vadd.f32 %v9187_v7, %v5590_v56  ;;  %v5025_v35 = vpop.permute.xlu1 %5024  ;;  %v4669_v50 = vsel %vm4639_vm11, %v4636_v53, %v4572_v41  ;;  %v5332_v5 = vpop.permute.xlu2 %5331 }
 0x865   : > { %6509 = vst.msk [vmem:[%s9167_s18 + $0x250] sm:$0xff] %vm4829_vm2, %v5417_v31  ;;  %v5137_v22 = vsel %vm4639_vm11, %v5105_v17, %v5025_v35  ;;  %v4776_v12 = vpop.f32.mrf.mxu2  ;;  %6496 = vmatmul.msk.bf16.gmra.mxu0 %vm1397_vm9, %v4669_v50  ;;  %v5338_v26 = vsel %vm903_vm0, %v9111_v57, %v5332_v5 }
 0x866   : > { %6581 = vst.msk [vmem:[%s9167_s18 + $0x350] sm:$0xff] %vm4829_vm2, %v5591_v46  ;;  %v4777_v39 = vadd.f32 %v9176_v51, %v4776_v12  ;;  %6425 = vmatmul.msk.bf16.gmra.mxu3 %vm1397_vm9, %v5137_v22  ;;  %6568 = vmatmul.msk.bf16.gmra.mxu1 %vm1397_vm9, %v5137_v22 }
 0x868   : > { %4841 = vst.msk [vmem:[%s9167_s18 + $0x58] sm:$0xff] %vm4829_vm2, %v4777_v39 }
 0x869   : > { %v5248_v33 = vpop.f32.mrf.mxu3 }
 0x86a   : > { %6385 = vmatmul.msk.bf16.gmra.mxu2 %vm1397_vm9, %v4669_v50  ;;  %v5249_v4 = vadd.f32 %v9162_v47, %v5248_v33  ;;  %v5418_v62 = vpop.f32.mrf.mxu0 }
 0x86b   : > { %v5419_v23 = vadd.f32 %v9183_v49, %v5418_v62  ;;  %v5592_v59 = vpop.f32.mrf.mxu1  ;;  %v4963_v14 = vpop.permute.xlu0 %4962 }
 0x86c   : > { %6439 = vst.msk [vmem:[%s9167_s18 + $0x160] sm:$0xff] %vm4829_vm2, %v5249_v4  ;;  %v5593_v28 = vadd.f32 %v9187_v7, %v5592_v59  ;;  %v4542_v40 = vpop.permute.xlu1 %4541  ;;  %v5075_v2 = vsel %vm903_vm0, %v9100_v44, %v4963_v14  ;;  %v5507_v1 = vpop.permute.xlu2 %5506 }
 0x86d   : > { %6510 = vst.msk [vmem:[%s9167_s18 + $0x258] sm:$0xff] %vm4829_vm2, %v5419_v23  ;;  %v4779_v25 = vpop.f32.mrf.mxu2  ;;  %v4638_v29 = vsel %vm939_vm4, %v4606_v60, %v4542_v40  ;;  %v5107_v55 = vsel %vm939_vm4, %v5075_v2, %v4995_v58 }
 0x86e   : > { %6582 = vst.msk [vmem:[%s9167_s18 + $0x358] sm:$0xff] %vm4829_vm2, %v5593_v28  ;;  %v4780_v36 = vadd.f32 %v9176_v51, %v4779_v25 }
 0x870   : > { %4842 = vst.msk [vmem:[%s9167_s18 + $0x60] sm:$0xff] %vm4829_vm2, %v4780_v36 }
 0x871   : > { %v5250_v11 = vpop.f32.mrf.mxu3 }
 0x872   : > { %v5251_v10 = vadd.f32 %v9162_v47, %v5250_v11  ;;  %v5421_v38 = vpop.f32.mrf.mxu0 }
 0x873   : > { %v5422_v32 = vadd.f32 %v9183_v49, %v5421_v38  ;;  %v5595_v19 = vpop.f32.mrf.mxu1  ;;  %v4574_v18 = vpop.permute.xlu0 %4573 }
 0x874   : > { %6440 = vst.msk [vmem:[%s9167_s18 + $0x168] sm:$0xff] %vm4829_vm2, %v5251_v10  ;;  %v5596_v9 = vadd.f32 %v9187_v7, %v5595_v19  ;;  %v5027_v44 = vpop.permute.xlu1 %5026  ;;  %v4671_v16 = vsel %vm4639_vm11, %v4638_v29, %v4574_v18 }
 0x875   : > { %6511 = vst.msk [vmem:[%s9167_s18 + $0x260] sm:$0xff] %vm4829_vm2, %v5422_v32  ;;  %v5139_v43 = vsel %vm4639_vm11, %v5107_v55, %v5027_v44  ;;  %v4781_v15 = vpop.f32.mrf.mxu2  ;;  %6497 = vmatmul.msk.bf16.gmra.mxu0 %vm1397_vm9, %v4671_v16 }
 0x876   : > { %6583 = vst.msk [vmem:[%s9167_s18 + $0x360] sm:$0xff] %vm4829_vm2, %v5596_v9  ;;  %v4782_v52 = vadd.f32 %v9176_v51, %v4781_v15  ;;  %6426 = vmatmul.msk.bf16.gmra.mxu3 %vm1397_vm9, %v5139_v43  ;;  %6569 = vmatmul.msk.bf16.gmra.mxu1 %vm1397_vm9, %v5139_v43 }
 0x878   : > { %4843 = vst.msk [vmem:[%s9167_s18 + $0x68] sm:$0xff] %vm4829_vm2, %v4782_v52 }
 0x879   : > { %v5253_v34 = vpop.f32.mrf.mxu3 }
 0x87a   : > { %6386 = vmatmul.msk.bf16.gmra.mxu2 %vm1397_vm9, %v4671_v16  ;;  %v5254_v0 = vadd.f32 %v9162_v47, %v5253_v34  ;;  %v5423_v54 = vpop.f32.mrf.mxu0 }
 0x87b   : > { %v5424_v27 = vadd.f32 %v9183_v49, %v5423_v54  ;;  %v5597_v30 = vpop.f32.mrf.mxu1  ;;  %v5505_v61 = vpop.permute.xlu0 %5504 }
 0x87c   : > { %6441 = vst.msk [vmem:[%s9167_s18 + $0x170] sm:$0xff] %vm4829_vm2, %v5254_v0  ;;  %v5598_v20 = vadd.f32 %v9187_v7, %v5597_v30  ;;  %v5334_v37 = vpop.permute.xlu1 %5333  ;;  %v5512_v24 = vsel %vm903_vm0, %v9139_v3, %v5505_v61 }
 0x87d   : > { %6512 = vst.msk [vmem:[%s9167_s18 + $0x268] sm:$0xff] %vm4829_vm2, %v5424_v27  ;;  %v4784_v48 = vpop.f32.mrf.mxu2  ;;  %v5340_v31 = vsel %vm939_vm4, %v5338_v26, %v5334_v37  ;;  %v5514_v56 = vsel %vm939_vm4, %v5512_v24, %v5507_v1 }
 0x87e   : > { %6584 = vst.msk [vmem:[%s9167_s18 + $0x368] sm:$0xff] %vm4829_vm2, %v5598_v20  ;;  %v4785_v6 = vadd.f32 %v9176_v51, %v4784_v48 }
 0x880   : > { %4844 = vst.msk [vmem:[%s9167_s18 + $0x70] sm:$0xff] %vm4829_vm2, %v4785_v6 }
 0x881   : > { %v5255_v42 = vpop.f32.mrf.mxu3 }
 0x882   : > { %v5256_v45 = vadd.f32 %v9162_v47, %v5255_v42  ;;  %v5426_v13 = vpop.f32.mrf.mxu0 }
 0x883   : > { %v5427_v63 = vadd.f32 %v9183_v49, %v5426_v13  ;;  %v5600_v8 = vpop.f32.mrf.mxu1  ;;  %v5336_v53 = vpop.permute.xlu0 %5335 }
 0x884   : > { %6442 = vst.msk [vmem:[%s9167_s18 + $0x178] sm:$0xff] %vm4829_vm2, %v5256_v45  ;;  %v5601_v3 = vadd.f32 %v9187_v7, %v5600_v8  ;;  %v5509_v46 = vpop.permute.xlu1 %5508  ;;  %v5342_v57 = vsel %vm4639_vm11, %v5340_v31, %v5336_v53 }
 0x885   : > { %6513 = vst.msk [vmem:[%s9167_s18 + $0x270] sm:$0xff] %vm4829_vm2, %v5427_v63  ;;  %v5516_v41 = vsel %vm4639_vm11, %v5514_v56, %v5509_v46  ;;  %v4786_v35 = vpop.f32.mrf.mxu2  ;;  %6498 = vmatmul.msk.bf16.gmra.mxu0 %vm1397_vm9, %v5342_v57 }
 0x886   : > { %6585 = vst.msk [vmem:[%s9167_s18 + $0x370] sm:$0xff] %vm4829_vm2, %v5601_v3  ;;  %v4787_v17 = vadd.f32 %v9176_v51, %v4786_v35  ;;  %6570 = vmatmul.msk.bf16.gmra.mxu1 %vm1397_vm9, %v5516_v41 }
 0x888   : > { %4845 = vst.msk [vmem:[%s9167_s18 + $0x78] sm:$0xff] %vm4829_vm2, %v4787_v17 }
 0x889   : > { %v5258_v21 = vpop.f32.mrf.mxu3 }
 0x88a   : > { %v5259_v50 = vadd.f32 %v9162_v47, %v5258_v21  ;;  %v5428_v22 = vpop.f32.mrf.mxu0 }
 0x88b   : > { %v5429_v12 = vadd.f32 %v9183_v49, %v5428_v22  ;;  %v5602_v39 = vpop.f32.mrf.mxu1 }
 0x88c   : > { %6443 = vst.msk [vmem:[%s9167_s18 + $0x180] sm:$0xff] %vm4829_vm2, %v5259_v50  ;;  %v5603_v33 = vadd.f32 %v9187_v7, %v5602_v39 }
 0x88d   : > { %6514 = vst.msk [vmem:[%s9167_s18 + $0x278] sm:$0xff] %vm4829_vm2, %v5429_v12  ;;  %v4789_v4 = vpop.f32.mrf.mxu2 }
 0x88e   : > { %6586 = vst.msk [vmem:[%s9167_s18 + $0x378] sm:$0xff] %vm4829_vm2, %v5603_v33  ;;  %v4790_v62 = vadd.f32 %v9176_v51, %v4789_v4 }
 0x890   : > { %4846 = vst.msk [vmem:[%s9167_s18 + $0x80] sm:$0xff] %vm4829_vm2, %v4790_v62 }
 0x891   : > { %v5260_v23 = vpop.f32.mrf.mxu3 }
 0x892   : > { %v5261_v59 = vadd.f32 %v9162_v47, %v5260_v23  ;;  %v5431_v28 = vpop.f32.mrf.mxu0 }
 0x893   : > { %v5432_v14 = vadd.f32 %v9183_v49, %v5431_v28  ;;  %v5605_v40 = vpop.f32.mrf.mxu1 }
 0x894   : > { %6444 = vst.msk [vmem:[%s9167_s18 + $0x188] sm:$0xff] %vm4829_vm2, %v5261_v59  ;;  %v5606_v25 = vadd.f32 %v9187_v7, %v5605_v40 }
 0x895   : > { %v4791_v36 = vpop.f32.mrf.mxu2  ;;  %6515 = vst.msk [vmem:[%s9167_s18 + $0x280] sm:$0xff] %vm4829_vm2, %v5432_v14 }
 0x896   : > { %v4792_v58 = vadd.f32 %v9176_v51, %v4791_v36  ;;  %6587 = vst.msk [vmem:[%s9167_s18 + $0x380] sm:$0xff] %vm4829_vm2, %v5606_v25 }
 0x898   : > { %4847 = vst.msk [vmem:[%s9167_s18 + $0x88] sm:$0xff] %vm4829_vm2, %v4792_v58 }
 0x899   : > { %v5263_v2 = vpop.f32.mrf.mxu3 }
 0x89a   : > { %v5264_v11 = vadd.f32 %v9162_v47, %v5263_v2  ;;  %v5433_v10 = vpop.f32.mrf.mxu0 }
 0x89b   : > { %v5434_v38 = vadd.f32 %v9183_v49, %v5433_v10  ;;  %v5607_v60 = vpop.f32.mrf.mxu1 }
 0x89c   : > { %6445 = vst.msk [vmem:[%s9167_s18 + $0x190] sm:$0xff] %vm4829_vm2, %v5264_v11  ;;  %v5608_v32 = vadd.f32 %v9187_v7, %v5607_v60 }
 0x89d   : > { %v4794_v19 = vpop.f32.mrf.mxu2  ;;  %6516 = vst.msk [vmem:[%s9167_s18 + $0x288] sm:$0xff] %vm4829_vm2, %v5434_v38 }
 0x89e   : > { %v4795_v29 = vadd.f32 %v9176_v51, %v4794_v19  ;;  %6588 = vst.msk [vmem:[%s9167_s18 + $0x388] sm:$0xff] %vm4829_vm2, %v5608_v32 }
 0x8a0   : > { %4848 = vst.msk [vmem:[%s9167_s18 + $0x90] sm:$0xff] %vm4829_vm2, %v4795_v29 }
 0x8a1   : > { %v5265_v9 = vpop.f32.mrf.mxu3 }
 0x8a2   : > { %v5266_v18 = vadd.f32 %v9162_v47, %v5265_v9  ;;  %v5436_v44 = vpop.f32.mrf.mxu0 }
 0x8a3   : > { %v5437_v55 = vadd.f32 %v9183_v49, %v5436_v44  ;;  %v5610_v16 = vpop.f32.mrf.mxu1 }
 0x8a4   : > { %6446 = vst.msk [vmem:[%s9167_s18 + $0x198] sm:$0xff] %vm4829_vm2, %v5266_v18  ;;  %v5611_v43 = vadd.f32 %v9187_v7, %v5610_v16 }
 0x8a5   : > { %v4796_v15 = vpop.f32.mrf.mxu2  ;;  %6517 = vst.msk [vmem:[%s9167_s18 + $0x290] sm:$0xff] %vm4829_vm2, %v5437_v55 }
 0x8a6   : > { %v4797_v52 = vadd.f32 %v9176_v51, %v4796_v15  ;;  %6589 = vst.msk [vmem:[%s9167_s18 + $0x390] sm:$0xff] %vm4829_vm2, %v5611_v43 }
 0x8a8   : > { %4849 = vst.msk [vmem:[%s9167_s18 + $0x98] sm:$0xff] %vm4829_vm2, %v4797_v52 }
 0x8a9   : > { %v5268_v5 = vpop.f32.mrf.mxu3 }
 0x8aa   : > { %v5269_v34 = vadd.f32 %v9162_v47, %v5268_v5  ;;  %v5438_v0 = vpop.f32.mrf.mxu0 }
 0x8ab   : > { %v5439_v54 = vadd.f32 %v9183_v49, %v5438_v0  ;;  %v5612_v27 = vpop.f32.mrf.mxu1 }
 0x8ac   : > { %6447 = vst.msk [vmem:[%s9167_s18 + $0x1a0] sm:$0xff] %vm4829_vm2, %v5269_v34  ;;  %v5613_v30 = vadd.f32 %v9187_v7, %v5612_v27 }
 0x8ad   : > { %v4799_v20 = vpop.f32.mrf.mxu2  ;;  %6518 = vst.msk [vmem:[%s9167_s18 + $0x298] sm:$0xff] %vm4829_vm2, %v5439_v54 }
 0x8ae   : > { %v4800_v61 = vadd.f32 %v9176_v51, %v4799_v20  ;;  %6590 = vst.msk [vmem:[%s9167_s18 + $0x398] sm:$0xff] %vm4829_vm2, %v5613_v30 }
 0x8b0   : > { %4850 = vst.msk [vmem:[%s9167_s18 + $0xa0] sm:$0xff] %vm4829_vm2, %v4800_v61 }
 0x8b1   : > { %v5270_v37 = vpop.f32.mrf.mxu3 }
 0x8b2   : > { %v5271_v48 = vadd.f32 %v9162_v47, %v5270_v37  ;;  %v5441_v6 = vpop.f32.mrf.mxu0 }
 0x8b3   : > { %v5442_v24 = vadd.f32 %v9183_v49, %v5441_v6  ;;  %v5615_v1 = vpop.f32.mrf.mxu1 }
 0x8b4   : > { %6448 = vst.msk [vmem:[%s9167_s18 + $0x1a8] sm:$0xff] %vm4829_vm2, %v5271_v48  ;;  %v5616_v42 = vadd.f32 %v9187_v7, %v5615_v1 }
 0x8b5   : > { %v4801_v45 = vpop.f32.mrf.mxu2  ;;  %6519 = vst.msk [vmem:[%s9167_s18 + $0x2a0] sm:$0xff] %vm4829_vm2, %v5442_v24 }
 0x8b6   : > { %v4802_v13 = vadd.f32 %v9176_v51, %v4801_v45  ;;  %6591 = vst.msk [vmem:[%s9167_s18 + $0x3a0] sm:$0xff] %vm4829_vm2, %v5616_v42 }
 0x8b8   : > { %4851 = vst.msk [vmem:[%s9167_s18 + $0xa8] sm:$0xff] %vm4829_vm2, %v4802_v13 }
 0x8b9   : > { %v5273_v26 = vpop.f32.mrf.mxu3 }
 0x8ba   : > { %v5274_v63 = vadd.f32 %v9162_v47, %v5273_v26  ;;  %v5443_v8 = vpop.f32.mrf.mxu0 }
 0x8bb   : > { %v5444_v31 = vadd.f32 %v9183_v49, %v5443_v8  ;;  %v5617_v56 = vpop.f32.mrf.mxu1 }
 0x8bc   : > { %6449 = vst.msk [vmem:[%s9167_s18 + $0x1b0] sm:$0xff] %vm4829_vm2, %v5274_v63  ;;  %v5618_v3 = vadd.f32 %v9187_v7, %v5617_v56 }
 0x8bd   : > { %v4804_v53 = vpop.f32.mrf.mxu2  ;;  %6520 = vst.msk [vmem:[%s9167_s18 + $0x2a8] sm:$0xff] %vm4829_vm2, %v5444_v31 }
 0x8be   : > { %v4805_v46 = vadd.f32 %v9176_v51, %v4804_v53  ;;  %6592 = vst.msk [vmem:[%s9167_s18 + $0x3a8] sm:$0xff] %vm4829_vm2, %v5618_v3 }
 0x8c0   : > { %4852 = vst.msk [vmem:[%s9167_s18 + $0xb0] sm:$0xff] %vm4829_vm2, %v4805_v46 }
 0x8c1   : > { %v5275_v57 = vpop.f32.mrf.mxu3 }
 0x8c2   : > { %v5276_v41 = vadd.f32 %v9162_v47, %v5275_v57  ;;  %v5446_v35 = vpop.f32.mrf.mxu0 }
 0x8c3   : > { %v5447_v17 = vadd.f32 %v9183_v49, %v5446_v35  ;;  %v5620_v21 = vpop.f32.mrf.mxu1 }
 0x8c4   : > { %6450 = vst.msk [vmem:[%s9167_s18 + $0x1b8] sm:$0xff] %vm4829_vm2, %v5276_v41  ;;  %v5621_v50 = vadd.f32 %v9187_v7, %v5620_v21 }
 0x8c5   : > { %v4806_v22 = vpop.f32.mrf.mxu2  ;;  %6521 = vst.msk [vmem:[%s9167_s18 + $0x2b0] sm:$0xff] %vm4829_vm2, %v5447_v17 }
 0x8c6   : > { %v4807_v12 = vadd.f32 %v9176_v51, %v4806_v22  ;;  %6593 = vst.msk [vmem:[%s9167_s18 + $0x3b0] sm:$0xff] %vm4829_vm2, %v5621_v50 }
 0x8c8   : > { %4853 = vst.msk [vmem:[%s9167_s18 + $0xb8] sm:$0xff] %vm4829_vm2, %v4807_v12 }
 0x8c9   : > { %v5278_v39 = vpop.f32.mrf.mxu3 }
 0x8ca   : > { %v5279_v33 = vadd.f32 %v9162_v47, %v5278_v39  ;;  %v5448_v4 = vpop.f32.mrf.mxu0 }
 0x8cb   : > { %v5449_v62 = vadd.f32 %v9183_v49, %v5448_v4  ;;  %v5622_v23 = vpop.f32.mrf.mxu1 }
 0x8cc   : > { %6451 = vst.msk [vmem:[%s9167_s18 + $0x1c0] sm:$0xff] %vm4829_vm2, %v5279_v33  ;;  %v5623_v59 = vadd.f32 %v9187_v7, %v5622_v23 }
 0x8cd   : > { %v4809_v28 = vpop.f32.mrf.mxu2  ;;  %6522 = vst.msk [vmem:[%s9167_s18 + $0x2b8] sm:$0xff] %vm4829_vm2, %v5449_v62 }
 0x8ce   : > { %v4810_v14 = vadd.f32 %v9176_v51, %v4809_v28  ;;  %6594 = vst.msk [vmem:[%s9167_s18 + $0x3b8] sm:$0xff] %vm4829_vm2, %v5623_v59 }
 0x8d0   : > { %4854 = vst.msk [vmem:[%s9167_s18 + $0xc0] sm:$0xff] %vm4829_vm2, %v4810_v14 }
 0x8d1   : > { %v5280_v40 = vpop.f32.mrf.mxu3 }
 0x8d2   : > { %v5281_v25 = vadd.f32 %v9162_v47, %v5280_v40  ;;  %v5451_v36 = vpop.f32.mrf.mxu0 }
 0x8d3   : > { %v5452_v58 = vadd.f32 %v9183_v49, %v5451_v36  ;;  %v5625_v2 = vpop.f32.mrf.mxu1 }
 0x8d4   : > { %6452 = vst.msk [vmem:[%s9167_s18 + $0x1c8] sm:$0xff] %vm4829_vm2, %v5281_v25  ;;  %v5626_v11 = vadd.f32 %v9187_v7, %v5625_v2 }
 0x8d5   : > { %v4811_v10 = vpop.f32.mrf.mxu2  ;;  %6523 = vst.msk [vmem:[%s9167_s18 + $0x2c0] sm:$0xff] %vm4829_vm2, %v5452_v58 }
 0x8d6   : > { %v4812_v38 = vadd.f32 %v9176_v51, %v4811_v10  ;;  %6595 = vst.msk [vmem:[%s9167_s18 + $0x3c0] sm:$0xff] %vm4829_vm2, %v5626_v11 }
 0x8d8   : > { %4855 = vst.msk [vmem:[%s9167_s18 + $0xc8] sm:$0xff] %vm4829_vm2, %v4812_v38 }
 0x8d9   : > { %v5283_v60 = vpop.f32.mrf.mxu3 }
 0x8da   : > { %v5284_v32 = vadd.f32 %v9162_v47, %v5283_v60  ;;  %v5453_v19 = vpop.f32.mrf.mxu0 }
 0x8db   : > { %v5454_v29 = vadd.f32 %v9183_v49, %v5453_v19  ;;  %v5627_v9 = vpop.f32.mrf.mxu1 }
 0x8dc   : > { %6453 = vst.msk [vmem:[%s9167_s18 + $0x1d0] sm:$0xff] %vm4829_vm2, %v5284_v32  ;;  %v5628_v18 = vadd.f32 %v9187_v7, %v5627_v9 }
 0x8dd   : > { %v4814_v44 = vpop.f32.mrf.mxu2  ;;  %6524 = vst.msk [vmem:[%s9167_s18 + $0x2c8] sm:$0xff] %vm4829_vm2, %v5454_v29 }
 0x8de   : > { %v4815_v55 = vadd.f32 %v9176_v51, %v4814_v44  ;;  %6596 = vst.msk [vmem:[%s9167_s18 + $0x3c8] sm:$0xff] %vm4829_vm2, %v5628_v18 }
 0x8e0   : > { %4856 = vst.msk [vmem:[%s9167_s18 + $0xd0] sm:$0xff] %vm4829_vm2, %v4815_v55 }
 0x8e1   : > { %v5285_v16 = vpop.f32.mrf.mxu3 }
 0x8e2   : > { %v5286_v43 = vadd.f32 %v9162_v47, %v5285_v16  ;;  %v5456_v15 = vpop.f32.mrf.mxu0 }
 0x8e3   : > { %v5457_v52 = vadd.f32 %v9183_v49, %v5456_v15  ;;  %v5630_v5 = vpop.f32.mrf.mxu1 }
 0x8e4   : > { %6454 = vst.msk [vmem:[%s9167_s18 + $0x1d8] sm:$0xff] %vm4829_vm2, %v5286_v43  ;;  %v5631_v34 = vadd.f32 %v9187_v7, %v5630_v5 }
 0x8e5   : > { %v4816_v0 = vpop.f32.mrf.mxu2  ;;  %6525 = vst.msk [vmem:[%s9167_s18 + $0x2d0] sm:$0xff] %vm4829_vm2, %v5457_v52 }
 0x8e6   : > { %v4817_v54 = vadd.f32 %v9176_v51, %v4816_v0  ;;  %6597 = vst.msk [vmem:[%s9167_s18 + $0x3d0] sm:$0xff] %vm4829_vm2, %v5631_v34 }
 0x8e8   : > { %4857 = vst.msk [vmem:[%s9167_s18 + $0xd8] sm:$0xff] %vm4829_vm2, %v4817_v54 }
 0x8e9   : > { %v5288_v27 = vpop.f32.mrf.mxu3 }
 0x8ea   : > { %v5289_v30 = vadd.f32 %v9162_v47, %v5288_v27  ;;  %v5458_v20 = vpop.f32.mrf.mxu0 }
 0x8eb   : > { %v5459_v61 = vadd.f32 %v9183_v49, %v5458_v20  ;;  %v5632_v37 = vpop.f32.mrf.mxu1 }
 0x8ec   : > { %6455 = vst.msk [vmem:[%s9167_s18 + $0x1e0] sm:$0xff] %vm4829_vm2, %v5289_v30  ;;  %v5633_v48 = vadd.f32 %v9187_v7, %v5632_v37 }
 0x8ed   : > { %v4819_v6 = vpop.f32.mrf.mxu2  ;;  %6526 = vst.msk [vmem:[%s9167_s18 + $0x2d8] sm:$0xff] %vm4829_vm2, %v5459_v61 }
 0x8ee   : > { %v4820_v24 = vadd.f32 %v9176_v51, %v4819_v6  ;;  %6598 = vst.msk [vmem:[%s9167_s18 + $0x3d8] sm:$0xff] %vm4829_vm2, %v5633_v48 }
 0x8f0   : > { %4858 = vst.msk [vmem:[%s9167_s18 + $0xe0] sm:$0xff] %vm4829_vm2, %v4820_v24 }
 0x8f1   : > { %v5290_v1 = vpop.f32.mrf.mxu3 }
 0x8f2   : > { %v5291_v42 = vadd.f32 %v9162_v47, %v5290_v1  ;;  %v5461_v45 = vpop.f32.mrf.mxu0 }
 0x8f3   : > { %v5462_v13 = vadd.f32 %v9183_v49, %v5461_v45  ;;  %v5635_v26 = vpop.f32.mrf.mxu1 }
 0x8f4   : > { %6456 = vst.msk [vmem:[%s9167_s18 + $0x1e8] sm:$0xff] %vm4829_vm2, %v5291_v42  ;;  %v5636_v63 = vadd.f32 %v9187_v7, %v5635_v26 }
 0x8f5   : > { %v4821_v8 = vpop.f32.mrf.mxu2  ;;  %6527 = vst.msk [vmem:[%s9167_s18 + $0x2e0] sm:$0xff] %vm4829_vm2, %v5462_v13 }
 0x8f6   : > { %v4822_v31 = vadd.f32 %v9176_v51, %v4821_v8  ;;  %6599 = vst.msk [vmem:[%s9167_s18 + $0x3e0] sm:$0xff] %vm4829_vm2, %v5636_v63 }
 0x8f8   : > { %4859 = vst.msk [vmem:[%s9167_s18 + $0xe8] sm:$0xff] %vm4829_vm2, %v4822_v31 }
 0x8f9   : > { %v5293_v56 = vpop.f32.mrf.mxu3 }
 0x8fa   : > { %v5294_v3 = vadd.f32 %v9162_v47, %v5293_v56  ;;  %v5463_v53 = vpop.f32.mrf.mxu0 }
 0x8fb   : > { %v5464_v46 = vadd.f32 %v9183_v49, %v5463_v53  ;;  %v5637_v57 = vpop.f32.mrf.mxu1 }
 0x8fc   : > { %6457 = vst.msk [vmem:[%s9167_s18 + $0x1f0] sm:$0xff] %vm4829_vm2, %v5294_v3  ;;  %v5638_v41 = vadd.f32 %v9187_v7, %v5637_v57 }
 0x8fd   : > { %v4824_v35 = vpop.f32.mrf.mxu2  ;;  %6528 = vst.msk [vmem:[%s9167_s18 + $0x2e8] sm:$0xff] %vm4829_vm2, %v5464_v46 }
 0x8fe   : > { %v4825_v17 = vadd.f32 %v9176_v51, %v4824_v35  ;;  %6600 = vst.msk [vmem:[%s9167_s18 + $0x3e8] sm:$0xff] %vm4829_vm2, %v5638_v41 }
 0x900   : > { %4860 = vst.msk [vmem:[%s9167_s18 + $0xf0] sm:$0xff] %vm4829_vm2, %v4825_v17 }
 0x901   : > { %v5295_v21 = vpop.f32.mrf.mxu3 }
 0x902   : > { %v5296_v50 = vadd.f32 %v9162_v47, %v5295_v21  ;;  %v5466_v22 = vpop.f32.mrf.mxu0 }
 0x903   : > { %v5467_v12 = vadd.f32 %v9183_v49, %v5466_v22  ;;  %v5640_v39 = vpop.f32.mrf.mxu1 }
 0x904   : > { %6458 = vst.msk [vmem:[%s9167_s18 + $0x1f8] sm:$0xff] %vm4829_vm2, %v5296_v50  ;;  %v5641_v33 = vadd.f32 %v9187_v7, %v5640_v39 }
 0x905   : > { %v4826_v4 = vpop.f32.mrf.mxu2  ;;  %6529 = vst.msk [vmem:[%s9167_s18 + $0x2f0] sm:$0xff] %vm4829_vm2, %v5467_v12 }
 0x906   : > { %v4827_v62 = vadd.f32 %v9176_v51, %v4826_v4  ;;  %6601 = vst.msk [vmem:[%s9167_s18 + $0x3f0] sm:$0xff] %vm4829_vm2, %v5641_v33 }
 0x908   : > { %4861 = vst.msk [vmem:[%s9167_s18 + $0xf8] sm:$0xff] %vm4829_vm2, %v4827_v62 }
 0x90a   : > { %v5468_v23 = vpop.f32.mrf.mxu0 }
 0x90b   : > { %v5469_v47 = vadd.f32 %v9183_v49, %v5468_v23  ;;  %v5642_v59 = vpop.f32.mrf.mxu1 }
 0x90c   : > { %v5643_v28 = vadd.f32 %v9187_v7, %v5642_v59 }
 0x90d   : > { %6530 = vst.msk [vmem:[%s9167_s18 + $0x2f8] sm:$0xff] %vm4829_vm2, %v5469_v47 }
 0x90e   : > { %6602 = vst.msk [vmem:[%s9167_s18 + $0x3f8] sm:$0xff] %vm4829_vm2, %v5643_v28 }
 0x90f PF: > { %s23_s13 = sadd.s32 1, %s6992_s13  }
 0x910   : > { %p20_p7 = scmp.ge.s32.totalorder %s23_s13, 4  }
 0x912   :  { %22 = sbr.rel (!%p20_p7) target bundleno = 3 (0x3), region = 122 }
 0x917   :  { %5699 = vsyncpa [#allocation3], 1 }
 0x918   :  { %5701 = vsyncpa [#allocation3 + $0x1], 1 }
 0x919   :  { %5702 = vsyncpa [#allocation5], 1 }
 0x91a   :  { %5703 = vsyncpa [#allocation8], 1 }

</bundles_post_ra>
